<compile_context>
chip_gen: v6e
topology: v6e:2x2x1
jax: 0.10.0
libtpu: 0.0.40
codegen_flags: <defaults>
</compile_context>

<pallas_src>
import functools

import jax
import jax.numpy as jnp
from jax.experimental import pallas as pl
from jax.experimental.pallas import tpu as pltpu

# ---- hyper-parameters (mirror the PyTorch spec) ----
N_EMBD = 32
N_HEAD = 4
HEAD_SIZE = N_EMBD // N_HEAD
BLOCK_SIZE = 32          # positional table size / max sequence length
N_LAYER = 4
VOCAB_SIZE = 65          # stand-in for len(set(text)) in the spec
VOCAB_PAD = 128          # lane-dense padding for the embedding gather + lm_head store
LN_EPS = 1e-5


# ---------------------------------------------------------------------------
# kernel helpers
# ---------------------------------------------------------------------------
def _layernorm(y, g, b):
    mu = jnp.mean(y, axis=-1, keepdims=True)
    var = jnp.mean((y - mu) ** 2, axis=-1, keepdims=True)
    return (y - mu) * jax.lax.rsqrt(var + LN_EPS) * g + b


def _mm(a, b):
    return jnp.dot(a, b, preferred_element_type=jnp.float32)


def _mm_nt(a, b):
    # a @ b.T expressed directly via dot_general (no explicit transpose op)
    return jax.lax.dot_general(a, b, (((1,), (1,)), ((), ())),
                               preferred_element_type=jnp.float32)


# ---------------------------------------------------------------------------
# fused whole-model kernel
# ---------------------------------------------------------------------------
def gpt_kernel(idx_ref, tok_ref, pos_ref,
               wqkv_ref, wproj_ref, w1_ref, w2_ref, vec_ref,
               w1f_ref, w2f_ref, wlm_ref, fvec_ref,
               out_ref, *, B, T):
    C, H, D = N_EMBD, N_HEAD, HEAD_SIZE
    BT = B * T
    Vp = tok_ref.shape[0]                  # padded vocab (lane-dense, 128)
    L = wqkv_ref.shape[0]
    f32 = jnp.float32

    # ---- embeddings: gathers expressed as one-hot matmuls (MXU, no dynamic gather) ----
    idx = idx_ref[...]                                                    # (BT, 1) int32
    tok_oh = (idx == jax.lax.broadcasted_iota(jnp.int32, (BT, Vp), 1)).astype(f32)
    x = _mm(tok_oh, tok_ref[...])                                         # (BT, C)

    rp = jax.lax.broadcasted_iota(jnp.int32, (BT, BLOCK_SIZE), 0)
    cp = jax.lax.broadcasted_iota(jnp.int32, (BT, BLOCK_SIZE), 1)
    pos_oh = functools.reduce(
        jnp.logical_or,
        [(rp >= b * T) & (rp < (b + 1) * T) & (cp == rp - b * T) for b in range(B)])
    x = x + _mm(pos_oh.astype(f32), pos_ref[...])                         # + pos_emb

    # ---- masks, hoisted once for all layers / heads ----
    r = jax.lax.broadcasted_iota(jnp.int32, (BT, BT), 0)
    c = jax.lax.broadcasted_iota(jnp.int32, (BT, BT), 1)
    same_batch = functools.reduce(
        jnp.logical_or,
        [(r >= b * T) & (r < (b + 1) * T) & (c >= b * T) & (c < (b + 1) * T)
         for b in range(B)])
    allowed = same_batch & (r >= c)        # block-diagonal causal mask over (B*T, B*T)
    lane = jax.lax.broadcasted_iota(jnp.int32, (1, C), 1)
    head_masks = [((lane >= h * D) & (lane < (h + 1) * D)).astype(f32) for h in range(H)]

    for l in range(L):                     # layers unrolled; all weights resident in VMEM
        wqkv, wproj, w1, w2 = wqkv_ref[l], wproj_ref[l], w1_ref[l], w2_ref[l]
        vec = vec_ref[l]
        b1, bproj, b2 = vec[0:1, :], vec[1:2, :C], vec[2:3, :C]
        g1, be1, g2, be2 = vec[3:4, :C], vec[4:5, :C], vec[5:6, :C], vec[6:7, :C]

        # --- self-attention (pre-LN) ---
        xn = _layernorm(x, g1, be1)
        qkv = _mm(xn, wqkv)                # (BT, 3C); 1/sqrt(D) folded into Wq
        q, k, v = qkv[:, :C], qkv[:, C:2 * C], qkv[:, 2 * C:]

        o = jnp.zeros((BT, C), f32)
        for h in range(H):                 # heads via lane masks: no slicing/concat of heads
            hm = head_masks[h]             # (1, C)
            s = _mm_nt(q * hm, k)          # (BT, BT); only head-h channels contribute
            s = jnp.where(allowed, s, -jnp.inf)
            m = jnp.max(s, axis=-1, keepdims=True)
            e = jnp.exp(s - m)
            p = e * pl.reciprocal(jnp.sum(e, axis=-1, keepdims=True), approx=False)
            o = o + _mm(p, v * hm)         # lands in head-h lanes of the (BT, C) slab
        # TODO(synk): attention / residual / MLP dropout omitted (eval-mode identity).

        x = x + _mm(o, wproj) + bproj

        # --- feed-forward (pre-LN) ---
        xn2 = _layernorm(x, g2, be2)
        h1 = jnp.maximum(_mm(xn2, w1) + b1, 0.0)
        x = x + _mm(h1, w2) + b2

    # ---- final LayerNorm + FeedForward + lm_head (lane-dense padded output) ----
    fvec = fvec_ref[...]
    b1f, gf, bef = fvec[0:1, :], fvec[1:2, :C], fvec[2:3, :C]
    b2f, blm = fvec[3:4, :C], fvec[4:5, :]                    # blm padded to 128 lanes

    x = _layernorm(x, gf, bef)
    h1 = jnp.maximum(_mm(x, w1f_ref[...]) + b1f, 0.0)
    x = _mm(h1, w2f_ref[...]) + b2f                           # model-level ffwd (no residual)
    out_ref[...] = (_mm(x, wlm_ref[...]) + blm).astype(out_ref.dtype)


# ---------------------------------------------------------------------------
# wrapper
# ---------------------------------------------------------------------------
@jax.jit
def gpt_forward(idx, packed):
    (tok, pos, wqkv_all, wproj_all, w1_all, w2_all, vec_all,
     w1f, w2f, wlm, fvec) = packed
    B, T = idx.shape
    assert T <= BLOCK_SIZE
    BT = B * T
    Vp = wlm.shape[1]                       # padded vocab width (128)

    idx2 = idx.reshape(BT, 1).astype(jnp.int32)
    operands = (idx2, tok, pos, wqkv_all, wproj_all, w1_all, w2_all,
                vec_all, w1f, w2f, wlm, fvec)

    def full_spec(a):
        nd = a.ndim
        return pl.BlockSpec(a.shape, lambda i, nd=nd: (0,) * nd)

    logits = pl.pallas_call(
        functools.partial(gpt_kernel, B=B, T=T),
        out_shape=jax.ShapeDtypeStruct((BT, Vp), jnp.float32),
        grid_spec=pltpu.PrefetchScalarGridSpec(
            num_scalar_prefetch=0,
            grid=(1,),                                   # single fused step: whole model
            in_specs=[full_spec(a) for a in operands],
            out_specs=pl.BlockSpec((BT, Vp), lambda i: (0, 0)),
        ),
        compiler_params=pltpu.CompilerParams(
            dimension_semantics=("arbitrary",)),
    )(*operands)
    return logits[:, :VOCAB_SIZE].reshape(B, T, VOCAB_SIZE)


# ---------------------------------------------------------------------------
# parameters: raw (reference layout) and packed (kernel layout)
# ---------------------------------------------------------------------------
def init_raw_params(key, vocab_size=VOCAB_SIZE, n_layer=N_LAYER):
    C = N_EMBD
    s = 0.02
    keys = iter(jax.random.split(key, 2 + 9 * n_layer + 6))
    nrm = lambda shape: jax.random.normal(next(keys), shape, jnp.float32) * s
    tok = nrm((vocab_size, C))
    pos = nrm((BLOCK_SIZE, C))
    layers = []
    for _ in range(n_layer):
        layers.append(dict(
            wq=nrm((C, C)), wk=nrm((C, C)), wv=nrm((C, C)),
            wproj=nrm((C, C)), bproj=nrm((C,)),
            w1=nrm((C, 4 * C)), b1=nrm((4 * C,)),
            w2=nrm((4 * C, C)), b2=nrm((C,)),
            g1=jnp.ones((C,), jnp.float32), be1=jnp.zeros((C,), jnp.float32),
            g2=jnp.ones((C,), jnp.float32), be2=jnp.zeros((C,), jnp.float32)))
    return dict(
        tok=tok, pos=pos, layers=layers,
        gf=jnp.ones((C,), jnp.float32), bef=jnp.zeros((C,), jnp.float32),
        w1f=nrm((C, 4 * C)), b1f=nrm((4 * C,)),
        w2f=nrm((4 * C, C)), b2f=nrm((C,)),
        wlm=nrm((C, vocab_size)), blm=nrm((vocab_size,)))


def pack_params(raw):
    C = N_EMBD
    scale = HEAD_SIZE ** -0.5
    V = raw["wlm"].shape[1]
    assert V <= VOCAB_PAD and VOCAB_PAD == 4 * C

    def pad(v, width=4 * C):
        return jnp.zeros((width,), jnp.float32).at[:v.shape[0]].set(v)

    # lane-dense padded embedding table and lm_head weight (extra rows/cols are zero)
    tok_pad = jnp.zeros((VOCAB_PAD, C), jnp.float32).at[:V, :].set(raw["tok"])
    wlm_pad = jnp.zeros((C, VOCAB_PAD), jnp.float32).at[:, :V].set(raw["wlm"])

    wqkv_all = jnp.stack([jnp.concatenate(
        [l["wq"] * scale, l["wk"], l["wv"]], axis=1) for l in raw["layers"]])
    wproj_all = jnp.stack([l["wproj"] for l in raw["layers"]])
    w1_all = jnp.stack([l["w1"] for l in raw["layers"]])
    w2_all = jnp.stack([l["w2"] for l in raw["layers"]])
    vec_all = jnp.stack([jnp.stack(
        [pad(l["b1"]), pad(l["bproj"]), pad(l["b2"]),
         pad(l["g1"]), pad(l["be1"]), pad(l["g2"]), pad(l["be2"]),
         jnp.zeros((4 * C,), jnp.float32)]) for l in raw["layers"]])   # (L, 8, 4C)
    fvec = jnp.stack([pad(raw["b1f"]), pad(raw["gf"]), pad(raw["bef"]),
                      pad(raw["b2f"]), pad(raw["blm"]),
                      jnp.zeros((4 * C,), jnp.float32),
                      jnp.zeros((4 * C,), jnp.float32),
                      jnp.zeros((4 * C,), jnp.float32)])               # (8, 4C)
    return (tok_pad, raw["pos"], wqkv_all, wproj_all, w1_all, w2_all,
            vec_all, raw["w1f"], raw["w2f"], wlm_pad, fvec)


# ---------------------------------------------------------------------------
# pure-JAX reference (mirrors the PyTorch forward in eval mode, targets=None)
# ---------------------------------------------------------------------------
def gpt_reference(idx, raw):
    B, T = idx.shape
    C, H, D = N_EMBD, N_HEAD, HEAD_SIZE

    def ln(y, g, b):
        mu = jnp.mean(y, axis=-1, keepdims=True)
        var = jnp.mean((y - mu) ** 2, axis=-1, keepdims=True)
        return (y - mu) / jnp.sqrt(var + LN_EPS) * g + b

    x = raw["tok"][idx] + raw["pos"][:T]
    mask = jnp.tril(jnp.ones((T, T), bool))
    for l in raw["layers"]:
        xn = ln(x, l["g1"], l["be1"])
        q, k, v = xn @ l["wq"], xn @ l["wk"], xn @ l["wv"]
        qh = q.reshape(B, T, H, D).transpose(0, 2, 1, 3)
        kh = k.reshape(B, T, H, D).transpose(0, 2, 1, 3)
        vh = v.reshape(B, T, H, D).transpose(0, 2, 1, 3)
        s = jnp.einsum("bhqd,bhkd->bhqk", qh, kh) * D ** -0.5
        s = jnp.where(mask, s, -jnp.inf)
        p = jax.nn.softmax(s, axis=-1)
        o = jnp.einsum("bhqk,bhkd->bhqd", p, vh).transpose(0, 2, 1, 3).reshape(B, T, C)
        x = x + o @ l["wproj"] + l["bproj"]
        xn2 = ln(x, l["g2"], l["be2"])
        x = x + jnp.maximum(xn2 @ l["w1"] + l["b1"], 0.0) @ l["w2"] + l["b2"]
    x = ln(x, raw["gf"], raw["bef"])
    x = jnp.maximum(x @ raw["w1f"] + raw["b1f"], 0.0) @ raw["w2f"] + raw["b2f"]
    return x @ raw["wlm"] + raw["blm"]


if __name__ == "__main__":
    key = jax.random.PRNGKey(0)
    kp, ki = jax.random.split(key)
    B, T = 2, 8

    raw = init_raw_params(kp)
    packed = pack_params(raw)
    idx = jax.random.randint(ki, (B, T), 0, VOCAB_SIZE, dtype=jnp.int32)

    logits = gpt_forward(idx, packed)
    jax.block_until_ready(logits)

    ref = gpt_reference(idx, raw)
    assert logits.shape == (B, T, VOCAB_SIZE)
    max_err = float(jnp.max(jnp.abs(logits - ref)))
    assert jnp.allclose(logits, ref, atol=1e-4, rtol=1e-4), max_err

    print("KERNEL_OK")
</pallas_src>

<mosaic_0001>
module attributes {stable_mosaic.version = 11 : i64} {
  func.func @gpt_kernel(%arg0: i32, %arg1: memref<16x1xi32, #tpu.memory_space<vmem>>, %arg2: memref<128x32xf32, #tpu.memory_space<vmem>>, %arg3: memref<32x32xf32, #tpu.memory_space<vmem>>, %arg4: memref<4x32x96xf32, #tpu.memory_space<vmem>>, %arg5: memref<4x32x32xf32, #tpu.memory_space<vmem>>, %arg6: memref<4x32x128xf32, #tpu.memory_space<vmem>>, %arg7: memref<4x128x32xf32, #tpu.memory_space<vmem>>, %arg8: memref<4x8x128xf32, #tpu.memory_space<vmem>>, %arg9: memref<32x128xf32, #tpu.memory_space<vmem>>, %arg10: memref<128x32xf32, #tpu.memory_space<vmem>>, %arg11: memref<32x128xf32, #tpu.memory_space<vmem>>, %arg12: memref<8x128xf32, #tpu.memory_space<vmem>>, %arg13: memref<16x128xf32, #tpu.memory_space<vmem>>) attributes {dimension_semantics = [#tpu.dimension_semantics<arbitrary>], iteration_bounds = array<i64: 1>, scalar_prefetch = 0 : i64, scratch_operands = 0 : i64, tpu.core_type = #tpu.core_type<tc>, window_params = [{pipeline_mode = #tpu.pipeline_mode<synchronous>, transform_indices = @transform_0, window_bounds = array<i64: 16, 1>}, {pipeline_mode = #tpu.pipeline_mode<synchronous>, transform_indices = @transform_1, window_bounds = array<i64: 128, 32>}, {pipeline_mode = #tpu.pipeline_mode<synchronous>, transform_indices = @transform_2, window_bounds = array<i64: 32, 32>}, {pipeline_mode = #tpu.pipeline_mode<synchronous>, transform_indices = @transform_3, window_bounds = array<i64: 4, 32, 96>}, {pipeline_mode = #tpu.pipeline_mode<synchronous>, transform_indices = @transform_4, window_bounds = array<i64: 4, 32, 32>}, {pipeline_mode = #tpu.pipeline_mode<synchronous>, transform_indices = @transform_5, window_bounds = array<i64: 4, 32, 128>}, {pipeline_mode = #tpu.pipeline_mode<synchronous>, transform_indices = @transform_6, window_bounds = array<i64: 4, 128, 32>}, {pipeline_mode = #tpu.pipeline_mode<synchronous>, transform_indices = @transform_7, window_bounds = array<i64: 4, 8, 128>}, {pipeline_mode = #tpu.pipeline_mode<synchronous>, transform_indices = @transform_8, window_bounds = array<i64: 32, 128>}, {pipeline_mode = #tpu.pipeline_mode<synchronous>, transform_indices = @transform_9, window_bounds = array<i64: 128, 32>}, {pipeline_mode = #tpu.pipeline_mode<synchronous>, transform_indices = @transform_10, window_bounds = array<i64: 32, 128>}, {pipeline_mode = #tpu.pipeline_mode<synchronous>, transform_indices = @transform_11, window_bounds = array<i64: 8, 128>}, {pipeline_mode = #tpu.pipeline_mode<synchronous>, transform_indices = @transform_12, window_bounds = array<i64: 16, 128>}]} {
    %c0 = arith.constant 0 : index
    %c0_0 = arith.constant 0 : index
    %0 = vector.load %arg1[%c0, %c0_0] : memref<16x1xi32, #tpu.memory_space<vmem>>, vector<16x1xi32>
    %1 = tpu.iota {dimensions = array<i32: 1>} : vector<16x128xi32>
    %2 = vector.broadcast %0 : vector<16x1xi32> to vector<16x128xi32>
    %3 = arith.cmpi eq, %2, %1 : vector<16x128xi32>
    %4 = arith.extui %3 : vector<16x128xi1> to vector<16x128xi32>
    %5 = arith.sitofp %4 : vector<16x128xi32> to vector<16x128xf32>
    %c0_1 = arith.constant 0 : index
    %c0_2 = arith.constant 0 : index
    %6 = vector.load %arg2[%c0_1, %c0_2] : memref<128x32xf32, #tpu.memory_space<vmem>>, vector<128x32xf32>
    %cst = arith.constant dense<0.000000e+00> : vector<16x32xf32>
    %7 = tpu.matmul %5, %6, %cst {dimension_numbers = #tpu.dot_dimension_numbers<[1], [0], [0], [1], [0, 0, 1, 1], [], []>} : vector<16x128xf32>, vector<128x32xf32>, vector<16x32xf32> -> vector<16x32xf32>
    %8 = tpu.iota {dimensions = array<i32: 0>} : vector<16x32xi32>
    %9 = tpu.iota {dimensions = array<i32: 1>} : vector<16x32xi32>
    %c0_i32 = arith.constant 0 : i32
    %10 = vector.broadcast %c0_i32 : i32 to vector<16x32xi32>
    %11 = arith.cmpi sge, %8, %10 : vector<16x32xi32>
    %c8_i32 = arith.constant 8 : i32
    %12 = vector.broadcast %c8_i32 : i32 to vector<16x32xi32>
    %13 = arith.cmpi slt, %8, %12 : vector<16x32xi32>
    %14 = arith.andi %11, %13 : vector<16x32xi1>
    %c0_i32_3 = arith.constant 0 : i32
    %15 = vector.broadcast %c0_i32_3 : i32 to vector<16x32xi32>
    %16 = arith.subi %8, %15 : vector<16x32xi32>
    %17 = arith.cmpi eq, %9, %16 : vector<16x32xi32>
    %18 = arith.andi %14, %17 : vector<16x32xi1>
    %c8_i32_4 = arith.constant 8 : i32
    %19 = vector.broadcast %c8_i32_4 : i32 to vector<16x32xi32>
    %20 = arith.cmpi sge, %8, %19 : vector<16x32xi32>
    %c16_i32 = arith.constant 16 : i32
    %21 = vector.broadcast %c16_i32 : i32 to vector<16x32xi32>
    %22 = arith.cmpi slt, %8, %21 : vector<16x32xi32>
    %23 = arith.andi %20, %22 : vector<16x32xi1>
    %c8_i32_5 = arith.constant 8 : i32
    %24 = vector.broadcast %c8_i32_5 : i32 to vector<16x32xi32>
    %25 = arith.subi %8, %24 : vector<16x32xi32>
    %26 = arith.cmpi eq, %9, %25 : vector<16x32xi32>
    %27 = arith.andi %23, %26 : vector<16x32xi1>
    %28 = arith.ori %18, %27 : vector<16x32xi1>
    %29 = arith.extui %28 : vector<16x32xi1> to vector<16x32xi32>
    %30 = arith.sitofp %29 : vector<16x32xi32> to vector<16x32xf32>
    %c0_6 = arith.constant 0 : index
    %c0_7 = arith.constant 0 : index
    %31 = vector.load %arg3[%c0_6, %c0_7] : memref<32x32xf32, #tpu.memory_space<vmem>>, vector<32x32xf32>
    %cst_8 = arith.constant dense<0.000000e+00> : vector<16x32xf32>
    %32 = tpu.matmul %30, %31, %cst_8 {dimension_numbers = #tpu.dot_dimension_numbers<[1], [0], [0], [1], [0, 0, 1, 1], [], []>} : vector<16x32xf32>, vector<32x32xf32>, vector<16x32xf32> -> vector<16x32xf32>
    %33 = arith.addf %7, %32 : vector<16x32xf32>
    %34 = tpu.iota {dimensions = array<i32: 0>} : vector<16x16xi32>
    %35 = tpu.iota {dimensions = array<i32: 1>} : vector<16x16xi32>
    %c0_i32_9 = arith.constant 0 : i32
    %36 = vector.broadcast %c0_i32_9 : i32 to vector<16x16xi32>
    %37 = arith.cmpi sge, %34, %36 : vector<16x16xi32>
    %c8_i32_10 = arith.constant 8 : i32
    %38 = vector.broadcast %c8_i32_10 : i32 to vector<16x16xi32>
    %39 = arith.cmpi slt, %34, %38 : vector<16x16xi32>
    %40 = arith.andi %37, %39 : vector<16x16xi1>
    %c0_i32_11 = arith.constant 0 : i32
    %41 = vector.broadcast %c0_i32_11 : i32 to vector<16x16xi32>
    %42 = arith.cmpi sge, %35, %41 : vector<16x16xi32>
    %43 = arith.andi %40, %42 : vector<16x16xi1>
    %c8_i32_12 = arith.constant 8 : i32
    %44 = vector.broadcast %c8_i32_12 : i32 to vector<16x16xi32>
    %45 = arith.cmpi slt, %35, %44 : vector<16x16xi32>
    %46 = arith.andi %43, %45 : vector<16x16xi1>
    %c8_i32_13 = arith.constant 8 : i32
    %47 = vector.broadcast %c8_i32_13 : i32 to vector<16x16xi32>
    %48 = arith.cmpi sge, %34, %47 : vector<16x16xi32>
    %c16_i32_14 = arith.constant 16 : i32
    %49 = vector.broadcast %c16_i32_14 : i32 to vector<16x16xi32>
    %50 = arith.cmpi slt, %34, %49 : vector<16x16xi32>
    %51 = arith.andi %48, %50 : vector<16x16xi1>
    %c8_i32_15 = arith.constant 8 : i32
    %52 = vector.broadcast %c8_i32_15 : i32 to vector<16x16xi32>
    %53 = arith.cmpi sge, %35, %52 : vector<16x16xi32>
    %54 = arith.andi %51, %53 : vector<16x16xi1>
    %c16_i32_16 = arith.constant 16 : i32
    %55 = vector.broadcast %c16_i32_16 : i32 to vector<16x16xi32>
    %56 = arith.cmpi slt, %35, %55 : vector<16x16xi32>
    %57 = arith.andi %54, %56 : vector<16x16xi1>
    %58 = arith.ori %46, %57 : vector<16x16xi1>
    %59 = arith.cmpi sge, %34, %35 : vector<16x16xi32>
    %60 = arith.andi %58, %59 : vector<16x16xi1>
    %61 = tpu.iota {dimensions = array<i32: 1>} : vector<1x32xi32>
    %c0_i32_17 = arith.constant 0 : i32
    %62 = vector.broadcast %c0_i32_17 : i32 to vector<1x32xi32>
    %63 = arith.cmpi sge, %61, %62 : vector<1x32xi32>
    %c8_i32_18 = arith.constant 8 : i32
    %64 = vector.broadcast %c8_i32_18 : i32 to vector<1x32xi32>
    %65 = arith.cmpi slt, %61, %64 : vector<1x32xi32>
    %66 = arith.andi %63, %65 : vector<1x32xi1>
    %67 = arith.extui %66 : vector<1x32xi1> to vector<1x32xi32>
    %68 = arith.sitofp %67 : vector<1x32xi32> to vector<1x32xf32>
    %c8_i32_19 = arith.constant 8 : i32
    %69 = vector.broadcast %c8_i32_19 : i32 to vector<1x32xi32>
    %70 = arith.cmpi sge, %61, %69 : vector<1x32xi32>
    %c16_i32_20 = arith.constant 16 : i32
    %71 = vector.broadcast %c16_i32_20 : i32 to vector<1x32xi32>
    %72 = arith.cmpi slt, %61, %71 : vector<1x32xi32>
    %73 = arith.andi %70, %72 : vector<1x32xi1>
    %74 = arith.extui %73 : vector<1x32xi1> to vector<1x32xi32>
    %75 = arith.sitofp %74 : vector<1x32xi32> to vector<1x32xf32>
    %c16_i32_21 = arith.constant 16 : i32
    %76 = vector.broadcast %c16_i32_21 : i32 to vector<1x32xi32>
    %77 = arith.cmpi sge, %61, %76 : vector<1x32xi32>
    %c24_i32 = arith.constant 24 : i32
    %78 = vector.broadcast %c24_i32 : i32 to vector<1x32xi32>
    %79 = arith.cmpi slt, %61, %78 : vector<1x32xi32>
    %80 = arith.andi %77, %79 : vector<1x32xi1>
    %81 = arith.extui %80 : vector<1x32xi1> to vector<1x32xi32>
    %82 = arith.sitofp %81 : vector<1x32xi32> to vector<1x32xf32>
    %c24_i32_22 = arith.constant 24 : i32
    %83 = vector.broadcast %c24_i32_22 : i32 to vector<1x32xi32>
    %84 = arith.cmpi sge, %61, %83 : vector<1x32xi32>
    %c32_i32 = arith.constant 32 : i32
    %85 = vector.broadcast %c32_i32 : i32 to vector<1x32xi32>
    %86 = arith.cmpi slt, %61, %85 : vector<1x32xi32>
    %87 = arith.andi %84, %86 : vector<1x32xi1>
    %88 = arith.extui %87 : vector<1x32xi1> to vector<1x32xi32>
    %89 = arith.sitofp %88 : vector<1x32xi32> to vector<1x32xf32>
    %c0_23 = arith.constant 0 : index
    %c0_24 = arith.constant 0 : index
    %c0_25 = arith.constant 0 : index
    %90 = vector.load %arg4[%c0_23, %c0_24, %c0_25] : memref<4x32x96xf32, #tpu.memory_space<vmem>>, vector<1x32x96xf32>
    %91 = vector.shape_cast %90 : vector<1x32x96xf32> to vector<32x96xf32>
    %c0_26 = arith.constant 0 : index
    %c0_27 = arith.constant 0 : index
    %c0_28 = arith.constant 0 : index
    %92 = vector.load %arg5[%c0_26, %c0_27, %c0_28] : memref<4x32x32xf32, #tpu.memory_space<vmem>>, vector<1x32x32xf32>
    %93 = vector.shape_cast %92 : vector<1x32x32xf32> to vector<32x32xf32>
    %c0_29 = arith.constant 0 : index
    %c0_30 = arith.constant 0 : index
    %c0_31 = arith.constant 0 : index
    %94 = vector.load %arg6[%c0_29, %c0_30, %c0_31] : memref<4x32x128xf32, #tpu.memory_space<vmem>>, vector<1x32x128xf32>
    %95 = vector.shape_cast %94 : vector<1x32x128xf32> to vector<32x128xf32>
    %c0_32 = arith.constant 0 : index
    %c0_33 = arith.constant 0 : index
    %c0_34 = arith.constant 0 : index
    %96 = vector.load %arg7[%c0_32, %c0_33, %c0_34] : memref<4x128x32xf32, #tpu.memory_space<vmem>>, vector<1x128x32xf32>
    %97 = vector.shape_cast %96 : vector<1x128x32xf32> to vector<128x32xf32>
    %c0_35 = arith.constant 0 : index
    %c0_36 = arith.constant 0 : index
    %c0_37 = arith.constant 0 : index
    %98 = vector.load %arg8[%c0_35, %c0_36, %c0_37] : memref<4x8x128xf32, #tpu.memory_space<vmem>>, vector<1x8x128xf32>
    %99 = vector.shape_cast %98 : vector<1x8x128xf32> to vector<8x128xf32>
    %100 = vector.extract_strided_slice %99 {offsets = [0, 0], sizes = [1, 128], strides = [1, 1]} : vector<8x128xf32> to vector<1x128xf32>
    %101 = vector.extract_strided_slice %99 {offsets = [1, 0], sizes = [1, 32], strides = [1, 1]} : vector<8x128xf32> to vector<1x32xf32>
    %102 = vector.extract_strided_slice %99 {offsets = [2, 0], sizes = [1, 32], strides = [1, 1]} : vector<8x128xf32> to vector<1x32xf32>
    %103 = vector.extract_strided_slice %99 {offsets = [3, 0], sizes = [1, 32], strides = [1, 1]} : vector<8x128xf32> to vector<1x32xf32>
    %104 = vector.extract_strided_slice %99 {offsets = [4, 0], sizes = [1, 32], strides = [1, 1]} : vector<8x128xf32> to vector<1x32xf32>
    %105 = vector.extract_strided_slice %99 {offsets = [5, 0], sizes = [1, 32], strides = [1, 1]} : vector<8x128xf32> to vector<1x32xf32>
    %106 = vector.extract_strided_slice %99 {offsets = [6, 0], sizes = [1, 32], strides = [1, 1]} : vector<8x128xf32> to vector<1x32xf32>
    %cst_38 = arith.constant dense<0.000000e+00> : vector<16xf32>
    %107 = vector.multi_reduction <add>, %33, %cst_38 [1] : vector<16x32xf32> to vector<16xf32>
    %108 = vector.shape_cast %107 : vector<16xf32> to vector<16x1xf32>
    %cst_39 = arith.constant 3.200000e+01 : f32
    %109 = vector.broadcast %cst_39 : f32 to vector<16x1xf32>
    %110 = arith.divf %108, %109 : vector<16x1xf32>
    %111 = vector.broadcast %110 : vector<16x1xf32> to vector<16x32xf32>
    %112 = arith.subf %33, %111 : vector<16x32xf32>
    %113 = arith.mulf %112, %112 : vector<16x32xf32>
    %cst_40 = arith.constant dense<0.000000e+00> : vector<16xf32>
    %114 = vector.multi_reduction <add>, %113, %cst_40 [1] : vector<16x32xf32> to vector<16xf32>
    %115 = vector.shape_cast %114 : vector<16xf32> to vector<16x1xf32>
    %cst_41 = arith.constant 3.200000e+01 : f32
    %116 = vector.broadcast %cst_41 : f32 to vector<16x1xf32>
    %117 = arith.divf %115, %116 : vector<16x1xf32>
    %118 = vector.broadcast %110 : vector<16x1xf32> to vector<16x32xf32>
    %119 = arith.subf %33, %118 : vector<16x32xf32>
    %cst_42 = arith.constant 9.99999974E-6 : f32
    %120 = vector.broadcast %cst_42 : f32 to vector<16x1xf32>
    %121 = arith.addf %117, %120 : vector<16x1xf32>
    %122 = math.rsqrt %121 : vector<16x1xf32>
    %123 = vector.broadcast %122 : vector<16x1xf32> to vector<16x32xf32>
    %124 = arith.mulf %119, %123 : vector<16x32xf32>
    %125 = vector.broadcast %103 : vector<1x32xf32> to vector<16x32xf32>
    %126 = arith.mulf %124, %125 : vector<16x32xf32>
    %127 = vector.broadcast %104 : vector<1x32xf32> to vector<16x32xf32>
    %128 = arith.addf %126, %127 : vector<16x32xf32>
    %cst_43 = arith.constant dense<0.000000e+00> : vector<16x96xf32>
    %129 = tpu.matmul %128, %91, %cst_43 {dimension_numbers = #tpu.dot_dimension_numbers<[1], [0], [0], [1], [0, 0, 1, 1], [], []>} : vector<16x32xf32>, vector<32x96xf32>, vector<16x96xf32> -> vector<16x96xf32>
    %130 = vector.extract_strided_slice %129 {offsets = [0, 0], sizes = [16, 32], strides = [1, 1]} : vector<16x96xf32> to vector<16x32xf32>
    %131 = vector.extract_strided_slice %129 {offsets = [0, 32], sizes = [16, 32], strides = [1, 1]} : vector<16x96xf32> to vector<16x32xf32>
    %132 = vector.extract_strided_slice %129 {offsets = [0, 64], sizes = [16, 32], strides = [1, 1]} : vector<16x96xf32> to vector<16x32xf32>
    %cst_44 = arith.constant 0.000000e+00 : f32
    %133 = vector.broadcast %cst_44 : f32 to vector<16x32xf32>
    %134 = vector.broadcast %68 : vector<1x32xf32> to vector<16x32xf32>
    %135 = arith.mulf %130, %134 : vector<16x32xf32>
    %cst_45 = arith.constant dense<0.000000e+00> : vector<16x16xf32>
    %136 = tpu.matmul %135, %131, %cst_45 {dimension_numbers = #tpu.dot_dimension_numbers<[1], [1], [0], [0], [0, 0, 1, 0], [], []>} : vector<16x32xf32>, vector<16x32xf32>, vector<16x16xf32> -> vector<16x16xf32>
    %cst_46 = arith.constant 0xFF800000 : f32
    %137 = vector.broadcast %cst_46 : f32 to vector<16x16xf32>
    %138 = arith.select %60, %136, %137 : vector<16x16xi1>, vector<16x16xf32>
    %cst_47 = arith.constant dense<0xFF800000> : vector<16xf32>
    %139 = vector.multi_reduction <maximumf>, %138, %cst_47 [1] : vector<16x16xf32> to vector<16xf32>
    %140 = vector.shape_cast %139 : vector<16xf32> to vector<16x1xf32>
    %141 = vector.broadcast %140 : vector<16x1xf32> to vector<16x16xf32>
    %142 = arith.subf %138, %141 : vector<16x16xf32>
    %143 = math.exp %142 : vector<16x16xf32>
    %cst_48 = arith.constant dense<0.000000e+00> : vector<16xf32>
    %144 = vector.multi_reduction <add>, %143, %cst_48 [1] : vector<16x16xf32> to vector<16xf32>
    %145 = vector.shape_cast %144 : vector<16xf32> to vector<16x1xf32>
    %146 = tpu.reciprocal %145 : vector<16x1xf32> -> vector<16x1xf32>
    %147 = vector.broadcast %146 : vector<16x1xf32> to vector<16x16xf32>
    %148 = arith.mulf %143, %147 : vector<16x16xf32>
    %149 = vector.broadcast %68 : vector<1x32xf32> to vector<16x32xf32>
    %150 = arith.mulf %132, %149 : vector<16x32xf32>
    %cst_49 = arith.constant dense<0.000000e+00> : vector<16x32xf32>
    %151 = tpu.matmul %148, %150, %cst_49 {dimension_numbers = #tpu.dot_dimension_numbers<[1], [0], [0], [1], [0, 0, 1, 1], [], []>} : vector<16x16xf32>, vector<16x32xf32>, vector<16x32xf32> -> vector<16x32xf32>
    %152 = arith.addf %133, %151 : vector<16x32xf32>
    %153 = vector.broadcast %75 : vector<1x32xf32> to vector<16x32xf32>
    %154 = arith.mulf %130, %153 : vector<16x32xf32>
    %cst_50 = arith.constant dense<0.000000e+00> : vector<16x16xf32>
    %155 = tpu.matmul %154, %131, %cst_50 {dimension_numbers = #tpu.dot_dimension_numbers<[1], [1], [0], [0], [0, 0, 1, 0], [], []>} : vector<16x32xf32>, vector<16x32xf32>, vector<16x16xf32> -> vector<16x16xf32>
    %cst_51 = arith.constant 0xFF800000 : f32
    %156 = vector.broadcast %cst_51 : f32 to vector<16x16xf32>
    %157 = arith.select %60, %155, %156 : vector<16x16xi1>, vector<16x16xf32>
    %cst_52 = arith.constant dense<0xFF800000> : vector<16xf32>
    %158 = vector.multi_reduction <maximumf>, %157, %cst_52 [1] : vector<16x16xf32> to vector<16xf32>
    %159 = vector.shape_cast %158 : vector<16xf32> to vector<16x1xf32>
    %160 = vector.broadcast %159 : vector<16x1xf32> to vector<16x16xf32>
    %161 = arith.subf %157, %160 : vector<16x16xf32>
    %162 = math.exp %161 : vector<16x16xf32>
    %cst_53 = arith.constant dense<0.000000e+00> : vector<16xf32>
    %163 = vector.multi_reduction <add>, %162, %cst_53 [1] : vector<16x16xf32> to vector<16xf32>
    %164 = vector.shape_cast %163 : vector<16xf32> to vector<16x1xf32>
    %165 = tpu.reciprocal %164 : vector<16x1xf32> -> vector<16x1xf32>
    %166 = vector.broadcast %165 : vector<16x1xf32> to vector<16x16xf32>
    %167 = arith.mulf %162, %166 : vector<16x16xf32>
    %168 = vector.broadcast %75 : vector<1x32xf32> to vector<16x32xf32>
    %169 = arith.mulf %132, %168 : vector<16x32xf32>
    %cst_54 = arith.constant dense<0.000000e+00> : vector<16x32xf32>
    %170 = tpu.matmul %167, %169, %cst_54 {dimension_numbers = #tpu.dot_dimension_numbers<[1], [0], [0], [1], [0, 0, 1, 1], [], []>} : vector<16x16xf32>, vector<16x32xf32>, vector<16x32xf32> -> vector<16x32xf32>
    %171 = arith.addf %152, %170 : vector<16x32xf32>
    %172 = vector.broadcast %82 : vector<1x32xf32> to vector<16x32xf32>
    %173 = arith.mulf %130, %172 : vector<16x32xf32>
    %cst_55 = arith.constant dense<0.000000e+00> : vector<16x16xf32>
    %174 = tpu.matmul %173, %131, %cst_55 {dimension_numbers = #tpu.dot_dimension_numbers<[1], [1], [0], [0], [0, 0, 1, 0], [], []>} : vector<16x32xf32>, vector<16x32xf32>, vector<16x16xf32> -> vector<16x16xf32>
    %cst_56 = arith.constant 0xFF800000 : f32
    %175 = vector.broadcast %cst_56 : f32 to vector<16x16xf32>
    %176 = arith.select %60, %174, %175 : vector<16x16xi1>, vector<16x16xf32>
    %cst_57 = arith.constant dense<0xFF800000> : vector<16xf32>
    %177 = vector.multi_reduction <maximumf>, %176, %cst_57 [1] : vector<16x16xf32> to vector<16xf32>
    %178 = vector.shape_cast %177 : vector<16xf32> to vector<16x1xf32>
    %179 = vector.broadcast %178 : vector<16x1xf32> to vector<16x16xf32>
    %180 = arith.subf %176, %179 : vector<16x16xf32>
    %181 = math.exp %180 : vector<16x16xf32>
    %cst_58 = arith.constant dense<0.000000e+00> : vector<16xf32>
    %182 = vector.multi_reduction <add>, %181, %cst_58 [1] : vector<16x16xf32> to vector<16xf32>
    %183 = vector.shape_cast %182 : vector<16xf32> to vector<16x1xf32>
    %184 = tpu.reciprocal %183 : vector<16x1xf32> -> vector<16x1xf32>
    %185 = vector.broadcast %184 : vector<16x1xf32> to vector<16x16xf32>
    %186 = arith.mulf %181, %185 : vector<16x16xf32>
    %187 = vector.broadcast %82 : vector<1x32xf32> to vector<16x32xf32>
    %188 = arith.mulf %132, %187 : vector<16x32xf32>
    %cst_59 = arith.constant dense<0.000000e+00> : vector<16x32xf32>
    %189 = tpu.matmul %186, %188, %cst_59 {dimension_numbers = #tpu.dot_dimension_numbers<[1], [0], [0], [1], [0, 0, 1, 1], [], []>} : vector<16x16xf32>, vector<16x32xf32>, vector<16x32xf32> -> vector<16x32xf32>
    %190 = arith.addf %171, %189 : vector<16x32xf32>
    %191 = vector.broadcast %89 : vector<1x32xf32> to vector<16x32xf32>
    %192 = arith.mulf %130, %191 : vector<16x32xf32>
    %cst_60 = arith.constant dense<0.000000e+00> : vector<16x16xf32>
    %193 = tpu.matmul %192, %131, %cst_60 {dimension_numbers = #tpu.dot_dimension_numbers<[1], [1], [0], [0], [0, 0, 1, 0], [], []>} : vector<16x32xf32>, vector<16x32xf32>, vector<16x16xf32> -> vector<16x16xf32>
    %cst_61 = arith.constant 0xFF800000 : f32
    %194 = vector.broadcast %cst_61 : f32 to vector<16x16xf32>
    %195 = arith.select %60, %193, %194 : vector<16x16xi1>, vector<16x16xf32>
    %cst_62 = arith.constant dense<0xFF800000> : vector<16xf32>
    %196 = vector.multi_reduction <maximumf>, %195, %cst_62 [1] : vector<16x16xf32> to vector<16xf32>
    %197 = vector.shape_cast %196 : vector<16xf32> to vector<16x1xf32>
    %198 = vector.broadcast %197 : vector<16x1xf32> to vector<16x16xf32>
    %199 = arith.subf %195, %198 : vector<16x16xf32>
    %200 = math.exp %199 : vector<16x16xf32>
    %cst_63 = arith.constant dense<0.000000e+00> : vector<16xf32>
    %201 = vector.multi_reduction <add>, %200, %cst_63 [1] : vector<16x16xf32> to vector<16xf32>
    %202 = vector.shape_cast %201 : vector<16xf32> to vector<16x1xf32>
    %203 = tpu.reciprocal %202 : vector<16x1xf32> -> vector<16x1xf32>
    %204 = vector.broadcast %203 : vector<16x1xf32> to vector<16x16xf32>
    %205 = arith.mulf %200, %204 : vector<16x16xf32>
    %206 = vector.broadcast %89 : vector<1x32xf32> to vector<16x32xf32>
    %207 = arith.mulf %132, %206 : vector<16x32xf32>
    %cst_64 = arith.constant dense<0.000000e+00> : vector<16x32xf32>
    %208 = tpu.matmul %205, %207, %cst_64 {dimension_numbers = #tpu.dot_dimension_numbers<[1], [0], [0], [1], [0, 0, 1, 1], [], []>} : vector<16x16xf32>, vector<16x32xf32>, vector<16x32xf32> -> vector<16x32xf32>
    %209 = arith.addf %190, %208 : vector<16x32xf32>
    %cst_65 = arith.constant dense<0.000000e+00> : vector<16x32xf32>
    %210 = tpu.matmul %209, %93, %cst_65 {dimension_numbers = #tpu.dot_dimension_numbers<[1], [0], [0], [1], [0, 0, 1, 1], [], []>} : vector<16x32xf32>, vector<32x32xf32>, vector<16x32xf32> -> vector<16x32xf32>
    %211 = arith.addf %33, %210 : vector<16x32xf32>
    %212 = vector.broadcast %101 : vector<1x32xf32> to vector<16x32xf32>
    %213 = arith.addf %211, %212 : vector<16x32xf32>
    %cst_66 = arith.constant dense<0.000000e+00> : vector<16xf32>
    %214 = vector.multi_reduction <add>, %213, %cst_66 [1] : vector<16x32xf32> to vector<16xf32>
    %215 = vector.shape_cast %214 : vector<16xf32> to vector<16x1xf32>
    %cst_67 = arith.constant 3.200000e+01 : f32
    %216 = vector.broadcast %cst_67 : f32 to vector<16x1xf32>
    %217 = arith.divf %215, %216 : vector<16x1xf32>
    %218 = vector.broadcast %217 : vector<16x1xf32> to vector<16x32xf32>
    %219 = arith.subf %213, %218 : vector<16x32xf32>
    %220 = arith.mulf %219, %219 : vector<16x32xf32>
    %cst_68 = arith.constant dense<0.000000e+00> : vector<16xf32>
    %221 = vector.multi_reduction <add>, %220, %cst_68 [1] : vector<16x32xf32> to vector<16xf32>
    %222 = vector.shape_cast %221 : vector<16xf32> to vector<16x1xf32>
    %cst_69 = arith.constant 3.200000e+01 : f32
    %223 = vector.broadcast %cst_69 : f32 to vector<16x1xf32>
    %224 = arith.divf %222, %223 : vector<16x1xf32>
    %225 = vector.broadcast %217 : vector<16x1xf32> to vector<16x32xf32>
    %226 = arith.subf %213, %225 : vector<16x32xf32>
    %cst_70 = arith.constant 9.99999974E-6 : f32
    %227 = vector.broadcast %cst_70 : f32 to vector<16x1xf32>
    %228 = arith.addf %224, %227 : vector<16x1xf32>
    %229 = math.rsqrt %228 : vector<16x1xf32>
    %230 = vector.broadcast %229 : vector<16x1xf32> to vector<16x32xf32>
    %231 = arith.mulf %226, %230 : vector<16x32xf32>
    %232 = vector.broadcast %105 : vector<1x32xf32> to vector<16x32xf32>
    %233 = arith.mulf %231, %232 : vector<16x32xf32>
    %234 = vector.broadcast %106 : vector<1x32xf32> to vector<16x32xf32>
    %235 = arith.addf %233, %234 : vector<16x32xf32>
    %cst_71 = arith.constant dense<0.000000e+00> : vector<16x128xf32>
    %236 = tpu.matmul %235, %95, %cst_71 {dimension_numbers = #tpu.dot_dimension_numbers<[1], [0], [0], [1], [0, 0, 1, 1], [], []>} : vector<16x32xf32>, vector<32x128xf32>, vector<16x128xf32> -> vector<16x128xf32>
    %237 = vector.broadcast %100 : vector<1x128xf32> to vector<16x128xf32>
    %238 = arith.addf %236, %237 : vector<16x128xf32>
    %cst_72 = arith.constant 0.000000e+00 : f32
    %239 = vector.broadcast %cst_72 : f32 to vector<16x128xf32>
    %240 = arith.maximumf %238, %239 : vector<16x128xf32>
    %cst_73 = arith.constant dense<0.000000e+00> : vector<16x32xf32>
    %241 = tpu.matmul %240, %97, %cst_73 {dimension_numbers = #tpu.dot_dimension_numbers<[1], [0], [0], [1], [0, 0, 1, 1], [], []>} : vector<16x128xf32>, vector<128x32xf32>, vector<16x32xf32> -> vector<16x32xf32>
    %242 = arith.addf %213, %241 : vector<16x32xf32>
    %243 = vector.broadcast %102 : vector<1x32xf32> to vector<16x32xf32>
    %244 = arith.addf %242, %243 : vector<16x32xf32>
    %c1 = arith.constant 1 : index
    %c0_74 = arith.constant 0 : index
    %c0_75 = arith.constant 0 : index
    %245 = vector.load %arg4[%c1, %c0_74, %c0_75] : memref<4x32x96xf32, #tpu.memory_space<vmem>>, vector<1x32x96xf32>
    %246 = vector.shape_cast %245 : vector<1x32x96xf32> to vector<32x96xf32>
    %c1_76 = arith.constant 1 : index
    %c0_77 = arith.constant 0 : index
    %c0_78 = arith.constant 0 : index
    %247 = vector.load %arg5[%c1_76, %c0_77, %c0_78] : memref<4x32x32xf32, #tpu.memory_space<vmem>>, vector<1x32x32xf32>
    %248 = vector.shape_cast %247 : vector<1x32x32xf32> to vector<32x32xf32>
    %c1_79 = arith.constant 1 : index
    %c0_80 = arith.constant 0 : index
    %c0_81 = arith.constant 0 : index
    %249 = vector.load %arg6[%c1_79, %c0_80, %c0_81] : memref<4x32x128xf32, #tpu.memory_space<vmem>>, vector<1x32x128xf32>
    %250 = vector.shape_cast %249 : vector<1x32x128xf32> to vector<32x128xf32>
    %c1_82 = arith.constant 1 : index
    %c0_83 = arith.constant 0 : index
    %c0_84 = arith.constant 0 : index
    %251 = vector.load %arg7[%c1_82, %c0_83, %c0_84] : memref<4x128x32xf32, #tpu.memory_space<vmem>>, vector<1x128x32xf32>
    %252 = vector.shape_cast %251 : vector<1x128x32xf32> to vector<128x32xf32>
    %c1_85 = arith.constant 1 : index
    %c0_86 = arith.constant 0 : index
    %c0_87 = arith.constant 0 : index
    %253 = vector.load %arg8[%c1_85, %c0_86, %c0_87] : memref<4x8x128xf32, #tpu.memory_space<vmem>>, vector<1x8x128xf32>
    %254 = vector.shape_cast %253 : vector<1x8x128xf32> to vector<8x128xf32>
    %255 = vector.extract_strided_slice %254 {offsets = [0, 0], sizes = [1, 128], strides = [1, 1]} : vector<8x128xf32> to vector<1x128xf32>
    %256 = vector.extract_strided_slice %254 {offsets = [1, 0], sizes = [1, 32], strides = [1, 1]} : vector<8x128xf32> to vector<1x32xf32>
    %257 = vector.extract_strided_slice %254 {offsets = [2, 0], sizes = [1, 32], strides = [1, 1]} : vector<8x128xf32> to vector<1x32xf32>
    %258 = vector.extract_strided_slice %254 {offsets = [3, 0], sizes = [1, 32], strides = [1, 1]} : vector<8x128xf32> to vector<1x32xf32>
    %259 = vector.extract_strided_slice %254 {offsets = [4, 0], sizes = [1, 32], strides = [1, 1]} : vector<8x128xf32> to vector<1x32xf32>
    %260 = vector.extract_strided_slice %254 {offsets = [5, 0], sizes = [1, 32], strides = [1, 1]} : vector<8x128xf32> to vector<1x32xf32>
    %261 = vector.extract_strided_slice %254 {offsets = [6, 0], sizes = [1, 32], strides = [1, 1]} : vector<8x128xf32> to vector<1x32xf32>
    %cst_88 = arith.constant dense<0.000000e+00> : vector<16xf32>
    %262 = vector.multi_reduction <add>, %244, %cst_88 [1] : vector<16x32xf32> to vector<16xf32>
    %263 = vector.shape_cast %262 : vector<16xf32> to vector<16x1xf32>
    %cst_89 = arith.constant 3.200000e+01 : f32
    %264 = vector.broadcast %cst_89 : f32 to vector<16x1xf32>
    %265 = arith.divf %263, %264 : vector<16x1xf32>
    %266 = vector.broadcast %265 : vector<16x1xf32> to vector<16x32xf32>
    %267 = arith.subf %244, %266 : vector<16x32xf32>
    %268 = arith.mulf %267, %267 : vector<16x32xf32>
    %cst_90 = arith.constant dense<0.000000e+00> : vector<16xf32>
    %269 = vector.multi_reduction <add>, %268, %cst_90 [1] : vector<16x32xf32> to vector<16xf32>
    %270 = vector.shape_cast %269 : vector<16xf32> to vector<16x1xf32>
    %cst_91 = arith.constant 3.200000e+01 : f32
    %271 = vector.broadcast %cst_91 : f32 to vector<16x1xf32>
    %272 = arith.divf %270, %271 : vector<16x1xf32>
    %273 = vector.broadcast %265 : vector<16x1xf32> to vector<16x32xf32>
    %274 = arith.subf %244, %273 : vector<16x32xf32>
    %cst_92 = arith.constant 9.99999974E-6 : f32
    %275 = vector.broadcast %cst_92 : f32 to vector<16x1xf32>
    %276 = arith.addf %272, %275 : vector<16x1xf32>
    %277 = math.rsqrt %276 : vector<16x1xf32>
    %278 = vector.broadcast %277 : vector<16x1xf32> to vector<16x32xf32>
    %279 = arith.mulf %274, %278 : vector<16x32xf32>
    %280 = vector.broadcast %258 : vector<1x32xf32> to vector<16x32xf32>
    %281 = arith.mulf %279, %280 : vector<16x32xf32>
    %282 = vector.broadcast %259 : vector<1x32xf32> to vector<16x32xf32>
    %283 = arith.addf %281, %282 : vector<16x32xf32>
    %cst_93 = arith.constant dense<0.000000e+00> : vector<16x96xf32>
    %284 = tpu.matmul %283, %246, %cst_93 {dimension_numbers = #tpu.dot_dimension_numbers<[1], [0], [0], [1], [0, 0, 1, 1], [], []>} : vector<16x32xf32>, vector<32x96xf32>, vector<16x96xf32> -> vector<16x96xf32>
    %285 = vector.extract_strided_slice %284 {offsets = [0, 0], sizes = [16, 32], strides = [1, 1]} : vector<16x96xf32> to vector<16x32xf32>
    %286 = vector.extract_strided_slice %284 {offsets = [0, 32], sizes = [16, 32], strides = [1, 1]} : vector<16x96xf32> to vector<16x32xf32>
    %287 = vector.extract_strided_slice %284 {offsets = [0, 64], sizes = [16, 32], strides = [1, 1]} : vector<16x96xf32> to vector<16x32xf32>
    %cst_94 = arith.constant 0.000000e+00 : f32
    %288 = vector.broadcast %cst_94 : f32 to vector<16x32xf32>
    %289 = vector.broadcast %68 : vector<1x32xf32> to vector<16x32xf32>
    %290 = arith.mulf %285, %289 : vector<16x32xf32>
    %cst_95 = arith.constant dense<0.000000e+00> : vector<16x16xf32>
    %291 = tpu.matmul %290, %286, %cst_95 {dimension_numbers = #tpu.dot_dimension_numbers<[1], [1], [0], [0], [0, 0, 1, 0], [], []>} : vector<16x32xf32>, vector<16x32xf32>, vector<16x16xf32> -> vector<16x16xf32>
    %cst_96 = arith.constant 0xFF800000 : f32
    %292 = vector.broadcast %cst_96 : f32 to vector<16x16xf32>
    %293 = arith.select %60, %291, %292 : vector<16x16xi1>, vector<16x16xf32>
    %cst_97 = arith.constant dense<0xFF800000> : vector<16xf32>
    %294 = vector.multi_reduction <maximumf>, %293, %cst_97 [1] : vector<16x16xf32> to vector<16xf32>
    %295 = vector.shape_cast %294 : vector<16xf32> to vector<16x1xf32>
    %296 = vector.broadcast %295 : vector<16x1xf32> to vector<16x16xf32>
    %297 = arith.subf %293, %296 : vector<16x16xf32>
    %298 = math.exp %297 : vector<16x16xf32>
    %cst_98 = arith.constant dense<0.000000e+00> : vector<16xf32>
    %299 = vector.multi_reduction <add>, %298, %cst_98 [1] : vector<16x16xf32> to vector<16xf32>
    %300 = vector.shape_cast %299 : vector<16xf32> to vector<16x1xf32>
    %301 = tpu.reciprocal %300 : vector<16x1xf32> -> vector<16x1xf32>
    %302 = vector.broadcast %301 : vector<16x1xf32> to vector<16x16xf32>
    %303 = arith.mulf %298, %302 : vector<16x16xf32>
    %304 = vector.broadcast %68 : vector<1x32xf32> to vector<16x32xf32>
    %305 = arith.mulf %287, %304 : vector<16x32xf32>
    %cst_99 = arith.constant dense<0.000000e+00> : vector<16x32xf32>
    %306 = tpu.matmul %303, %305, %cst_99 {dimension_numbers = #tpu.dot_dimension_numbers<[1], [0], [0], [1], [0, 0, 1, 1], [], []>} : vector<16x16xf32>, vector<16x32xf32>, vector<16x32xf32> -> vector<16x32xf32>
    %307 = arith.addf %288, %306 : vector<16x32xf32>
    %308 = vector.broadcast %75 : vector<1x32xf32> to vector<16x32xf32>
    %309 = arith.mulf %285, %308 : vector<16x32xf32>
    %cst_100 = arith.constant dense<0.000000e+00> : vector<16x16xf32>
    %310 = tpu.matmul %309, %286, %cst_100 {dimension_numbers = #tpu.dot_dimension_numbers<[1], [1], [0], [0], [0, 0, 1, 0], [], []>} : vector<16x32xf32>, vector<16x32xf32>, vector<16x16xf32> -> vector<16x16xf32>
    %cst_101 = arith.constant 0xFF800000 : f32
    %311 = vector.broadcast %cst_101 : f32 to vector<16x16xf32>
    %312 = arith.select %60, %310, %311 : vector<16x16xi1>, vector<16x16xf32>
    %cst_102 = arith.constant dense<0xFF800000> : vector<16xf32>
    %313 = vector.multi_reduction <maximumf>, %312, %cst_102 [1] : vector<16x16xf32> to vector<16xf32>
    %314 = vector.shape_cast %313 : vector<16xf32> to vector<16x1xf32>
    %315 = vector.broadcast %314 : vector<16x1xf32> to vector<16x16xf32>
    %316 = arith.subf %312, %315 : vector<16x16xf32>
    %317 = math.exp %316 : vector<16x16xf32>
    %cst_103 = arith.constant dense<0.000000e+00> : vector<16xf32>
    %318 = vector.multi_reduction <add>, %317, %cst_103 [1] : vector<16x16xf32> to vector<16xf32>
    %319 = vector.shape_cast %318 : vector<16xf32> to vector<16x1xf32>
    %320 = tpu.reciprocal %319 : vector<16x1xf32> -> vector<16x1xf32>
    %321 = vector.broadcast %320 : vector<16x1xf32> to vector<16x16xf32>
    %322 = arith.mulf %317, %321 : vector<16x16xf32>
    %323 = vector.broadcast %75 : vector<1x32xf32> to vector<16x32xf32>
    %324 = arith.mulf %287, %323 : vector<16x32xf32>
    %cst_104 = arith.constant dense<0.000000e+00> : vector<16x32xf32>
    %325 = tpu.matmul %322, %324, %cst_104 {dimension_numbers = #tpu.dot_dimension_numbers<[1], [0], [0], [1], [0, 0, 1, 1], [], []>} : vector<16x16xf32>, vector<16x32xf32>, vector<16x32xf32> -> vector<16x32xf32>
    %326 = arith.addf %307, %325 : vector<16x32xf32>
    %327 = vector.broadcast %82 : vector<1x32xf32> to vector<16x32xf32>
    %328 = arith.mulf %285, %327 : vector<16x32xf32>
    %cst_105 = arith.constant dense<0.000000e+00> : vector<16x16xf32>
    %329 = tpu.matmul %328, %286, %cst_105 {dimension_numbers = #tpu.dot_dimension_numbers<[1], [1], [0], [0], [0, 0, 1, 0], [], []>} : vector<16x32xf32>, vector<16x32xf32>, vector<16x16xf32> -> vector<16x16xf32>
    %cst_106 = arith.constant 0xFF800000 : f32
    %330 = vector.broadcast %cst_106 : f32 to vector<16x16xf32>
    %331 = arith.select %60, %329, %330 : vector<16x16xi1>, vector<16x16xf32>
    %cst_107 = arith.constant dense<0xFF800000> : vector<16xf32>
    %332 = vector.multi_reduction <maximumf>, %331, %cst_107 [1] : vector<16x16xf32> to vector<16xf32>
    %333 = vector.shape_cast %332 : vector<16xf32> to vector<16x1xf32>
    %334 = vector.broadcast %333 : vector<16x1xf32> to vector<16x16xf32>
    %335 = arith.subf %331, %334 : vector<16x16xf32>
    %336 = math.exp %335 : vector<16x16xf32>
    %cst_108 = arith.constant dense<0.000000e+00> : vector<16xf32>
    %337 = vector.multi_reduction <add>, %336, %cst_108 [1] : vector<16x16xf32> to vector<16xf32>
    %338 = vector.shape_cast %337 : vector<16xf32> to vector<16x1xf32>
    %339 = tpu.reciprocal %338 : vector<16x1xf32> -> vector<16x1xf32>
    %340 = vector.broadcast %339 : vector<16x1xf32> to vector<16x16xf32>
    %341 = arith.mulf %336, %340 : vector<16x16xf32>
    %342 = vector.broadcast %82 : vector<1x32xf32> to vector<16x32xf32>
    %343 = arith.mulf %287, %342 : vector<16x32xf32>
    %cst_109 = arith.constant dense<0.000000e+00> : vector<16x32xf32>
    %344 = tpu.matmul %341, %343, %cst_109 {dimension_numbers = #tpu.dot_dimension_numbers<[1], [0], [0], [1], [0, 0, 1, 1], [], []>} : vector<16x16xf32>, vector<16x32xf32>, vector<16x32xf32> -> vector<16x32xf32>
    %345 = arith.addf %326, %344 : vector<16x32xf32>
    %346 = vector.broadcast %89 : vector<1x32xf32> to vector<16x32xf32>
    %347 = arith.mulf %285, %346 : vector<16x32xf32>
    %cst_110 = arith.constant dense<0.000000e+00> : vector<16x16xf32>
    %348 = tpu.matmul %347, %286, %cst_110 {dimension_numbers = #tpu.dot_dimension_numbers<[1], [1], [0], [0], [0, 0, 1, 0], [], []>} : vector<16x32xf32>, vector<16x32xf32>, vector<16x16xf32> -> vector<16x16xf32>
    %cst_111 = arith.constant 0xFF800000 : f32
    %349 = vector.broadcast %cst_111 : f32 to vector<16x16xf32>
    %350 = arith.select %60, %348, %349 : vector<16x16xi1>, vector<16x16xf32>
    %cst_112 = arith.constant dense<0xFF800000> : vector<16xf32>
    %351 = vector.multi_reduction <maximumf>, %350, %cst_112 [1] : vector<16x16xf32> to vector<16xf32>
    %352 = vector.shape_cast %351 : vector<16xf32> to vector<16x1xf32>
    %353 = vector.broadcast %352 : vector<16x1xf32> to vector<16x16xf32>
    %354 = arith.subf %350, %353 : vector<16x16xf32>
    %355 = math.exp %354 : vector<16x16xf32>
    %cst_113 = arith.constant dense<0.000000e+00> : vector<16xf32>
    %356 = vector.multi_reduction <add>, %355, %cst_113 [1] : vector<16x16xf32> to vector<16xf32>
    %357 = vector.shape_cast %356 : vector<16xf32> to vector<16x1xf32>
    %358 = tpu.reciprocal %357 : vector<16x1xf32> -> vector<16x1xf32>
    %359 = vector.broadcast %358 : vector<16x1xf32> to vector<16x16xf32>
    %360 = arith.mulf %355, %359 : vector<16x16xf32>
    %361 = vector.broadcast %89 : vector<1x32xf32> to vector<16x32xf32>
    %362 = arith.mulf %287, %361 : vector<16x32xf32>
    %cst_114 = arith.constant dense<0.000000e+00> : vector<16x32xf32>
    %363 = tpu.matmul %360, %362, %cst_114 {dimension_numbers = #tpu.dot_dimension_numbers<[1], [0], [0], [1], [0, 0, 1, 1], [], []>} : vector<16x16xf32>, vector<16x32xf32>, vector<16x32xf32> -> vector<16x32xf32>
    %364 = arith.addf %345, %363 : vector<16x32xf32>
    %cst_115 = arith.constant dense<0.000000e+00> : vector<16x32xf32>
    %365 = tpu.matmul %364, %248, %cst_115 {dimension_numbers = #tpu.dot_dimension_numbers<[1], [0], [0], [1], [0, 0, 1, 1], [], []>} : vector<16x32xf32>, vector<32x32xf32>, vector<16x32xf32> -> vector<16x32xf32>
    %366 = arith.addf %244, %365 : vector<16x32xf32>
    %367 = vector.broadcast %256 : vector<1x32xf32> to vector<16x32xf32>
    %368 = arith.addf %366, %367 : vector<16x32xf32>
    %cst_116 = arith.constant dense<0.000000e+00> : vector<16xf32>
    %369 = vector.multi_reduction <add>, %368, %cst_116 [1] : vector<16x32xf32> to vector<16xf32>
    %370 = vector.shape_cast %369 : vector<16xf32> to vector<16x1xf32>
    %cst_117 = arith.constant 3.200000e+01 : f32
    %371 = vector.broadcast %cst_117 : f32 to vector<16x1xf32>
    %372 = arith.divf %370, %371 : vector<16x1xf32>
    %373 = vector.broadcast %372 : vector<16x1xf32> to vector<16x32xf32>
    %374 = arith.subf %368, %373 : vector<16x32xf32>
    %375 = arith.mulf %374, %374 : vector<16x32xf32>
    %cst_118 = arith.constant dense<0.000000e+00> : vector<16xf32>
    %376 = vector.multi_reduction <add>, %375, %cst_118 [1] : vector<16x32xf32> to vector<16xf32>
    %377 = vector.shape_cast %376 : vector<16xf32> to vector<16x1xf32>
    %cst_119 = arith.constant 3.200000e+01 : f32
    %378 = vector.broadcast %cst_119 : f32 to vector<16x1xf32>
    %379 = arith.divf %377, %378 : vector<16x1xf32>
    %380 = vector.broadcast %372 : vector<16x1xf32> to vector<16x32xf32>
    %381 = arith.subf %368, %380 : vector<16x32xf32>
    %cst_120 = arith.constant 9.99999974E-6 : f32
    %382 = vector.broadcast %cst_120 : f32 to vector<16x1xf32>
    %383 = arith.addf %379, %382 : vector<16x1xf32>
    %384 = math.rsqrt %383 : vector<16x1xf32>
    %385 = vector.broadcast %384 : vector<16x1xf32> to vector<16x32xf32>
    %386 = arith.mulf %381, %385 : vector<16x32xf32>
    %387 = vector.broadcast %260 : vector<1x32xf32> to vector<16x32xf32>
    %388 = arith.mulf %386, %387 : vector<16x32xf32>
    %389 = vector.broadcast %261 : vector<1x32xf32> to vector<16x32xf32>
    %390 = arith.addf %388, %389 : vector<16x32xf32>
    %cst_121 = arith.constant dense<0.000000e+00> : vector<16x128xf32>
    %391 = tpu.matmul %390, %250, %cst_121 {dimension_numbers = #tpu.dot_dimension_numbers<[1], [0], [0], [1], [0, 0, 1, 1], [], []>} : vector<16x32xf32>, vector<32x128xf32>, vector<16x128xf32> -> vector<16x128xf32>
    %392 = vector.broadcast %255 : vector<1x128xf32> to vector<16x128xf32>
    %393 = arith.addf %391, %392 : vector<16x128xf32>
    %cst_122 = arith.constant 0.000000e+00 : f32
    %394 = vector.broadcast %cst_122 : f32 to vector<16x128xf32>
    %395 = arith.maximumf %393, %394 : vector<16x128xf32>
    %cst_123 = arith.constant dense<0.000000e+00> : vector<16x32xf32>
    %396 = tpu.matmul %395, %252, %cst_123 {dimension_numbers = #tpu.dot_dimension_numbers<[1], [0], [0], [1], [0, 0, 1, 1], [], []>} : vector<16x128xf32>, vector<128x32xf32>, vector<16x32xf32> -> vector<16x32xf32>
    %397 = arith.addf %368, %396 : vector<16x32xf32>
    %398 = vector.broadcast %257 : vector<1x32xf32> to vector<16x32xf32>
    %399 = arith.addf %397, %398 : vector<16x32xf32>
    %c2 = arith.constant 2 : index
    %c0_124 = arith.constant 0 : index
    %c0_125 = arith.constant 0 : index
    %400 = vector.load %arg4[%c2, %c0_124, %c0_125] : memref<4x32x96xf32, #tpu.memory_space<vmem>>, vector<1x32x96xf32>
    %401 = vector.shape_cast %400 : vector<1x32x96xf32> to vector<32x96xf32>
    %c2_126 = arith.constant 2 : index
    %c0_127 = arith.constant 0 : index
    %c0_128 = arith.constant 0 : index
    %402 = vector.load %arg5[%c2_126, %c0_127, %c0_128] : memref<4x32x32xf32, #tpu.memory_space<vmem>>, vector<1x32x32xf32>
    %403 = vector.shape_cast %402 : vector<1x32x32xf32> to vector<32x32xf32>
    %c2_129 = arith.constant 2 : index
    %c0_130 = arith.constant 0 : index
    %c0_131 = arith.constant 0 : index
    %404 = vector.load %arg6[%c2_129, %c0_130, %c0_131] : memref<4x32x128xf32, #tpu.memory_space<vmem>>, vector<1x32x128xf32>
    %405 = vector.shape_cast %404 : vector<1x32x128xf32> to vector<32x128xf32>
    %c2_132 = arith.constant 2 : index
    %c0_133 = arith.constant 0 : index
    %c0_134 = arith.constant 0 : index
    %406 = vector.load %arg7[%c2_132, %c0_133, %c0_134] : memref<4x128x32xf32, #tpu.memory_space<vmem>>, vector<1x128x32xf32>
    %407 = vector.shape_cast %406 : vector<1x128x32xf32> to vector<128x32xf32>
    %c2_135 = arith.constant 2 : index
    %c0_136 = arith.constant 0 : index
    %c0_137 = arith.constant 0 : index
    %408 = vector.load %arg8[%c2_135, %c0_136, %c0_137] : memref<4x8x128xf32, #tpu.memory_space<vmem>>, vector<1x8x128xf32>
    %409 = vector.shape_cast %408 : vector<1x8x128xf32> to vector<8x128xf32>
    %410 = vector.extract_strided_slice %409 {offsets = [0, 0], sizes = [1, 128], strides = [1, 1]} : vector<8x128xf32> to vector<1x128xf32>
    %411 = vector.extract_strided_slice %409 {offsets = [1, 0], sizes = [1, 32], strides = [1, 1]} : vector<8x128xf32> to vector<1x32xf32>
    %412 = vector.extract_strided_slice %409 {offsets = [2, 0], sizes = [1, 32], strides = [1, 1]} : vector<8x128xf32> to vector<1x32xf32>
    %413 = vector.extract_strided_slice %409 {offsets = [3, 0], sizes = [1, 32], strides = [1, 1]} : vector<8x128xf32> to vector<1x32xf32>
    %414 = vector.extract_strided_slice %409 {offsets = [4, 0], sizes = [1, 32], strides = [1, 1]} : vector<8x128xf32> to vector<1x32xf32>
    %415 = vector.extract_strided_slice %409 {offsets = [5, 0], sizes = [1, 32], strides = [1, 1]} : vector<8x128xf32> to vector<1x32xf32>
    %416 = vector.extract_strided_slice %409 {offsets = [6, 0], sizes = [1, 32], strides = [1, 1]} : vector<8x128xf32> to vector<1x32xf32>
    %cst_138 = arith.constant dense<0.000000e+00> : vector<16xf32>
    %417 = vector.multi_reduction <add>, %399, %cst_138 [1] : vector<16x32xf32> to vector<16xf32>
    %418 = vector.shape_cast %417 : vector<16xf32> to vector<16x1xf32>
    %cst_139 = arith.constant 3.200000e+01 : f32
    %419 = vector.broadcast %cst_139 : f32 to vector<16x1xf32>
    %420 = arith.divf %418, %419 : vector<16x1xf32>
    %421 = vector.broadcast %420 : vector<16x1xf32> to vector<16x32xf32>
    %422 = arith.subf %399, %421 : vector<16x32xf32>
    %423 = arith.mulf %422, %422 : vector<16x32xf32>
    %cst_140 = arith.constant dense<0.000000e+00> : vector<16xf32>
    %424 = vector.multi_reduction <add>, %423, %cst_140 [1] : vector<16x32xf32> to vector<16xf32>
    %425 = vector.shape_cast %424 : vector<16xf32> to vector<16x1xf32>
    %cst_141 = arith.constant 3.200000e+01 : f32
    %426 = vector.broadcast %cst_141 : f32 to vector<16x1xf32>
    %427 = arith.divf %425, %426 : vector<16x1xf32>
    %428 = vector.broadcast %420 : vector<16x1xf32> to vector<16x32xf32>
    %429 = arith.subf %399, %428 : vector<16x32xf32>
    %cst_142 = arith.constant 9.99999974E-6 : f32
    %430 = vector.broadcast %cst_142 : f32 to vector<16x1xf32>
    %431 = arith.addf %427, %430 : vector<16x1xf32>
    %432 = math.rsqrt %431 : vector<16x1xf32>
    %433 = vector.broadcast %432 : vector<16x1xf32> to vector<16x32xf32>
    %434 = arith.mulf %429, %433 : vector<16x32xf32>
    %435 = vector.broadcast %413 : vector<1x32xf32> to vector<16x32xf32>
    %436 = arith.mulf %434, %435 : vector<16x32xf32>
    %437 = vector.broadcast %414 : vector<1x32xf32> to vector<16x32xf32>
    %438 = arith.addf %436, %437 : vector<16x32xf32>
    %cst_143 = arith.constant dense<0.000000e+00> : vector<16x96xf32>
    %439 = tpu.matmul %438, %401, %cst_143 {dimension_numbers = #tpu.dot_dimension_numbers<[1], [0], [0], [1], [0, 0, 1, 1], [], []>} : vector<16x32xf32>, vector<32x96xf32>, vector<16x96xf32> -> vector<16x96xf32>
    %440 = vector.extract_strided_slice %439 {offsets = [0, 0], sizes = [16, 32], strides = [1, 1]} : vector<16x96xf32> to vector<16x32xf32>
    %441 = vector.extract_strided_slice %439 {offsets = [0, 32], sizes = [16, 32], strides = [1, 1]} : vector<16x96xf32> to vector<16x32xf32>
    %442 = vector.extract_strided_slice %439 {offsets = [0, 64], sizes = [16, 32], strides = [1, 1]} : vector<16x96xf32> to vector<16x32xf32>
    %cst_144 = arith.constant 0.000000e+00 : f32
    %443 = vector.broadcast %cst_144 : f32 to vector<16x32xf32>
    %444 = vector.broadcast %68 : vector<1x32xf32> to vector<16x32xf32>
    %445 = arith.mulf %440, %444 : vector<16x32xf32>
    %cst_145 = arith.constant dense<0.000000e+00> : vector<16x16xf32>
    %446 = tpu.matmul %445, %441, %cst_145 {dimension_numbers = #tpu.dot_dimension_numbers<[1], [1], [0], [0], [0, 0, 1, 0], [], []>} : vector<16x32xf32>, vector<16x32xf32>, vector<16x16xf32> -> vector<16x16xf32>
    %cst_146 = arith.constant 0xFF800000 : f32
    %447 = vector.broadcast %cst_146 : f32 to vector<16x16xf32>
    %448 = arith.select %60, %446, %447 : vector<16x16xi1>, vector<16x16xf32>
    %cst_147 = arith.constant dense<0xFF800000> : vector<16xf32>
    %449 = vector.multi_reduction <maximumf>, %448, %cst_147 [1] : vector<16x16xf32> to vector<16xf32>
    %450 = vector.shape_cast %449 : vector<16xf32> to vector<16x1xf32>
    %451 = vector.broadcast %450 : vector<16x1xf32> to vector<16x16xf32>
    %452 = arith.subf %448, %451 : vector<16x16xf32>
    %453 = math.exp %452 : vector<16x16xf32>
    %cst_148 = arith.constant dense<0.000000e+00> : vector<16xf32>
    %454 = vector.multi_reduction <add>, %453, %cst_148 [1] : vector<16x16xf32> to vector<16xf32>
    %455 = vector.shape_cast %454 : vector<16xf32> to vector<16x1xf32>
    %456 = tpu.reciprocal %455 : vector<16x1xf32> -> vector<16x1xf32>
    %457 = vector.broadcast %456 : vector<16x1xf32> to vector<16x16xf32>
    %458 = arith.mulf %453, %457 : vector<16x16xf32>
    %459 = vector.broadcast %68 : vector<1x32xf32> to vector<16x32xf32>
    %460 = arith.mulf %442, %459 : vector<16x32xf32>
    %cst_149 = arith.constant dense<0.000000e+00> : vector<16x32xf32>
    %461 = tpu.matmul %458, %460, %cst_149 {dimension_numbers = #tpu.dot_dimension_numbers<[1], [0], [0], [1], [0, 0, 1, 1], [], []>} : vector<16x16xf32>, vector<16x32xf32>, vector<16x32xf32> -> vector<16x32xf32>
    %462 = arith.addf %443, %461 : vector<16x32xf32>
    %463 = vector.broadcast %75 : vector<1x32xf32> to vector<16x32xf32>
    %464 = arith.mulf %440, %463 : vector<16x32xf32>
    %cst_150 = arith.constant dense<0.000000e+00> : vector<16x16xf32>
    %465 = tpu.matmul %464, %441, %cst_150 {dimension_numbers = #tpu.dot_dimension_numbers<[1], [1], [0], [0], [0, 0, 1, 0], [], []>} : vector<16x32xf32>, vector<16x32xf32>, vector<16x16xf32> -> vector<16x16xf32>
    %cst_151 = arith.constant 0xFF800000 : f32
    %466 = vector.broadcast %cst_151 : f32 to vector<16x16xf32>
    %467 = arith.select %60, %465, %466 : vector<16x16xi1>, vector<16x16xf32>
    %cst_152 = arith.constant dense<0xFF800000> : vector<16xf32>
    %468 = vector.multi_reduction <maximumf>, %467, %cst_152 [1] : vector<16x16xf32> to vector<16xf32>
    %469 = vector.shape_cast %468 : vector<16xf32> to vector<16x1xf32>
    %470 = vector.broadcast %469 : vector<16x1xf32> to vector<16x16xf32>
    %471 = arith.subf %467, %470 : vector<16x16xf32>
    %472 = math.exp %471 : vector<16x16xf32>
    %cst_153 = arith.constant dense<0.000000e+00> : vector<16xf32>
    %473 = vector.multi_reduction <add>, %472, %cst_153 [1] : vector<16x16xf32> to vector<16xf32>
    %474 = vector.shape_cast %473 : vector<16xf32> to vector<16x1xf32>
    %475 = tpu.reciprocal %474 : vector<16x1xf32> -> vector<16x1xf32>
    %476 = vector.broadcast %475 : vector<16x1xf32> to vector<16x16xf32>
    %477 = arith.mulf %472, %476 : vector<16x16xf32>
    %478 = vector.broadcast %75 : vector<1x32xf32> to vector<16x32xf32>
    %479 = arith.mulf %442, %478 : vector<16x32xf32>
    %cst_154 = arith.constant dense<0.000000e+00> : vector<16x32xf32>
    %480 = tpu.matmul %477, %479, %cst_154 {dimension_numbers = #tpu.dot_dimension_numbers<[1], [0], [0], [1], [0, 0, 1, 1], [], []>} : vector<16x16xf32>, vector<16x32xf32>, vector<16x32xf32> -> vector<16x32xf32>
    %481 = arith.addf %462, %480 : vector<16x32xf32>
    %482 = vector.broadcast %82 : vector<1x32xf32> to vector<16x32xf32>
    %483 = arith.mulf %440, %482 : vector<16x32xf32>
    %cst_155 = arith.constant dense<0.000000e+00> : vector<16x16xf32>
    %484 = tpu.matmul %483, %441, %cst_155 {dimension_numbers = #tpu.dot_dimension_numbers<[1], [1], [0], [0], [0, 0, 1, 0], [], []>} : vector<16x32xf32>, vector<16x32xf32>, vector<16x16xf32> -> vector<16x16xf32>
    %cst_156 = arith.constant 0xFF800000 : f32
    %485 = vector.broadcast %cst_156 : f32 to vector<16x16xf32>
    %486 = arith.select %60, %484, %485 : vector<16x16xi1>, vector<16x16xf32>
    %cst_157 = arith.constant dense<0xFF800000> : vector<16xf32>
    %487 = vector.multi_reduction <maximumf>, %486, %cst_157 [1] : vector<16x16xf32> to vector<16xf32>
    %488 = vector.shape_cast %487 : vector<16xf32> to vector<16x1xf32>
    %489 = vector.broadcast %488 : vector<16x1xf32> to vector<16x16xf32>
    %490 = arith.subf %486, %489 : vector<16x16xf32>
    %491 = math.exp %490 : vector<16x16xf32>
    %cst_158 = arith.constant dense<0.000000e+00> : vector<16xf32>
    %492 = vector.multi_reduction <add>, %491, %cst_158 [1] : vector<16x16xf32> to vector<16xf32>
    %493 = vector.shape_cast %492 : vector<16xf32> to vector<16x1xf32>
    %494 = tpu.reciprocal %493 : vector<16x1xf32> -> vector<16x1xf32>
    %495 = vector.broadcast %494 : vector<16x1xf32> to vector<16x16xf32>
    %496 = arith.mulf %491, %495 : vector<16x16xf32>
    %497 = vector.broadcast %82 : vector<1x32xf32> to vector<16x32xf32>
    %498 = arith.mulf %442, %497 : vector<16x32xf32>
    %cst_159 = arith.constant dense<0.000000e+00> : vector<16x32xf32>
    %499 = tpu.matmul %496, %498, %cst_159 {dimension_numbers = #tpu.dot_dimension_numbers<[1], [0], [0], [1], [0, 0, 1, 1], [], []>} : vector<16x16xf32>, vector<16x32xf32>, vector<16x32xf32> -> vector<16x32xf32>
    %500 = arith.addf %481, %499 : vector<16x32xf32>
    %501 = vector.broadcast %89 : vector<1x32xf32> to vector<16x32xf32>
    %502 = arith.mulf %440, %501 : vector<16x32xf32>
    %cst_160 = arith.constant dense<0.000000e+00> : vector<16x16xf32>
    %503 = tpu.matmul %502, %441, %cst_160 {dimension_numbers = #tpu.dot_dimension_numbers<[1], [1], [0], [0], [0, 0, 1, 0], [], []>} : vector<16x32xf32>, vector<16x32xf32>, vector<16x16xf32> -> vector<16x16xf32>
    %cst_161 = arith.constant 0xFF800000 : f32
    %504 = vector.broadcast %cst_161 : f32 to vector<16x16xf32>
    %505 = arith.select %60, %503, %504 : vector<16x16xi1>, vector<16x16xf32>
    %cst_162 = arith.constant dense<0xFF800000> : vector<16xf32>
    %506 = vector.multi_reduction <maximumf>, %505, %cst_162 [1] : vector<16x16xf32> to vector<16xf32>
    %507 = vector.shape_cast %506 : vector<16xf32> to vector<16x1xf32>
    %508 = vector.broadcast %507 : vector<16x1xf32> to vector<16x16xf32>
    %509 = arith.subf %505, %508 : vector<16x16xf32>
    %510 = math.exp %509 : vector<16x16xf32>
    %cst_163 = arith.constant dense<0.000000e+00> : vector<16xf32>
    %511 = vector.multi_reduction <add>, %510, %cst_163 [1] : vector<16x16xf32> to vector<16xf32>
    %512 = vector.shape_cast %511 : vector<16xf32> to vector<16x1xf32>
    %513 = tpu.reciprocal %512 : vector<16x1xf32> -> vector<16x1xf32>
    %514 = vector.broadcast %513 : vector<16x1xf32> to vector<16x16xf32>
    %515 = arith.mulf %510, %514 : vector<16x16xf32>
    %516 = vector.broadcast %89 : vector<1x32xf32> to vector<16x32xf32>
    %517 = arith.mulf %442, %516 : vector<16x32xf32>
    %cst_164 = arith.constant dense<0.000000e+00> : vector<16x32xf32>
    %518 = tpu.matmul %515, %517, %cst_164 {dimension_numbers = #tpu.dot_dimension_numbers<[1], [0], [0], [1], [0, 0, 1, 1], [], []>} : vector<16x16xf32>, vector<16x32xf32>, vector<16x32xf32> -> vector<16x32xf32>
    %519 = arith.addf %500, %518 : vector<16x32xf32>
    %cst_165 = arith.constant dense<0.000000e+00> : vector<16x32xf32>
    %520 = tpu.matmul %519, %403, %cst_165 {dimension_numbers = #tpu.dot_dimension_numbers<[1], [0], [0], [1], [0, 0, 1, 1], [], []>} : vector<16x32xf32>, vector<32x32xf32>, vector<16x32xf32> -> vector<16x32xf32>
    %521 = arith.addf %399, %520 : vector<16x32xf32>
    %522 = vector.broadcast %411 : vector<1x32xf32> to vector<16x32xf32>
    %523 = arith.addf %521, %522 : vector<16x32xf32>
    %cst_166 = arith.constant dense<0.000000e+00> : vector<16xf32>
    %524 = vector.multi_reduction <add>, %523, %cst_166 [1] : vector<16x32xf32> to vector<16xf32>
    %525 = vector.shape_cast %524 : vector<16xf32> to vector<16x1xf32>
    %cst_167 = arith.constant 3.200000e+01 : f32
    %526 = vector.broadcast %cst_167 : f32 to vector<16x1xf32>
    %527 = arith.divf %525, %526 : vector<16x1xf32>
    %528 = vector.broadcast %527 : vector<16x1xf32> to vector<16x32xf32>
    %529 = arith.subf %523, %528 : vector<16x32xf32>
    %530 = arith.mulf %529, %529 : vector<16x32xf32>
    %cst_168 = arith.constant dense<0.000000e+00> : vector<16xf32>
    %531 = vector.multi_reduction <add>, %530, %cst_168 [1] : vector<16x32xf32> to vector<16xf32>
    %532 = vector.shape_cast %531 : vector<16xf32> to vector<16x1xf32>
    %cst_169 = arith.constant 3.200000e+01 : f32
    %533 = vector.broadcast %cst_169 : f32 to vector<16x1xf32>
    %534 = arith.divf %532, %533 : vector<16x1xf32>
    %535 = vector.broadcast %527 : vector<16x1xf32> to vector<16x32xf32>
    %536 = arith.subf %523, %535 : vector<16x32xf32>
    %cst_170 = arith.constant 9.99999974E-6 : f32
    %537 = vector.broadcast %cst_170 : f32 to vector<16x1xf32>
    %538 = arith.addf %534, %537 : vector<16x1xf32>
    %539 = math.rsqrt %538 : vector<16x1xf32>
    %540 = vector.broadcast %539 : vector<16x1xf32> to vector<16x32xf32>
    %541 = arith.mulf %536, %540 : vector<16x32xf32>
    %542 = vector.broadcast %415 : vector<1x32xf32> to vector<16x32xf32>
    %543 = arith.mulf %541, %542 : vector<16x32xf32>
    %544 = vector.broadcast %416 : vector<1x32xf32> to vector<16x32xf32>
    %545 = arith.addf %543, %544 : vector<16x32xf32>
    %cst_171 = arith.constant dense<0.000000e+00> : vector<16x128xf32>
    %546 = tpu.matmul %545, %405, %cst_171 {dimension_numbers = #tpu.dot_dimension_numbers<[1], [0], [0], [1], [0, 0, 1, 1], [], []>} : vector<16x32xf32>, vector<32x128xf32>, vector<16x128xf32> -> vector<16x128xf32>
    %547 = vector.broadcast %410 : vector<1x128xf32> to vector<16x128xf32>
    %548 = arith.addf %546, %547 : vector<16x128xf32>
    %cst_172 = arith.constant 0.000000e+00 : f32
    %549 = vector.broadcast %cst_172 : f32 to vector<16x128xf32>
    %550 = arith.maximumf %548, %549 : vector<16x128xf32>
    %cst_173 = arith.constant dense<0.000000e+00> : vector<16x32xf32>
    %551 = tpu.matmul %550, %407, %cst_173 {dimension_numbers = #tpu.dot_dimension_numbers<[1], [0], [0], [1], [0, 0, 1, 1], [], []>} : vector<16x128xf32>, vector<128x32xf32>, vector<16x32xf32> -> vector<16x32xf32>
    %552 = arith.addf %523, %551 : vector<16x32xf32>
    %553 = vector.broadcast %412 : vector<1x32xf32> to vector<16x32xf32>
    %554 = arith.addf %552, %553 : vector<16x32xf32>
    %c3 = arith.constant 3 : index
    %c0_174 = arith.constant 0 : index
    %c0_175 = arith.constant 0 : index
    %555 = vector.load %arg4[%c3, %c0_174, %c0_175] : memref<4x32x96xf32, #tpu.memory_space<vmem>>, vector<1x32x96xf32>
    %556 = vector.shape_cast %555 : vector<1x32x96xf32> to vector<32x96xf32>
    %c3_176 = arith.constant 3 : index
    %c0_177 = arith.constant 0 : index
    %c0_178 = arith.constant 0 : index
    %557 = vector.load %arg5[%c3_176, %c0_177, %c0_178] : memref<4x32x32xf32, #tpu.memory_space<vmem>>, vector<1x32x32xf32>
    %558 = vector.shape_cast %557 : vector<1x32x32xf32> to vector<32x32xf32>
    %c3_179 = arith.constant 3 : index
    %c0_180 = arith.constant 0 : index
    %c0_181 = arith.constant 0 : index
    %559 = vector.load %arg6[%c3_179, %c0_180, %c0_181] : memref<4x32x128xf32, #tpu.memory_space<vmem>>, vector<1x32x128xf32>
    %560 = vector.shape_cast %559 : vector<1x32x128xf32> to vector<32x128xf32>
    %c3_182 = arith.constant 3 : index
    %c0_183 = arith.constant 0 : index
    %c0_184 = arith.constant 0 : index
    %561 = vector.load %arg7[%c3_182, %c0_183, %c0_184] : memref<4x128x32xf32, #tpu.memory_space<vmem>>, vector<1x128x32xf32>
    %562 = vector.shape_cast %561 : vector<1x128x32xf32> to vector<128x32xf32>
    %c3_185 = arith.constant 3 : index
    %c0_186 = arith.constant 0 : index
    %c0_187 = arith.constant 0 : index
    %563 = vector.load %arg8[%c3_185, %c0_186, %c0_187] : memref<4x8x128xf32, #tpu.memory_space<vmem>>, vector<1x8x128xf32>
    %564 = vector.shape_cast %563 : vector<1x8x128xf32> to vector<8x128xf32>
    %565 = vector.extract_strided_slice %564 {offsets = [0, 0], sizes = [1, 128], strides = [1, 1]} : vector<8x128xf32> to vector<1x128xf32>
    %566 = vector.extract_strided_slice %564 {offsets = [1, 0], sizes = [1, 32], strides = [1, 1]} : vector<8x128xf32> to vector<1x32xf32>
    %567 = vector.extract_strided_slice %564 {offsets = [2, 0], sizes = [1, 32], strides = [1, 1]} : vector<8x128xf32> to vector<1x32xf32>
    %568 = vector.extract_strided_slice %564 {offsets = [3, 0], sizes = [1, 32], strides = [1, 1]} : vector<8x128xf32> to vector<1x32xf32>
    %569 = vector.extract_strided_slice %564 {offsets = [4, 0], sizes = [1, 32], strides = [1, 1]} : vector<8x128xf32> to vector<1x32xf32>
    %570 = vector.extract_strided_slice %564 {offsets = [5, 0], sizes = [1, 32], strides = [1, 1]} : vector<8x128xf32> to vector<1x32xf32>
    %571 = vector.extract_strided_slice %564 {offsets = [6, 0], sizes = [1, 32], strides = [1, 1]} : vector<8x128xf32> to vector<1x32xf32>
    %cst_188 = arith.constant dense<0.000000e+00> : vector<16xf32>
    %572 = vector.multi_reduction <add>, %554, %cst_188 [1] : vector<16x32xf32> to vector<16xf32>
    %573 = vector.shape_cast %572 : vector<16xf32> to vector<16x1xf32>
    %cst_189 = arith.constant 3.200000e+01 : f32
    %574 = vector.broadcast %cst_189 : f32 to vector<16x1xf32>
    %575 = arith.divf %573, %574 : vector<16x1xf32>
    %576 = vector.broadcast %575 : vector<16x1xf32> to vector<16x32xf32>
    %577 = arith.subf %554, %576 : vector<16x32xf32>
    %578 = arith.mulf %577, %577 : vector<16x32xf32>
    %cst_190 = arith.constant dense<0.000000e+00> : vector<16xf32>
    %579 = vector.multi_reduction <add>, %578, %cst_190 [1] : vector<16x32xf32> to vector<16xf32>
    %580 = vector.shape_cast %579 : vector<16xf32> to vector<16x1xf32>
    %cst_191 = arith.constant 3.200000e+01 : f32
    %581 = vector.broadcast %cst_191 : f32 to vector<16x1xf32>
    %582 = arith.divf %580, %581 : vector<16x1xf32>
    %583 = vector.broadcast %575 : vector<16x1xf32> to vector<16x32xf32>
    %584 = arith.subf %554, %583 : vector<16x32xf32>
    %cst_192 = arith.constant 9.99999974E-6 : f32
    %585 = vector.broadcast %cst_192 : f32 to vector<16x1xf32>
    %586 = arith.addf %582, %585 : vector<16x1xf32>
    %587 = math.rsqrt %586 : vector<16x1xf32>
    %588 = vector.broadcast %587 : vector<16x1xf32> to vector<16x32xf32>
    %589 = arith.mulf %584, %588 : vector<16x32xf32>
    %590 = vector.broadcast %568 : vector<1x32xf32> to vector<16x32xf32>
    %591 = arith.mulf %589, %590 : vector<16x32xf32>
    %592 = vector.broadcast %569 : vector<1x32xf32> to vector<16x32xf32>
    %593 = arith.addf %591, %592 : vector<16x32xf32>
    %cst_193 = arith.constant dense<0.000000e+00> : vector<16x96xf32>
    %594 = tpu.matmul %593, %556, %cst_193 {dimension_numbers = #tpu.dot_dimension_numbers<[1], [0], [0], [1], [0, 0, 1, 1], [], []>} : vector<16x32xf32>, vector<32x96xf32>, vector<16x96xf32> -> vector<16x96xf32>
    %595 = vector.extract_strided_slice %594 {offsets = [0, 0], sizes = [16, 32], strides = [1, 1]} : vector<16x96xf32> to vector<16x32xf32>
    %596 = vector.extract_strided_slice %594 {offsets = [0, 32], sizes = [16, 32], strides = [1, 1]} : vector<16x96xf32> to vector<16x32xf32>
    %597 = vector.extract_strided_slice %594 {offsets = [0, 64], sizes = [16, 32], strides = [1, 1]} : vector<16x96xf32> to vector<16x32xf32>
    %cst_194 = arith.constant 0.000000e+00 : f32
    %598 = vector.broadcast %cst_194 : f32 to vector<16x32xf32>
    %599 = vector.broadcast %68 : vector<1x32xf32> to vector<16x32xf32>
    %600 = arith.mulf %595, %599 : vector<16x32xf32>
    %cst_195 = arith.constant dense<0.000000e+00> : vector<16x16xf32>
    %601 = tpu.matmul %600, %596, %cst_195 {dimension_numbers = #tpu.dot_dimension_numbers<[1], [1], [0], [0], [0, 0, 1, 0], [], []>} : vector<16x32xf32>, vector<16x32xf32>, vector<16x16xf32> -> vector<16x16xf32>
    %cst_196 = arith.constant 0xFF800000 : f32
    %602 = vector.broadcast %cst_196 : f32 to vector<16x16xf32>
    %603 = arith.select %60, %601, %602 : vector<16x16xi1>, vector<16x16xf32>
    %cst_197 = arith.constant dense<0xFF800000> : vector<16xf32>
    %604 = vector.multi_reduction <maximumf>, %603, %cst_197 [1] : vector<16x16xf32> to vector<16xf32>
    %605 = vector.shape_cast %604 : vector<16xf32> to vector<16x1xf32>
    %606 = vector.broadcast %605 : vector<16x1xf32> to vector<16x16xf32>
    %607 = arith.subf %603, %606 : vector<16x16xf32>
    %608 = math.exp %607 : vector<16x16xf32>
    %cst_198 = arith.constant dense<0.000000e+00> : vector<16xf32>
    %609 = vector.multi_reduction <add>, %608, %cst_198 [1] : vector<16x16xf32> to vector<16xf32>
    %610 = vector.shape_cast %609 : vector<16xf32> to vector<16x1xf32>
    %611 = tpu.reciprocal %610 : vector<16x1xf32> -> vector<16x1xf32>
    %612 = vector.broadcast %611 : vector<16x1xf32> to vector<16x16xf32>
    %613 = arith.mulf %608, %612 : vector<16x16xf32>
    %614 = vector.broadcast %68 : vector<1x32xf32> to vector<16x32xf32>
    %615 = arith.mulf %597, %614 : vector<16x32xf32>
    %cst_199 = arith.constant dense<0.000000e+00> : vector<16x32xf32>
    %616 = tpu.matmul %613, %615, %cst_199 {dimension_numbers = #tpu.dot_dimension_numbers<[1], [0], [0], [1], [0, 0, 1, 1], [], []>} : vector<16x16xf32>, vector<16x32xf32>, vector<16x32xf32> -> vector<16x32xf32>
    %617 = arith.addf %598, %616 : vector<16x32xf32>
    %618 = vector.broadcast %75 : vector<1x32xf32> to vector<16x32xf32>
    %619 = arith.mulf %595, %618 : vector<16x32xf32>
    %cst_200 = arith.constant dense<0.000000e+00> : vector<16x16xf32>
    %620 = tpu.matmul %619, %596, %cst_200 {dimension_numbers = #tpu.dot_dimension_numbers<[1], [1], [0], [0], [0, 0, 1, 0], [], []>} : vector<16x32xf32>, vector<16x32xf32>, vector<16x16xf32> -> vector<16x16xf32>
    %cst_201 = arith.constant 0xFF800000 : f32
    %621 = vector.broadcast %cst_201 : f32 to vector<16x16xf32>
    %622 = arith.select %60, %620, %621 : vector<16x16xi1>, vector<16x16xf32>
    %cst_202 = arith.constant dense<0xFF800000> : vector<16xf32>
    %623 = vector.multi_reduction <maximumf>, %622, %cst_202 [1] : vector<16x16xf32> to vector<16xf32>
    %624 = vector.shape_cast %623 : vector<16xf32> to vector<16x1xf32>
    %625 = vector.broadcast %624 : vector<16x1xf32> to vector<16x16xf32>
    %626 = arith.subf %622, %625 : vector<16x16xf32>
    %627 = math.exp %626 : vector<16x16xf32>
    %cst_203 = arith.constant dense<0.000000e+00> : vector<16xf32>
    %628 = vector.multi_reduction <add>, %627, %cst_203 [1] : vector<16x16xf32> to vector<16xf32>
    %629 = vector.shape_cast %628 : vector<16xf32> to vector<16x1xf32>
    %630 = tpu.reciprocal %629 : vector<16x1xf32> -> vector<16x1xf32>
    %631 = vector.broadcast %630 : vector<16x1xf32> to vector<16x16xf32>
    %632 = arith.mulf %627, %631 : vector<16x16xf32>
    %633 = vector.broadcast %75 : vector<1x32xf32> to vector<16x32xf32>
    %634 = arith.mulf %597, %633 : vector<16x32xf32>
    %cst_204 = arith.constant dense<0.000000e+00> : vector<16x32xf32>
    %635 = tpu.matmul %632, %634, %cst_204 {dimension_numbers = #tpu.dot_dimension_numbers<[1], [0], [0], [1], [0, 0, 1, 1], [], []>} : vector<16x16xf32>, vector<16x32xf32>, vector<16x32xf32> -> vector<16x32xf32>
    %636 = arith.addf %617, %635 : vector<16x32xf32>
    %637 = vector.broadcast %82 : vector<1x32xf32> to vector<16x32xf32>
    %638 = arith.mulf %595, %637 : vector<16x32xf32>
    %cst_205 = arith.constant dense<0.000000e+00> : vector<16x16xf32>
    %639 = tpu.matmul %638, %596, %cst_205 {dimension_numbers = #tpu.dot_dimension_numbers<[1], [1], [0], [0], [0, 0, 1, 0], [], []>} : vector<16x32xf32>, vector<16x32xf32>, vector<16x16xf32> -> vector<16x16xf32>
    %cst_206 = arith.constant 0xFF800000 : f32
    %640 = vector.broadcast %cst_206 : f32 to vector<16x16xf32>
    %641 = arith.select %60, %639, %640 : vector<16x16xi1>, vector<16x16xf32>
    %cst_207 = arith.constant dense<0xFF800000> : vector<16xf32>
    %642 = vector.multi_reduction <maximumf>, %641, %cst_207 [1] : vector<16x16xf32> to vector<16xf32>
    %643 = vector.shape_cast %642 : vector<16xf32> to vector<16x1xf32>
    %644 = vector.broadcast %643 : vector<16x1xf32> to vector<16x16xf32>
    %645 = arith.subf %641, %644 : vector<16x16xf32>
    %646 = math.exp %645 : vector<16x16xf32>
    %cst_208 = arith.constant dense<0.000000e+00> : vector<16xf32>
    %647 = vector.multi_reduction <add>, %646, %cst_208 [1] : vector<16x16xf32> to vector<16xf32>
    %648 = vector.shape_cast %647 : vector<16xf32> to vector<16x1xf32>
    %649 = tpu.reciprocal %648 : vector<16x1xf32> -> vector<16x1xf32>
    %650 = vector.broadcast %649 : vector<16x1xf32> to vector<16x16xf32>
    %651 = arith.mulf %646, %650 : vector<16x16xf32>
    %652 = vector.broadcast %82 : vector<1x32xf32> to vector<16x32xf32>
    %653 = arith.mulf %597, %652 : vector<16x32xf32>
    %cst_209 = arith.constant dense<0.000000e+00> : vector<16x32xf32>
    %654 = tpu.matmul %651, %653, %cst_209 {dimension_numbers = #tpu.dot_dimension_numbers<[1], [0], [0], [1], [0, 0, 1, 1], [], []>} : vector<16x16xf32>, vector<16x32xf32>, vector<16x32xf32> -> vector<16x32xf32>
    %655 = arith.addf %636, %654 : vector<16x32xf32>
    %656 = vector.broadcast %89 : vector<1x32xf32> to vector<16x32xf32>
    %657 = arith.mulf %595, %656 : vector<16x32xf32>
    %cst_210 = arith.constant dense<0.000000e+00> : vector<16x16xf32>
    %658 = tpu.matmul %657, %596, %cst_210 {dimension_numbers = #tpu.dot_dimension_numbers<[1], [1], [0], [0], [0, 0, 1, 0], [], []>} : vector<16x32xf32>, vector<16x32xf32>, vector<16x16xf32> -> vector<16x16xf32>
    %cst_211 = arith.constant 0xFF800000 : f32
    %659 = vector.broadcast %cst_211 : f32 to vector<16x16xf32>
    %660 = arith.select %60, %658, %659 : vector<16x16xi1>, vector<16x16xf32>
    %cst_212 = arith.constant dense<0xFF800000> : vector<16xf32>
    %661 = vector.multi_reduction <maximumf>, %660, %cst_212 [1] : vector<16x16xf32> to vector<16xf32>
    %662 = vector.shape_cast %661 : vector<16xf32> to vector<16x1xf32>
    %663 = vector.broadcast %662 : vector<16x1xf32> to vector<16x16xf32>
    %664 = arith.subf %660, %663 : vector<16x16xf32>
    %665 = math.exp %664 : vector<16x16xf32>
    %cst_213 = arith.constant dense<0.000000e+00> : vector<16xf32>
    %666 = vector.multi_reduction <add>, %665, %cst_213 [1] : vector<16x16xf32> to vector<16xf32>
    %667 = vector.shape_cast %666 : vector<16xf32> to vector<16x1xf32>
    %668 = tpu.reciprocal %667 : vector<16x1xf32> -> vector<16x1xf32>
    %669 = vector.broadcast %668 : vector<16x1xf32> to vector<16x16xf32>
    %670 = arith.mulf %665, %669 : vector<16x16xf32>
    %671 = vector.broadcast %89 : vector<1x32xf32> to vector<16x32xf32>
    %672 = arith.mulf %597, %671 : vector<16x32xf32>
    %cst_214 = arith.constant dense<0.000000e+00> : vector<16x32xf32>
    %673 = tpu.matmul %670, %672, %cst_214 {dimension_numbers = #tpu.dot_dimension_numbers<[1], [0], [0], [1], [0, 0, 1, 1], [], []>} : vector<16x16xf32>, vector<16x32xf32>, vector<16x32xf32> -> vector<16x32xf32>
    %674 = arith.addf %655, %673 : vector<16x32xf32>
    %cst_215 = arith.constant dense<0.000000e+00> : vector<16x32xf32>
    %675 = tpu.matmul %674, %558, %cst_215 {dimension_numbers = #tpu.dot_dimension_numbers<[1], [0], [0], [1], [0, 0, 1, 1], [], []>} : vector<16x32xf32>, vector<32x32xf32>, vector<16x32xf32> -> vector<16x32xf32>
    %676 = arith.addf %554, %675 : vector<16x32xf32>
    %677 = vector.broadcast %566 : vector<1x32xf32> to vector<16x32xf32>
    %678 = arith.addf %676, %677 : vector<16x32xf32>
    %cst_216 = arith.constant dense<0.000000e+00> : vector<16xf32>
    %679 = vector.multi_reduction <add>, %678, %cst_216 [1] : vector<16x32xf32> to vector<16xf32>
    %680 = vector.shape_cast %679 : vector<16xf32> to vector<16x1xf32>
    %cst_217 = arith.constant 3.200000e+01 : f32
    %681 = vector.broadcast %cst_217 : f32 to vector<16x1xf32>
    %682 = arith.divf %680, %681 : vector<16x1xf32>
    %683 = vector.broadcast %682 : vector<16x1xf32> to vector<16x32xf32>
    %684 = arith.subf %678, %683 : vector<16x32xf32>
    %685 = arith.mulf %684, %684 : vector<16x32xf32>
    %cst_218 = arith.constant dense<0.000000e+00> : vector<16xf32>
    %686 = vector.multi_reduction <add>, %685, %cst_218 [1] : vector<16x32xf32> to vector<16xf32>
    %687 = vector.shape_cast %686 : vector<16xf32> to vector<16x1xf32>
    %cst_219 = arith.constant 3.200000e+01 : f32
    %688 = vector.broadcast %cst_219 : f32 to vector<16x1xf32>
    %689 = arith.divf %687, %688 : vector<16x1xf32>
    %690 = vector.broadcast %682 : vector<16x1xf32> to vector<16x32xf32>
    %691 = arith.subf %678, %690 : vector<16x32xf32>
    %cst_220 = arith.constant 9.99999974E-6 : f32
    %692 = vector.broadcast %cst_220 : f32 to vector<16x1xf32>
    %693 = arith.addf %689, %692 : vector<16x1xf32>
    %694 = math.rsqrt %693 : vector<16x1xf32>
    %695 = vector.broadcast %694 : vector<16x1xf32> to vector<16x32xf32>
    %696 = arith.mulf %691, %695 : vector<16x32xf32>
    %697 = vector.broadcast %570 : vector<1x32xf32> to vector<16x32xf32>
    %698 = arith.mulf %696, %697 : vector<16x32xf32>
    %699 = vector.broadcast %571 : vector<1x32xf32> to vector<16x32xf32>
    %700 = arith.addf %698, %699 : vector<16x32xf32>
    %cst_221 = arith.constant dense<0.000000e+00> : vector<16x128xf32>
    %701 = tpu.matmul %700, %560, %cst_221 {dimension_numbers = #tpu.dot_dimension_numbers<[1], [0], [0], [1], [0, 0, 1, 1], [], []>} : vector<16x32xf32>, vector<32x128xf32>, vector<16x128xf32> -> vector<16x128xf32>
    %702 = vector.broadcast %565 : vector<1x128xf32> to vector<16x128xf32>
    %703 = arith.addf %701, %702 : vector<16x128xf32>
    %cst_222 = arith.constant 0.000000e+00 : f32
    %704 = vector.broadcast %cst_222 : f32 to vector<16x128xf32>
    %705 = arith.maximumf %703, %704 : vector<16x128xf32>
    %cst_223 = arith.constant dense<0.000000e+00> : vector<16x32xf32>
    %706 = tpu.matmul %705, %562, %cst_223 {dimension_numbers = #tpu.dot_dimension_numbers<[1], [0], [0], [1], [0, 0, 1, 1], [], []>} : vector<16x128xf32>, vector<128x32xf32>, vector<16x32xf32> -> vector<16x32xf32>
    %707 = arith.addf %678, %706 : vector<16x32xf32>
    %708 = vector.broadcast %567 : vector<1x32xf32> to vector<16x32xf32>
    %709 = arith.addf %707, %708 : vector<16x32xf32>
    %c0_224 = arith.constant 0 : index
    %c0_225 = arith.constant 0 : index
    %710 = vector.load %arg12[%c0_224, %c0_225] : memref<8x128xf32, #tpu.memory_space<vmem>>, vector<8x128xf32>
    %711 = vector.extract_strided_slice %710 {offsets = [0, 0], sizes = [1, 128], strides = [1, 1]} : vector<8x128xf32> to vector<1x128xf32>
    %712 = vector.extract_strided_slice %710 {offsets = [1, 0], sizes = [1, 32], strides = [1, 1]} : vector<8x128xf32> to vector<1x32xf32>
    %713 = vector.extract_strided_slice %710 {offsets = [2, 0], sizes = [1, 32], strides = [1, 1]} : vector<8x128xf32> to vector<1x32xf32>
    %714 = vector.extract_strided_slice %710 {offsets = [3, 0], sizes = [1, 32], strides = [1, 1]} : vector<8x128xf32> to vector<1x32xf32>
    %715 = vector.extract_strided_slice %710 {offsets = [4, 0], sizes = [1, 128], strides = [1, 1]} : vector<8x128xf32> to vector<1x128xf32>
    %cst_226 = arith.constant dense<0.000000e+00> : vector<16xf32>
    %716 = vector.multi_reduction <add>, %709, %cst_226 [1] : vector<16x32xf32> to vector<16xf32>
    %717 = vector.shape_cast %716 : vector<16xf32> to vector<16x1xf32>
    %cst_227 = arith.constant 3.200000e+01 : f32
    %718 = vector.broadcast %cst_227 : f32 to vector<16x1xf32>
    %719 = arith.divf %717, %718 : vector<16x1xf32>
    %720 = vector.broadcast %719 : vector<16x1xf32> to vector<16x32xf32>
    %721 = arith.subf %709, %720 : vector<16x32xf32>
    %722 = arith.mulf %721, %721 : vector<16x32xf32>
    %cst_228 = arith.constant dense<0.000000e+00> : vector<16xf32>
    %723 = vector.multi_reduction <add>, %722, %cst_228 [1] : vector<16x32xf32> to vector<16xf32>
    %724 = vector.shape_cast %723 : vector<16xf32> to vector<16x1xf32>
    %cst_229 = arith.constant 3.200000e+01 : f32
    %725 = vector.broadcast %cst_229 : f32 to vector<16x1xf32>
    %726 = arith.divf %724, %725 : vector<16x1xf32>
    %727 = vector.broadcast %719 : vector<16x1xf32> to vector<16x32xf32>
    %728 = arith.subf %709, %727 : vector<16x32xf32>
    %cst_230 = arith.constant 9.99999974E-6 : f32
    %729 = vector.broadcast %cst_230 : f32 to vector<16x1xf32>
    %730 = arith.addf %726, %729 : vector<16x1xf32>
    %731 = math.rsqrt %730 : vector<16x1xf32>
    %732 = vector.broadcast %731 : vector<16x1xf32> to vector<16x32xf32>
    %733 = arith.mulf %728, %732 : vector<16x32xf32>
    %734 = vector.broadcast %712 : vector<1x32xf32> to vector<16x32xf32>
    %735 = arith.mulf %733, %734 : vector<16x32xf32>
    %736 = vector.broadcast %713 : vector<1x32xf32> to vector<16x32xf32>
    %737 = arith.addf %735, %736 : vector<16x32xf32>
    %c0_231 = arith.constant 0 : index
    %c0_232 = arith.constant 0 : index
    %738 = vector.load %arg9[%c0_231, %c0_232] : memref<32x128xf32, #tpu.memory_space<vmem>>, vector<32x128xf32>
    %cst_233 = arith.constant dense<0.000000e+00> : vector<16x128xf32>
    %739 = tpu.matmul %737, %738, %cst_233 {dimension_numbers = #tpu.dot_dimension_numbers<[1], [0], [0], [1], [0, 0, 1, 1], [], []>} : vector<16x32xf32>, vector<32x128xf32>, vector<16x128xf32> -> vector<16x128xf32>
    %740 = vector.broadcast %711 : vector<1x128xf32> to vector<16x128xf32>
    %741 = arith.addf %739, %740 : vector<16x128xf32>
    %cst_234 = arith.constant 0.000000e+00 : f32
    %742 = vector.broadcast %cst_234 : f32 to vector<16x128xf32>
    %743 = arith.maximumf %741, %742 : vector<16x128xf32>
    %c0_235 = arith.constant 0 : index
    %c0_236 = arith.constant 0 : index
    %744 = vector.load %arg10[%c0_235, %c0_236] : memref<128x32xf32, #tpu.memory_space<vmem>>, vector<128x32xf32>
    %cst_237 = arith.constant dense<0.000000e+00> : vector<16x32xf32>
    %745 = tpu.matmul %743, %744, %cst_237 {dimension_numbers = #tpu.dot_dimension_numbers<[1], [0], [0], [1], [0, 0, 1, 1], [], []>} : vector<16x128xf32>, vector<128x32xf32>, vector<16x32xf32> -> vector<16x32xf32>
    %746 = vector.broadcast %714 : vector<1x32xf32> to vector<16x32xf32>
    %747 = arith.addf %745, %746 : vector<16x32xf32>
    %c0_238 = arith.constant 0 : index
    %c0_239 = arith.constant 0 : index
    %748 = vector.load %arg11[%c0_238, %c0_239] : memref<32x128xf32, #tpu.memory_space<vmem>>, vector<32x128xf32>
    %cst_240 = arith.constant dense<0.000000e+00> : vector<16x128xf32>
    %749 = tpu.matmul %747, %748, %cst_240 {dimension_numbers = #tpu.dot_dimension_numbers<[1], [0], [0], [1], [0, 0, 1, 1], [], []>} : vector<16x32xf32>, vector<32x128xf32>, vector<16x128xf32> -> vector<16x128xf32>
    %750 = vector.broadcast %715 : vector<1x128xf32> to vector<16x128xf32>
    %751 = arith.addf %749, %750 : vector<16x128xf32>
    %c0_241 = arith.constant 0 : index
    %c0_242 = arith.constant 0 : index
    %752 = vector.load %arg13[%c0_241, %c0_242] : memref<16x128xf32, #tpu.memory_space<vmem>>, vector<16x128xf32>
    tpu.vector_store %arg13[%c0_241, %c0_242], %751 {strides = array<i32>} : memref<16x128xf32, #tpu.memory_space<vmem>>, vector<16x128xf32>,
    return
  }
  func.func @transform_0(%arg0: i32) -> (i32, i32) {
    %c0_i32 = arith.constant 0 : i32
    %c0_i32_0 = arith.constant 0 : i32
    %c0_i32_1 = arith.constant 0 : i32
    return %c0_i32, %c0_i32_0 : i32, i32
  }
  func.func @transform_1(%arg0: i32) -> (i32, i32) {
    %c0_i32 = arith.constant 0 : i32
    %c0_i32_0 = arith.constant 0 : i32
    %c0_i32_1 = arith.constant 0 : i32
    return %c0_i32, %c0_i32_0 : i32, i32
  }
  func.func @transform_2(%arg0: i32) -> (i32, i32) {
    %c0_i32 = arith.constant 0 : i32
    %c0_i32_0 = arith.constant 0 : i32
    %c0_i32_1 = arith.constant 0 : i32
    return %c0_i32, %c0_i32_0 : i32, i32
  }
  func.func @transform_3(%arg0: i32) -> (i32, i32, i32) {
    %c0_i32 = arith.constant 0 : i32
    %c0_i32_0 = arith.constant 0 : i32
    %c0_i32_1 = arith.constant 0 : i32
    %c0_i32_2 = arith.constant 0 : i32
    return %c0_i32, %c0_i32_0, %c0_i32_1 : i32, i32, i32
  }
  func.func @transform_4(%arg0: i32) -> (i32, i32, i32) {
    %c0_i32 = arith.constant 0 : i32
    %c0_i32_0 = arith.constant 0 : i32
    %c0_i32_1 = arith.constant 0 : i32
    %c0_i32_2 = arith.constant 0 : i32
    return %c0_i32, %c0_i32_0, %c0_i32_1 : i32, i32, i32
  }
  func.func @transform_5(%arg0: i32) -> (i32, i32, i32) {
    %c0_i32 = arith.constant 0 : i32
    %c0_i32_0 = arith.constant 0 : i32
    %c0_i32_1 = arith.constant 0 : i32
    %c0_i32_2 = arith.constant 0 : i32
    return %c0_i32, %c0_i32_0, %c0_i32_1 : i32, i32, i32
  }
  func.func @transform_6(%arg0: i32) -> (i32, i32, i32) {
    %c0_i32 = arith.constant 0 : i32
    %c0_i32_0 = arith.constant 0 : i32
    %c0_i32_1 = arith.constant 0 : i32
    %c0_i32_2 = arith.constant 0 : i32
    return %c0_i32, %c0_i32_0, %c0_i32_1 : i32, i32, i32
  }
  func.func @transform_7(%arg0: i32) -> (i32, i32, i32) {
    %c0_i32 = arith.constant 0 : i32
    %c0_i32_0 = arith.constant 0 : i32
    %c0_i32_1 = arith.constant 0 : i32
    %c0_i32_2 = arith.constant 0 : i32
    return %c0_i32, %c0_i32_0, %c0_i32_1 : i32, i32, i32
  }
  func.func @transform_8(%arg0: i32) -> (i32, i32) {
    %c0_i32 = arith.constant 0 : i32
    %c0_i32_0 = arith.constant 0 : i32
    %c0_i32_1 = arith.constant 0 : i32
    return %c0_i32, %c0_i32_0 : i32, i32
  }
  func.func @transform_9(%arg0: i32) -> (i32, i32) {
    %c0_i32 = arith.constant 0 : i32
    %c0_i32_0 = arith.constant 0 : i32
    %c0_i32_1 = arith.constant 0 : i32
    return %c0_i32, %c0_i32_0 : i32, i32
  }
  func.func @transform_10(%arg0: i32) -> (i32, i32) {
    %c0_i32 = arith.constant 0 : i32
    %c0_i32_0 = arith.constant 0 : i32
    %c0_i32_1 = arith.constant 0 : i32
    return %c0_i32, %c0_i32_0 : i32, i32
  }
  func.func @transform_11(%arg0: i32) -> (i32, i32) {
    %c0_i32 = arith.constant 0 : i32
    %c0_i32_0 = arith.constant 0 : i32
    %c0_i32_1 = arith.constant 0 : i32
    return %c0_i32, %c0_i32_0 : i32, i32
  }
  func.func @transform_12(%arg0: i32) -> (i32, i32) {
    %c0_i32 = arith.constant 0 : i32
    %c0_i32_0 = arith.constant 0 : i32
    %c0_i32_1 = arith.constant 0 : i32
    return %c0_i32, %c0_i32_0 : i32, i32
  }
}

</mosaic_0001>

<bundles_post_ra>
// kernel: gpt_forward.1
= control target key start
LH: loop header
LB: loop body
LE: loop exit
PB: predicated region body
PF: predicated region fallthrough
CT: control target
= control target key end

     0   :  { %v6973_v0 = vmov 0   ;;  %v43_v3 = vlaneseq  ;;  %v6974_v17 = vmov 0.0   ;;  %vm106_vm1 = vcmask 261120   ;;  %s6976_s16 = smov 96   ;;  %s8430_s0 = inlined_call_operand.vmem [shape: s32[16,1], index: 0, kind: input, shape index: {}]   ;;  %s8431_s1 = inlined_call_operand.vmem [shape: f32[128,32], index: 1, kind: input, shape index: {}]   ;;  %s8432_s2 = inlined_call_operand.vmem [shape: f32[32,32], index: 2, kind: input, shape index: {}]   ;;  %s8433_s3 = inlined_call_operand.vmem [shape: f32[4,32,96], index: 3, kind: input, shape index: {}]   ;;  %s8434_s7 = inlined_call_operand.vmem [shape: f32[4,8,128], index: 7, kind: input, shape index: {}]   ;;  %s8435_s4 = inlined_call_operand.vmem [shape: f32[4,32,32], index: 4, kind: input, shape index: {}]   ;;  %s8436_s5 = inlined_call_operand.vmem [shape: f32[4,32,128], index: 5, kind: input, shape index: {}]   ;;  %s8437_s6 = inlined_call_operand.vmem [shape: f32[4,128,32], index: 6, kind: input, shape index: {}]   ;;  %s8438_s8 = inlined_call_operand.vmem [shape: f32[32,128], index: 8, kind: input, shape index: {}]   ;;  %s8439_s9 = inlined_call_operand.vmem [shape: f32[128,32], index: 9, kind: input, shape index: {}]   ;;  %s8440_s11 = inlined_call_operand.vmem [shape: f32[8,128], index: 11, kind: input, shape index: {}]   ;;  %s8441_s10 = inlined_call_operand.vmem [shape: f32[32,128], index: 10, kind: input, shape index: {}]   ;;  %s8442_s12 = inlined_call_operand.vmem [shape: f32[16,128], index: 12, kind: output, shape index: {}]  }
   0x1   :  { %6808 = vset.pattern.permute.xlu0 %v6973_v0  ;;  %v41_v1 = vld [vmem:[%s8430_s0] sm:$0xff]  ;;  %v72_v2 = vld [vmem:[%s8431_s1 + $0x78] sm:$0xff]  ;;  %v71_v4 = vld [vmem:[%s8431_s1 + $0x70] sm:$0xff]  ;;  %v6975_v29 = vmov 1.0   ;;  %vm541_vm11 = vcmask 130048  }
   0x2   :  { %46 = vperm.xlu0 %6808, %v41_v1   ;;  %6215 = vmatprep.subr.mxu1 %v72_v2  ;;  %v42_v5 = vld [vmem:[%s8430_s0 + $0x8] sm:$0xff]  ;;  %v69_v7 = vld [vmem:[%s8431_s1 + $0x60] sm:$0xff]  ;;  %v105_v8 = vld [vmem:[%s8432_s2 + $0x18] sm:$0xff]  ;;  %v7064_v9 = vand.u32 127, %v43_v3  ;;  %v7066_v10 = vshrl.u32 %v43_v3, 7  ;;  %s6977_s0 = smov 64  }
   0x3   :  { %6216 = vmatpush3.msra.mxu1 %v72_v2  ;;  %v70_v6 = vld [vmem:[%s8431_s1 + $0x68] sm:$0xff]  ;;  %v104_v11 = vld [vmem:[%s8432_s2 + $0x10] sm:$0xff]  ;;  %v68_v12 = vld [vmem:[%s8431_s1 + $0x58] sm:$0xff]  ;;  %6204 = vmatprep.subr.mxu0 %v105_v8 }
   0x4   :  { %6217 = vmatprep.subr.mxu1 %v71_v4  ;;  %6205 = vmatpush3.msra.mxu0 %v105_v8  ;;  %v103_v13 = vld [vmem:[%s8432_s2 + $0x8] sm:$0xff]  ;;  %v67_v14 = vld [vmem:[%s8431_s1 + $0x50] sm:$0xff]  ;;  %vm82_vm0 = vcmp.eq.s32.totalorder %v7064_v9, %v7066_v10  ;;  %v102_v15 = vld [vmem:[%s8432_s2] sm:$0xff]  ;;  %v7145_v59 = vsub.s32 3, %v7066_v10  ;;  %v7153_v61 = vsub.s32 4, %v7066_v10  ;;  %vm266_vm4 = vcmp.lt.s32.totalorder %v7064_v9, 8 }
   0x5   :  { %6218 = vmatpush3.msra.mxu1 %v71_v4  ;;  %6206 = vmatprep.subr.mxu0 %v104_v11  ;;  %v66_v16 = vld [vmem:[%s8431_s1 + $0x48] sm:$0xff]  ;;  %v5657_v18 = vsel %vm82_vm0, 1.0, %v6974_v17  ;;  %v65_v19 = vld [vmem:[%s8431_s1 + $0x40] sm:$0xff]  ;;  %v64_v20 = vld [vmem:[%s8431_s1 + $0x38] sm:$0xff]  ;;  %vm269_vm5 = vcmp.ge.s32.totalorder %v7064_v9, 8  ;;  %vm272_vm6 = vcmp.lt.s32.totalorder %v7064_v9, 16  ;;  %vm277_vm9 = vcmp.ge.s32.totalorder %v7066_v10, %v7064_v9 }
   0x6   :  { %49 = vperm.xlu0 %6808, %v42_v5   ;;  %6219 = vmatprep.subr.mxu1 %v70_v6  ;;  %v63_v21 = vld [vmem:[%s8431_s1 + $0x30] sm:$0xff]  ;;  %v62_v22 = vld [vmem:[%s8431_s1 + $0x28] sm:$0xff]  ;;  %v61_v23 = vld [vmem:[%s8431_s1 + $0x20] sm:$0xff]  ;;  %vm287_vm13 = vcmp.ge.s32.totalorder %v7064_v9, 16  ;;  %vm288_vm14 = vcmp.lt.s32.totalorder %v7064_v9, 24  ;;  %vm292_vm0 = vcmp.ge.s32.totalorder %v7064_v9, 24 }
   0x7   :  { %6220 = vmatpush3.msra.mxu1 %v70_v6  ;;  %6207 = vmatpush3.msra.mxu0 %v104_v11  ;;  %v60_v24 = vld [vmem:[%s8431_s1 + $0x18] sm:$0xff]  ;;  %v59_v25 = vld [vmem:[%s8431_s1 + $0x10] sm:$0xff]  ;;  %v58_v26 = vld [vmem:[%s8431_s1 + $0x8] sm:$0xff]  ;;  %v7169_v11 = vsel %vm266_vm4, 1.0, %v6974_v17 }
   0x8   :  { %6221 = vmatprep.subr.mxu1 %v69_v7  ;;  %6208 = vmatprep.subr.mxu0 %v103_v13  ;;  %v57_v27 = vld [vmem:[%s8431_s1] sm:$0xff]  ;;  %v300_v49 = vld [vmem:[%s8433_s3 + $0x18] sm:$0xff]  ;;  %v299_v50 = vld [vmem:[%s8433_s3 + $0x10] sm:$0xff] }
   0x9   :  { %6222 = vmatpush3.msra.mxu1 %v69_v7  ;;  %6209 = vmatpush3.msra.mxu0 %v103_v13  ;;  %v298_v51 = vld [vmem:[%s8433_s3 + $0x8] sm:$0xff]  ;;  %v297_v52 = vld [vmem:[%s8433_s3] sm:$0xff]  ;;  %vm7186_vm7 = vmand %vm269_vm5, %vm272_vm6 }
   0xa   :  { %6223 = vmatprep.subr.mxu1 %v68_v12  ;;  %6210 = vmatprep.subr.mxu0 %v102_v15  ;;  %v7150_v60 = vld [vmem:[%s8434_s7] sm:$0xff]  ;;  %vm7232_vm12 = vmand %vm266_vm4, %vm277_vm9 }
   0xb   :  { %6224 = vmatpush3.msra.mxu1 %v68_v12  ;;  %6211 = vmatpush3.msra.mxu0 %v102_v15  ;;  %v356_v62 = vrot.slane %v7150_v60, %v7145_v59  ;;  %v362_v1 = vrot.slane %v7150_v60, %v7153_v61  ;;  %vm289_vm15 = vmand %vm287_vm13, %vm288_vm14 }
   0xc   :  { %6225 = vmatprep.subr.mxu1 %v67_v14  ;;  %6212 = vmatprep.mubr.msk.f32.mxu0 %vm106_vm1, %v5657_v18 }
   0xd   :  { %6226 = vmatpush3.msra.mxu1 %v67_v14  ;;  %6213 = vmatmul.mubr.msk.f32.vlgmr.msra.gmra.mxu0 %vm106_vm1, %v5657_v18  ;;  %v7199_v18 = vsel %vm7186_vm7, 1.0, %v6974_v17 }
   0xe   :  { %6227 = vmatprep.subr.mxu1 %v66_v16  ;;  %6250 = vmatprep.subr.mxu0 %v300_v49 }
   0xf   :  { %6228 = vmatpush3.msra.mxu1 %v66_v16  ;;  %6251 = vmatpush3.msra.mxu0 %v300_v49 }
  0x10   :  { %6229 = vmatprep.subr.mxu1 %v65_v19  ;;  %6252 = vmatprep.subr.mxu0 %v299_v50 }
  0x11   :  { %6230 = vmatpush3.msra.mxu1 %v65_v19  ;;  %6253 = vmatpush3.msra.mxu0 %v299_v50 }
  0x12   :  { %6231 = vmatprep.subr.mxu1 %v64_v20  ;;  %6254 = vmatprep.subr.mxu0 %v298_v51 }
  0x13   :  { %6232 = vmatpush3.msra.mxu1 %v64_v20  ;;  %6255 = vmatpush3.msra.mxu0 %v298_v51 }
  0x14   :  { %6233 = vmatprep.subr.mxu1 %v63_v21  ;;  %6256 = vmatprep.subr.mxu0 %v297_v52 }
  0x15   :  { %6234 = vmatpush3.msra.mxu1 %v63_v21  ;;  %6257 = vmatpush3.msra.mxu0 %v297_v52 }
  0x16   :  { %6235 = vmatprep.subr.mxu1 %v62_v22 }
  0x17   :  { %6236 = vmatpush3.msra.mxu1 %v62_v22  ;;  %v75_v22 = vadd.s32 8, %v7066_v10 }
  0x18   :  { %6237 = vmatprep.subr.mxu1 %v61_v23 }
  0x19   :  { %6238 = vmatpush3.msra.mxu1 %v61_v23  ;;  %vm278_vm8 = vcmp.ge.s32.totalorder %v75_v22, %v7064_v9 }
  0x1a   :  { %6239 = vmatprep.subr.mxu1 %v60_v24  ;;  %vm7224_vm10 = vmand %vm7186_vm7, %vm278_vm8 }
  0x1b   :  { %6240 = vmatpush3.msra.mxu1 %v60_v24 }
  0x1c   :  { %6241 = vmatprep.subr.mxu1 %v59_v25 }
  0x1d   :  { %6242 = vmatpush3.msra.mxu1 %v59_v25 }
  0x1e   :  { %6243 = vmatprep.subr.mxu1 %v58_v26 }
  0x1f   :  { %6244 = vmatpush3.msra.mxu1 %v58_v26 }
  0x20   :  { %6245 = vmatprep.subr.mxu1 %v57_v27 }
  0x21   :  { %6246 = vmatpush3.msra.mxu1 %v57_v27 }
  0x7d   :  { %v47_v28 = vpop.permute.xlu0 %46 }
  0x7e   :  { %vm51_vm2 = vcmp.eq.s32.totalorder %v47_v28, %v7064_v9 }
  0x7f   :  { %6247 = vmatprep.mubr.msk.f32.mxu1 %vm51_vm2, %v6975_v29  ;;  %vm293_vm2 = vcmp.lt.s32.totalorder %v7064_v9, 32 }
  0x81   :  { %v50_v30 = vpop.permute.xlu0 %49 }
  0x82   :  { %vm52_vm3 = vcmp.eq.s32.totalorder %v50_v30, %v7064_v9 }
  0x83   :  { %6248 = vmatmul.mubr.msk.f32.vlgmr.msra.gmra.mxu1 %vm52_vm3, %v6975_v29  ;;  %vm294_vm3 = vmand %vm292_vm0, %vm293_vm2 }
  0xcd   :  { %v6214_v31 = vpop.f32.mrf.mxu0 }
  0xcf   :  { %v179_v33 = vpop.f32.mrf.mxu0 }
 0x143   :  { %v6249_v32 = vpop.f32.mrf.mxu1 }
 0x144   :  { %v7122_v36 = vadd.f32 %v6249_v32, %v6214_v31 }
 0x145   :  { %v254_v34 = vpop.f32.mrf.mxu1 }
 0x146   :  { %v7120_v35 = vadd.f32 %v254_v34, %v179_v33  ;;  %v329_v38 = vsel %vm106_vm1, %v7122_v36, 0.0 }
 0x148   :  { %v326_v37 = vsel %vm106_vm1, %v7120_v35, 0.0 }
 0x149   :  { %327 = vadd.xlane.f32.xlu1 %v326_v37 }
 0x14d   :  { %330 = vadd.xlane.f32.xlu1 %v329_v38 }
 0x1d2   :  { %v328_v39 = vpop.xlane.xlu1 %327 }
 0x1d3   :  { %v333_v40 = vmul.f32 0.03125, %v328_v39 }
 0x1d5   :  { %v335_v41 = vsub.f32 %v7120_v35, %v333_v40 }
 0x1d6   :  { %v331_v42 = vpop.xlane.xlu1 %330 }
 0x1d7   :  { %v334_v43 = vmul.f32 0.03125, %v331_v42  ;;  %v337_v44 = vmul.f32 %v335_v41, %v335_v41 }
 0x1d9   :  { %v336_v45 = vsub.f32 %v7122_v36, %v334_v43  ;;  %v339_v46 = vsel %vm106_vm1, %v337_v44, 0.0 }
 0x1da   :  { %340 = vadd.xlane.f32.xlu0 %v339_v46 }
 0x1db   :  { %v338_v47 = vmul.f32 %v336_v45, %v336_v45 }
 0x1dd   :  { %v342_v48 = vsel %vm106_vm1, %v338_v47, 0.0 }
 0x1de   :  { %343 = vadd.xlane.f32.xlu1 %v342_v48 }
 0x263   :  { %v341_v53 = vpop.xlane.xlu0 %340 }
 0x264   :  { %v345_v54 = vmul.f32 0.03125, %v341_v53 }
 0x266   :  { %v347_v55 = vadd.f32 1e-05, %v345_v54 }
 0x267   :  { %v344_v56 = vpop.xlane.xlu1 %343 }
 0x268   :  { %6809 = vrsqrt.f32 %v347_v55  ;;  %v346_v57 = vmul.f32 0.03125, %v344_v56 }
 0x26a   :  { %v348_v58 = vadd.f32 1e-05, %v346_v57 }
 0x26c   :  { %6811 = vrsqrt.f32 %v348_v58 }
 0x275   :  { %v6810_v63 = vpop.eup %6809 }
 0x276   :  { %v351_v0 = vmul.f32 %v6810_v63, %v335_v41 }
 0x278   :  { %v357_v2 = vmul.f32 %v356_v62, %v351_v0 }
 0x279   :  { %v6812_v3 = vpop.eup %6811 }
 0x27a   :  { %v352_v4 = vmul.f32 %v6812_v3, %v336_v45  ;;  %v363_v5 = vadd.f32 %v362_v1, %v357_v2 }
 0x27c   :  { %v358_v6 = vmul.f32 %v356_v62, %v352_v4  ;;  %6258 = vmatprep.mubr.msk.f32.mxu0 %vm106_vm1, %v363_v5  ;;  %v7266_v62 = vsel %vm289_vm15, 1.0, %v6974_v17 }
 0x27e   :  { %v364_v7 = vadd.f32 %v362_v1, %v358_v6 }
 0x280   :  { %6259 = vmatmul.mubr.msk.f32.vlgmr.msra.gmra.mxu0 %vm106_vm1, %v364_v7 }
 0x340   :  { %v7162_v8 = vpop.f32.mrf.mxu0 }
 0x341   :  { %452 = vrot.lane.b32.xlu1 %v7162_v8, %s6976_s16  ;;  %v447_v19 = vmul.f32 %v7162_v8, %v7169_v11  ;;  %v571_v21 = vmul.f32 %v7162_v8, %v7199_v18  ;;  %v862_v1 = vmul.f32 %v7162_v8, %v7266_v62 }
 0x342   :  { %v7171_v12 = vpop.f32.mrf.mxu0 }
 0x343   :  { %v446_v13 = vmul.f32 %v7169_v11, %v7171_v12  ;;  %v570_v20 = vmul.f32 %v7199_v18, %v7171_v12  ;;  %v861_v0 = vmul.f32 %v7266_v62, %v7171_v12 }
 0x345   :  { %450 = vrot.lane.b32.xlu1 %v7171_v12, %s6976_s16  ;;  %6265 = vmatprep.mubr.msk.f32.mxu0 %vm106_vm1, %v446_v13 }
 0x3b3   :  { %v7178_v14 = vpop.permute.xlu1 %452 }
 0x3b4   :  { %6261 = vmatprep.subr.msk.mxu0 %vm106_vm1, %v7178_v14 }
 0x3b5   :  { %6262 = vmatpush3.xpose.msk.msra.mxu0 %vm106_vm1, %v7178_v14 }
 0x3b7   :  { %v7190_v16 = vpop.permute.xlu1 %450 }
 0x3b8   :  { %6263 = vmatprep.subr.msk.mxu0 %vm106_vm1, %v7190_v16 }
 0x3b9   :  { %6264 = vmatpush3.xpose.msk.msra.mxu0 %vm106_vm1, %v7190_v16 }
 0x3ba   :  { %6268 = vmatprep.subr.msk.mxu0 %vm106_vm1, %v7178_v14 }
 0x3bc   :  { %6266 = vmatmul.mubr.msk.f32.vlgmr.msra.gmra.mxu0 %vm106_vm1, %v447_v19 }
 0x3bd   :  { %6269 = vmatpush3.xpose.msk.msra.mxu0 %vm106_vm1, %v7178_v14  ;;  %6272 = vmatprep.mubr.msk.f32.mxu0 %vm106_vm1, %v570_v20 }
 0x3be   :  { %6270 = vmatprep.subr.msk.mxu0 %vm106_vm1, %v7190_v16 }
 0x3c1   :  { %6271 = vmatpush3.xpose.msk.msra.mxu0 %vm106_vm1, %v7190_v16 }
 0x3c4   :  { %6273 = vmatmul.mubr.msk.f32.vlgmr.msra.gmra.mxu0 %vm106_vm1, %v571_v21 }
 0x47c   :  { %v6267_v23 = vpop.f32.mrf.mxu0 }
 0x47d   :  { %v7246_v45 = vsel %vm7224_vm10, %v6267_v23, -inf }
 0x47e   :  { %v530_v24 = vpop.f32.mrf.mxu0  ;;  %v545_v46 = vsel %vm541_vm11, %v7246_v45, -inf }
 0x47f   :  { %v539_v50 = vsel %vm7232_vm12, %v530_v24, -inf }
 0x480   :  { %v542_v51 = vsel %vm541_vm11, %v539_v50, -inf }
 0x484   :  { %v6274_v26 = vpop.f32.mrf.mxu0 }
 0x485   :  { %v654_v27 = vsel %vm7224_vm10, %v6274_v26, -inf }
 0x486   :  { %v644_v29 = vpop.f32.mrf.mxu0  ;;  %v658_v30 = vsel %vm541_vm11, %v654_v27, -inf }
 0x487   :  { %v653_v31 = vsel %vm7232_vm12, %v644_v29, -inf  ;;  %659 = vmax.xlane.f32.xlu0 %v658_v30 }
 0x488   :  { %v655_v32 = vsel %vm541_vm11, %v653_v31, -inf }
 0x489   :  { %656 = vmax.xlane.f32.xlu1 %v655_v32 }
 0x49d   :  { %678 = vrot.lane.b32.xlu0 %v7199_v18, %s6977_s0 }
 0x510   :  { %v660_v33 = vpop.xlane.xlu0 %659 }
 0x511   :  { %v662_v34 = vsub.f32 %v654_v27, %v660_v33 }
 0x512   :  { %v657_v37 = vpop.xlane.xlu1 %656 }
 0x513   :  { %v665_v38 = vmul.f32 1.442695, %v662_v34  ;;  %v661_v39 = vsub.f32 %v653_v31, %v657_v37 }
 0x514   :  { %v7250_v47 = vpop.permute.xlu0 %678 }
 0x515   :  { %6813 = vpow2.f32 %v665_v38  ;;  %v663_v40 = vmul.f32 1.442695, %v661_v39  ;;  %v682_v48 = vmul.f32 %v7162_v8, %v7250_v47  ;;  %v681_v49 = vmul.f32 %v7250_v47, %v7171_v12 }
 0x517   :  { %6815 = vpow2.f32 %v663_v40 }
 0x522   :  { %v6814_v41 = vpop.eup %6813 }
 0x523   :  { %v670_v42 = vsel %vm541_vm11, %v6814_v41, 0.0 }
 0x524   :  { %v6816_v43 = vpop.eup %6815  ;;  %671 = vadd.xlane.f32.xlu1 %v670_v42 }
 0x525   :  { %v667_v44 = vsel %vm541_vm11, %v6816_v43, 0.0 }
 0x526   :  { %668 = vadd.xlane.f32.xlu0 %v667_v44 }
 0x52a   :  { %546 = vmax.xlane.f32.xlu0 %v545_v46 }
 0x535   :  { %687 = vrot.lane.b32.xlu1 %v682_v48, %s6977_s0 }
 0x539   :  { %685 = vrot.lane.b32.xlu1 %v681_v49, %s6977_s0 }
 0x55d   :  { %543 = vmax.xlane.f32.xlu1 %v542_v51 }
 0x5ad   :  { %v672_v52 = vpop.xlane.xlu1 %671 }
 0x5ae   :  { %6817 = vrcp.f32 %v672_v52 }
 0x5af   :  { %v669_v53 = vpop.xlane.xlu0 %668 }
 0x5b0   :  { %6819 = vrcp.f32 %v669_v53 }
 0x5b1   :  { %v688_v54 = vpop.permute.xlu1 %687 }
 0x5b2   :  { %6275 = vmatprep.subr.mxu0 %v688_v54 }
 0x5b3   :  { %6276 = vmatpush3.msra.mxu0 %v688_v54  ;;  %v547_v29 = vpop.xlane.xlu0 %546 }
 0x5b4   :  { %v549_v30 = vsub.f32 %v7246_v45, %v547_v29 }
 0x5b5   :  { %v686_v55 = vpop.permute.xlu1 %685 }
 0x5b6   :  { %6277 = vmatprep.subr.mxu0 %v686_v55  ;;  %v552_v31 = vmul.f32 1.442695, %v549_v30 }
 0x5b7   :  { %6278 = vmatpush3.msra.mxu0 %v686_v55 }
 0x5b8   :  { %6289 = vmatprep.subr.msk.mxu0 %vm106_vm1, %v7178_v14 }
 0x5bb   :  { %v6818_v56 = vpop.eup %6817 }
 0x5bc   :  { %v676_v63 = vmul.f32 %v6818_v56, %v6814_v41 }
 0x5bd   :  { %v6820_v57 = vpop.eup %6819 }
 0x5be   :  { %v675_v58 = vmul.f32 %v6820_v57, %v6816_v43 }
 0x5c0   :  { %6279 = vmatprep.mubr.msk.f32.mxu0 %vm541_vm11, %v675_v58 }
 0x5c1   :  { %6280 = vmatmul.mubr.msk.f32.vlgmr.msra.gmra.mxu0 %vm541_vm11, %v676_v63 }
 0x5c2   :  { %6290 = vmatpush3.xpose.msk.msra.mxu0 %vm106_vm1, %v7178_v14  ;;  %6293 = vmatprep.mubr.msk.f32.mxu0 %vm106_vm1, %v861_v0 }
 0x5c3   :  { %6291 = vmatprep.subr.msk.mxu0 %vm106_vm1, %v7190_v16 }
 0x5c6   :  { %6292 = vmatpush3.xpose.msk.msra.mxu0 %vm106_vm1, %v7190_v16 }
 0x5c9   :  { %6294 = vmatmul.mubr.msk.f32.vlgmr.msra.gmra.mxu0 %vm106_vm1, %v862_v1 }
 0x5e6   :  { %v544_v2 = vpop.xlane.xlu1 %543 }
 0x5e7   :  { %v548_v3 = vsub.f32 %v539_v50, %v544_v2 }
 0x5e9   :  { %v550_v4 = vmul.f32 1.442695, %v548_v3 }
 0x5eb   :  { %6821 = vpow2.f32 %v550_v4 }
 0x5f8   :  { %v6822_v5 = vpop.eup %6821 }
 0x5f9   :  { %v554_v6 = vsel %vm541_vm11, %v6822_v5, 0.0 }
 0x5fa   :  { %555 = vadd.xlane.f32.xlu1 %v554_v6 }
 0x681   :  { %v7283_v7 = vpop.f32.mrf.mxu0 }
 0x683   :  { %v556_v13 = vpop.xlane.xlu1 %555  ;;  %v7285_v15 = vpop.f32.mrf.mxu0 }
 0x684   :  { %6823 = vrcp.f32 %v556_v13 }
 0x685   :  { %6825 = vpow2.f32 %v552_v31 }
 0x689   :  { %v6295_v19 = vpop.f32.mrf.mxu0 }
 0x68a   :  { %v945_v23 = vsel %vm7224_vm10, %v6295_v19, -inf }
 0x68b   :  { %v935_v20 = vpop.f32.mrf.mxu0  ;;  %v949_v26 = vsel %vm541_vm11, %v945_v23, -inf }
 0x68c   :  { %v944_v21 = vsel %vm7232_vm12, %v935_v20, -inf }
 0x68d   :  { %v946_v22 = vsel %vm541_vm11, %v944_v21, -inf }
 0x68e   :  { %947 = vmax.xlane.f32.xlu0 %v946_v22 }
 0x691   :  { %v6824_v24 = vpop.eup %6823 }
 0x692   :  { %950 = vmax.xlane.f32.xlu0 %v949_v26  ;;  %v562_v27 = vmul.f32 %v6824_v24, %v6822_v5  ;;  %v6826_v32 = vpop.eup %6825  ;;  %v7324_v5 = vsel %vm294_vm3, 1.0, %v6974_v17 }
 0x693   :  { %v557_v33 = vsel %vm541_vm11, %v6826_v32, 0.0  ;;  %v1065_v13 = vmul.f32 %v7324_v5, %v7171_v12  ;;  %v1066_v9 = vmul.f32 %v7162_v8, %v7324_v5 }
 0x694   :  { %6286 = vmatprep.mubr.msk.f32.mxu1 %vm541_vm11, %v562_v27 }
 0x6a8   :  { %565 = vrot.lane.b32.xlu0 %v7169_v11, %s6977_s0 }
 0x6ac   :  { %969 = vrot.lane.b32.xlu0 %v7266_v62, %s6977_s0 }
 0x6cb   :  { %558 = vadd.xlane.f32.xlu0 %v557_v33 }
 0x717   :  { %v948_v34 = vpop.xlane.xlu0 %947 }
 0x718   :  { %v952_v44 = vsub.f32 %v944_v21, %v948_v34 }
 0x71a   :  { %v954_v46 = vmul.f32 1.442695, %v952_v44 }
 0x71b   :  { %v951_v37 = vpop.xlane.xlu0 %950 }
 0x71c   :  { %v953_v43 = vsub.f32 %v945_v23, %v951_v37 }
 0x71e   :  { %v956_v45 = vmul.f32 1.442695, %v953_v43 }
 0x71f   :  { %v7300_v38 = vpop.permute.xlu0 %565 }
 0x720   :  { %v569_v39 = vmul.f32 %v7162_v8, %v7300_v38  ;;  %v568_v42 = vmul.f32 %v7300_v38, %v7171_v12  ;;  %6827 = vpow2.f32 %v956_v45 }
 0x721   :  { %6829 = vpow2.f32 %v954_v46 }
 0x722   :  { %776 = vrot.lane.b32.xlu1 %v569_v39, %s6977_s0 }
 0x723   :  { %v7305_v40 = vpop.permute.xlu0 %969 }
 0x724   :  { %v972_v41 = vmul.f32 %v7305_v40, %v7171_v12  ;;  %v973_v52 = vmul.f32 %v7162_v8, %v7305_v40 }
 0x726   :  { %976 = vrot.lane.b32.xlu0 %v972_v41, %s6977_s0  ;;  %774 = vrot.lane.b32.xlu1 %v568_v42, %s6977_s0 }
 0x72d   :  { %v6828_v48 = vpop.eup %6827 }
 0x72e   :  { %v961_v49 = vsel %vm541_vm11, %v6828_v48, 0.0  ;;  %v6830_v50 = vpop.eup %6829 }
 0x72f   :  { %v958_v51 = vsel %vm541_vm11, %v6830_v50, 0.0 }
 0x74a   :  { %962 = vadd.xlane.f32.xlu1 %v961_v49 }
 0x74e   :  { %959 = vadd.xlane.f32.xlu1 %v958_v51 }
 0x754   :  { %v559_v53 = vpop.xlane.xlu0 %558 }
 0x755   :  { %6831 = vrcp.f32 %v559_v53 }
 0x75f   :  { %978 = vrot.lane.b32.xlu1 %v973_v52, %s6977_s0 }
 0x762   :  { %v6832_v55 = vpop.eup %6831 }
 0x763   :  { %v563_v57 = vmul.f32 %v6832_v55, %v6826_v32  ;;  %v302_v55 = vld [vmem:[%s8435_s4 + $0x8] sm:$0xff] }
 0x794   :  { %v777_v54 = vpop.permute.xlu1 %776 }
 0x795   :  { %6282 = vmatprep.subr.mxu1 %v777_v54 }
 0x796   :  { %6283 = vmatpush3.msra.mxu1 %v777_v54  ;;  %v303_v54 = vld [vmem:[%s8435_s4 + $0x10] sm:$0xff] }
 0x798   :  { %v775_v56 = vpop.permute.xlu1 %774  ;;  %v977_v1 = vpop.permute.xlu0 %976 }
 0x799   :  { %6284 = vmatprep.subr.mxu1 %v775_v56 }
 0x79a   :  { %6285 = vmatpush3.msra.mxu1 %v775_v56  ;;  %v301_v56 = vld [vmem:[%s8435_s4] sm:$0xff] }
 0x79b   :  { %6287 = vmatmul.mubr.msk.f32.vlgmr.msra.gmra.mxu1 %vm541_vm11, %v563_v57 }
 0x7d3   :  { %v963_v58 = vpop.xlane.xlu1 %962 }
 0x7d4   :  { %6833 = vrcp.f32 %v963_v58 }
 0x7d7   :  { %v960_v63 = vpop.xlane.xlu1 %959 }
 0x7d8   :  { %6835 = vrcp.f32 %v960_v63 }
 0x7db   :  { %v979_v0 = vpop.permute.xlu1 %978 }
 0x7dc   :  { %6296 = vmatprep.subr.mxu1 %v979_v0 }
 0x7dd   :  { %6297 = vmatpush3.msra.mxu1 %v979_v0 }
 0x7de   :  { %6298 = vmatprep.subr.mxu1 %v977_v1 }
 0x7df   :  { %6299 = vmatpush3.msra.mxu1 %v977_v1 }
 0x7e0   :  { %6303 = vmatprep.subr.msk.mxu1 %vm106_vm1, %v7178_v14 }
 0x7e1   :  { %v6834_v2 = vpop.eup %6833 }
 0x7e2   :  { %v967_v6 = vmul.f32 %v6834_v2, %v6828_v48 }
 0x7e5   :  { %v6836_v3 = vpop.eup %6835 }
 0x7e6   :  { %v966_v4 = vmul.f32 %v6836_v3, %v6830_v50  ;;  %v304_v50 = vld [vmem:[%s8435_s4 + $0x18] sm:$0xff]  ;;  %v7380_v3 = vsub.s32 1, %v7066_v10 }
 0x7e8   :  { %6300 = vmatprep.mubr.msk.f32.mxu1 %vm541_vm11, %v966_v4  ;;  %v1355_v4 = vrot.slane %v7150_v60, %v7380_v3 }
 0x7e9   :  { %6301 = vmatmul.mubr.msk.f32.vlgmr.msra.gmra.mxu1 %vm541_vm11, %v967_v6 }
 0x7ea   :  { %6304 = vmatpush3.xpose.msk.msra.mxu1 %vm106_vm1, %v7178_v14  ;;  %6307 = vmatprep.mubr.msk.f32.mxu1 %vm106_vm1, %v1065_v13 }
 0x7eb   :  { %6305 = vmatprep.subr.msk.mxu1 %vm106_vm1, %v7190_v16 }
 0x7ee   :  { %6306 = vmatpush3.xpose.msk.msra.mxu1 %vm106_vm1, %v7190_v16 }
 0x7f1   :  { %6308 = vmatmul.mubr.msk.f32.vlgmr.msra.gmra.mxu1 %vm106_vm1, %v1066_v9 }
 0x85b   :  { %v6288_v17 = vpop.f32.mrf.mxu1 }
 0x85c   :  { %v858_v20 = vadd.f32 %v6288_v17, %v7283_v7 }
 0x85d   :  { %v852_v19 = vpop.f32.mrf.mxu1 }
 0x85e   :  { %v853_v57 = vadd.f32 %v852_v19, %v7285_v15 }
 0x8a9   :  { %v6302_v21 = vpop.f32.mrf.mxu1 }
 0x8aa   :  { %v7341_v22 = vadd.f32 %v6302_v21, %v858_v20 }
 0x8ab   :  { %v1054_v14 = vpop.f32.mrf.mxu1 }
 0x8ac   :  { %v1063_v63 = vadd.f32 %v1054_v14, %v853_v57 }
 0x8b1   :  { %v6309_v23 = vpop.f32.mrf.mxu1 }
 0x8b2   :  { %v1149_v24 = vsel %vm7224_vm10, %v6309_v23, -inf }
 0x8b3   :  { %v1139_v26 = vpop.f32.mrf.mxu1  ;;  %v1153_v16 = vsel %vm541_vm11, %v1149_v24, -inf }
 0x8b4   :  { %v1148_v27 = vsel %vm7232_vm12, %v1139_v26, -inf  ;;  %1154 = vmax.xlane.f32.xlu0 %v1153_v16 }
 0x8b5   :  { %v1150_v29 = vsel %vm541_vm11, %v1148_v27, -inf }
 0x8b6   :  { %1151 = vmax.xlane.f32.xlu1 %v1150_v29 }
 0x8c7   :  { %1173 = vrot.lane.b32.xlu1 %v7324_v5, %s6977_s0 }
 0x93d   :  { %v1155_v7 = vpop.xlane.xlu0 %1154 }
 0x93e   :  { %v1157_v30 = vsub.f32 %v1149_v24, %v1155_v7  ;;  %v308_v7 = vld [vmem:[%s8436_s5 + $0x18] sm:$0xff] }
 0x93f   :  { %v1152_v31 = vpop.xlane.xlu1 %1151  ;;  %6328 = vmatprep.subr.mxu1 %v308_v7 }
 0x940   :  { %v1160_v32 = vmul.f32 1.442695, %v1157_v30  ;;  %v1156_v37 = vsub.f32 %v1148_v27, %v1152_v31  ;;  %v307_v30 = vld [vmem:[%s8436_s5 + $0x10] sm:$0xff]  ;;  %6329 = vmatpush3.msra.mxu1 %v308_v7  ;;  %v306_v31 = vld [vmem:[%s8436_s5 + $0x8] sm:$0xff] }
 0x941   :  { %6330 = vmatprep.subr.mxu1 %v307_v30 }
 0x942   :  { %6837 = vpow2.f32 %v1160_v32  ;;  %v1158_v41 = vmul.f32 1.442695, %v1156_v37  ;;  %6331 = vmatpush3.msra.mxu1 %v307_v30  ;;  %v305_v32 = vld [vmem:[%s8436_s5] sm:$0xff]  ;;  %v323_v37 = vld [vmem:[%s8437_s6 + $0x70] sm:$0xff] }
 0x943   :  { %v7351_v33 = vpop.permute.xlu1 %1173  ;;  %6332 = vmatprep.subr.mxu1 %v306_v31 }
 0x944   :  { %v1177_v34 = vmul.f32 %v7162_v8, %v7351_v33  ;;  %6839 = vpow2.f32 %v1158_v41  ;;  %v1176_v45 = vmul.f32 %v7351_v33, %v7171_v12  ;;  %6333 = vmatpush3.msra.mxu1 %v306_v31  ;;  %v321_v41 = vld [vmem:[%s8437_s6 + $0x60] sm:$0xff] }
 0x945   :  { %6334 = vmatprep.subr.mxu1 %v305_v32 }
 0x946   :  { %1182 = vrot.lane.b32.xlu0 %v1177_v34, %s6977_s0  ;;  %6335 = vmatpush3.msra.mxu1 %v305_v32  ;;  %v324_v34 = vld [vmem:[%s8437_s6 + $0x78] sm:$0xff] }
 0x94f   :  { %v6838_v39 = vpop.eup %6837 }
 0x950   :  { %v1165_v42 = vsel %vm541_vm11, %v6838_v39, 0.0 }
 0x951   :  { %1166 = vadd.xlane.f32.xlu1 %v1165_v42  ;;  %v6840_v43 = vpop.eup %6839  ;;  %v320_v42 = vld [vmem:[%s8437_s6 + $0x58] sm:$0xff] }
 0x952   :  { %v1162_v44 = vsel %vm541_vm11, %v6840_v43, 0.0 }
 0x965   :  { %1163 = vadd.xlane.f32.xlu0 %v1162_v44  ;;  %v318_v44 = vld [vmem:[%s8437_s6 + $0x48] sm:$0xff] }
 0x97b   :  { %1180 = vrot.lane.b32.xlu0 %v1176_v45, %s6977_s0  ;;  %v317_v45 = vld [vmem:[%s8437_s6 + $0x40] sm:$0xff] }
 0x9b8   :  { %v1183_v46 = vpop.permute.xlu0 %1182 }
 0x9b9   :  { %6310 = vmatprep.subr.mxu0 %v1183_v46 }
 0x9ba   :  { %6311 = vmatpush3.msra.mxu0 %v1183_v46  ;;  %v316_v46 = vld [vmem:[%s8437_s6 + $0x38] sm:$0xff] }
 0x9da   :  { %v1167_v8 = vpop.xlane.xlu1 %1166 }
 0x9db   :  { %6841 = vrcp.f32 %v1167_v8  ;;  %v315_v8 = vld [vmem:[%s8437_s6 + $0x30] sm:$0xff] }
 0x9e8   :  { %v6842_v51 = vpop.eup %6841 }
 0x9e9   :  { %v1171_v53 = vmul.f32 %v6842_v51, %v6838_v39  ;;  %v322_v39 = vld [vmem:[%s8437_s6 + $0x68] sm:$0xff] }
 0x9ee   :  { %v1164_v48 = vpop.xlane.xlu0 %1163 }
 0x9ef   :  { %6843 = vrcp.f32 %v1164_v48  ;;  %v314_v48 = vld [vmem:[%s8437_s6 + $0x28] sm:$0xff] }
 0x9f2   :  { %v1181_v49 = vpop.permute.xlu0 %1180 }
 0x9f3   :  { %6312 = vmatprep.subr.mxu0 %v1181_v49 }
 0x9f4   :  { %6313 = vmatpush3.msra.mxu0 %v1181_v49  ;;  %v313_v49 = vld [vmem:[%s8437_s6 + $0x20] sm:$0xff] }
 0x9f5   :  { %6317 = vmatprep.subr.mxu0 %v304_v50 }
 0x9fc   :  { %v6844_v52 = vpop.eup %6843 }
 0x9fd   :  { %v1170_v12 = vmul.f32 %v6844_v52, %v6840_v43  ;;  %v319_v43 = vld [vmem:[%s8437_s6 + $0x50] sm:$0xff] }
 0x9ff   :  { %6314 = vmatprep.mubr.msk.f32.mxu0 %vm541_vm11, %v1170_v12 }
 0xa00   :  { %6315 = vmatmul.mubr.msk.f32.vlgmr.msra.gmra.mxu0 %vm541_vm11, %v1171_v53 }
 0xa01   :  { %6318 = vmatpush3.msra.mxu0 %v304_v50 }
 0xa02   :  { %6319 = vmatprep.subr.mxu0 %v303_v54 }
 0xa03   :  { %6320 = vmatpush3.msra.mxu0 %v303_v54 }
 0xa04   :  { %6321 = vmatprep.subr.mxu0 %v302_v55 }
 0xa05   :  { %6322 = vmatpush3.msra.mxu0 %v302_v55  ;;  %v7455_v55 = vsub.s32 5, %v7066_v10 }
 0xa06   :  { %6323 = vmatprep.subr.mxu0 %v301_v56 }
 0xa07   :  { %6324 = vmatpush3.msra.mxu0 %v301_v56  ;;  %v7458_v56 = vsub.s32 6, %v7066_v10  ;;  %v1387_v57 = vrot.slane %v7150_v60, %v7455_v55 }
 0xa08   :  { %6339 = vmatprep.subr.mxu0 %v324_v34 }
 0xac0   :  { %v6316_v58 = vpop.f32.mrf.mxu0 }
 0xac1   :  { %v1268_v2 = vadd.f32 %v6316_v58, %v7341_v22 }
 0xac2   :  { %v1258_v0 = vpop.f32.mrf.mxu0 }
 0xac3   :  { %v1267_v1 = vadd.f32 %v1258_v0, %v1063_v63  ;;  %v1393_v0 = vrot.slane %v7150_v60, %v7458_v56 }
 0xac5   :  { %6325 = vmatprep.mubr.msk.f32.mxu0 %vm106_vm1, %v1267_v1 }
 0xac6   :  { %6326 = vmatmul.mubr.msk.f32.vlgmr.msra.gmra.mxu0 %vm106_vm1, %v1268_v2 }
 0xac7   :  { %6340 = vmatpush3.msra.mxu0 %v324_v34 }
 0xac8   :  { %6341 = vmatprep.subr.mxu0 %v323_v37 }
 0xac9   :  { %6342 = vmatpush3.msra.mxu0 %v323_v37 }
 0xaca   :  { %6343 = vmatprep.subr.mxu0 %v322_v39 }
 0xacb   :  { %6344 = vmatpush3.msra.mxu0 %v322_v39 }
 0xacc   :  { %6345 = vmatprep.subr.mxu0 %v321_v41 }
 0xacd   :  { %6346 = vmatpush3.msra.mxu0 %v321_v41 }
 0xace   :  { %6347 = vmatprep.subr.mxu0 %v320_v42 }
 0xacf   :  { %6348 = vmatpush3.msra.mxu0 %v320_v42 }
 0xad0   :  { %6349 = vmatprep.subr.mxu0 %v319_v43 }
 0xad1   :  { %6350 = vmatpush3.msra.mxu0 %v319_v43 }
 0xad2   :  { %6351 = vmatprep.subr.mxu0 %v318_v44 }
 0xad3   :  { %6352 = vmatpush3.msra.mxu0 %v318_v44 }
 0xad4   :  { %6353 = vmatprep.subr.mxu0 %v317_v45 }
 0xad5   :  { %6354 = vmatpush3.msra.mxu0 %v317_v45 }
 0xad6   :  { %6355 = vmatprep.subr.mxu0 %v316_v46 }
 0xad7   :  { %6356 = vmatpush3.msra.mxu0 %v316_v46 }
 0xad8   :  { %6357 = vmatprep.subr.mxu0 %v315_v8 }
 0xad9   :  { %6358 = vmatpush3.msra.mxu0 %v315_v8 }
 0xada   :  { %6359 = vmatprep.subr.mxu0 %v314_v48 }
 0xadb   :  { %6360 = vmatpush3.msra.mxu0 %v314_v48 }
 0xadc   :  { %6361 = vmatprep.subr.mxu0 %v313_v49 }
 0xadd   :  { %6362 = vmatpush3.msra.mxu0 %v313_v49  ;;  %v5700_v49 = vld [vmem:[%s8433_s3 + $0x38] sm:$0xff] }
 0xade   :  { %6374 = vmatprep.subr.mxu1 %v5700_v49 }
 0xb86   :  { %v6327_v6 = vpop.f32.mrf.mxu0 }
 0xb87   :  { %v1351_v13 = vadd.f32 %v6327_v6, %v7122_v36 }
 0xb88   :  { %v1341_v15 = vpop.f32.mrf.mxu0 }
 0xb89   :  { %v7385_v9 = vadd.f32 %v1355_v4, %v1351_v13  ;;  %v1350_v17 = vadd.f32 %v1341_v15, %v7120_v35 }
 0xb8b   :  { %v7388_v19 = vadd.f32 %v1355_v4, %v1350_v17  ;;  %v1361_v20 = vsel %vm106_vm1, %v7385_v9, 0.0  ;;  %v312_v17 = vld [vmem:[%s8437_s6 + $0x18] sm:$0xff] }
 0xb8c   :  { %1362 = vadd.xlane.f32.xlu1 %v1361_v20  ;;  %6363 = vmatprep.subr.mxu0 %v312_v17  ;;  %v311_v20 = vld [vmem:[%s8437_s6 + $0x10] sm:$0xff] }
 0xb8d   :  { %v1358_v21 = vsel %vm106_vm1, %v7388_v19, 0.0  ;;  %6364 = vmatpush3.msra.mxu0 %v312_v17 }
 0xb8e   :  { %1359 = vadd.xlane.f32.xlu0 %v1358_v21  ;;  %6365 = vmatprep.subr.mxu0 %v311_v20  ;;  %v310_v21 = vld [vmem:[%s8437_s6 + $0x8] sm:$0xff] }
 0xb8f   :  { %6366 = vmatpush3.msra.mxu0 %v311_v20 }
 0xb90   :  { %6367 = vmatprep.subr.mxu0 %v310_v21 }
 0xb91   :  { %6368 = vmatpush3.msra.mxu0 %v310_v21 }
 0xc15   :  { %v1363_v22 = vpop.xlane.xlu1 %1362 }
 0xc16   :  { %v1365_v14 = vmul.f32 0.03125, %v1363_v22  ;;  %v309_v22 = vld [vmem:[%s8437_s6] sm:$0xff] }
 0xc17   :  { %v1360_v23 = vpop.xlane.xlu0 %1359  ;;  %6369 = vmatprep.subr.mxu0 %v309_v22 }
 0xc18   :  { %v1364_v24 = vmul.f32 0.03125, %v1360_v23  ;;  %v7395_v36 = vsub.f32 %v7385_v9, %v1365_v14  ;;  %6370 = vmatpush3.msra.mxu0 %v309_v22  ;;  %v7481_v14 = vsub.s32 0, %v7066_v10 }
 0xc1a   :  { %v7398_v26 = vsub.f32 %v7388_v19, %v1364_v24  ;;  %v1369_v27 = vmul.f32 %v7395_v36, %v7395_v36  ;;  %v1399_v23 = vrot.slane %v7150_v60, %v7481_v14 }
 0xc1c   :  { %v1368_v35 = vmul.f32 %v7398_v26, %v7398_v26  ;;  %v1373_v29 = vsel %vm106_vm1, %v1369_v27, 0.0 }
 0xc1e   :  { %v1370_v16 = vsel %vm106_vm1, %v1368_v35, 0.0 }
 0xc1f   :  { %1371 = vadd.xlane.f32.xlu1 %v1370_v16 }
 0xc23   :  { %1374 = vadd.xlane.f32.xlu1 %v1373_v29  ;;  %v7486_v29 = vsub.s32 2, %v7066_v10 }
 0xc25   :  { %v1563_v32 = vrot.slane %v7150_v60, %v7486_v29 }
 0xca8   :  { %v1372_v50 = vpop.xlane.xlu1 %1371 }
 0xca9   :  { %v1376_v51 = vmul.f32 0.03125, %v1372_v50  ;;  %v5699_v50 = vld [vmem:[%s8433_s3 + $0x30] sm:$0xff] }
 0xcab   :  { %v1378_v52 = vadd.f32 1e-05, %v1376_v51  ;;  %v5698_v51 = vld [vmem:[%s8433_s3 + $0x28] sm:$0xff] }
 0xcac   :  { %v1375_v12 = vpop.xlane.xlu1 %1374 }
 0xcad   :  { %6845 = vrsqrt.f32 %v1378_v52  ;;  %v1377_v53 = vmul.f32 0.03125, %v1375_v12  ;;  %v5697_v52 = vld [vmem:[%s8433_s3 + $0x20] sm:$0xff] }
 0xcaf   :  { %v1379_v54 = vadd.f32 1e-05, %v1377_v53 }
 0xcb1   :  { %6847 = vrsqrt.f32 %v1379_v54 }
 0xcba   :  { %v6846_v58 = vpop.eup %6845 }
 0xcbb   :  { %v1382_v63 = vmul.f32 %v6846_v58, %v7398_v26 }
 0xcbd   :  { %v1388_v1 = vmul.f32 %v1387_v57, %v1382_v63 }
 0xcbe   :  { %v6848_v2 = vpop.eup %6847 }
 0xcbf   :  { %v1383_v4 = vmul.f32 %v6848_v2, %v7395_v36  ;;  %v1394_v6 = vadd.f32 %v1393_v0, %v1388_v1 }
 0xcc1   :  { %v1389_v13 = vmul.f32 %v1387_v57, %v1383_v4  ;;  %6336 = vmatprep.mubr.msk.f32.mxu1 %vm106_vm1, %v1394_v6 }
 0xcc3   :  { %v1395_v15 = vadd.f32 %v1393_v0, %v1389_v13  ;;  %v7519_v0 = vld [vmem:[%s8434_s7 + $0x8] sm:$0xff] }
 0xcc4   :  { %v1629_v1 = vrot.slane %v7519_v0, %v7145_v59  ;;  %v1635_v6 = vrot.slane %v7519_v0, %v7153_v61 }
 0xcc5   :  { %6337 = vmatmul.mubr.msk.f32.vlgmr.msra.gmra.mxu1 %vm106_vm1, %v1395_v15 }
 0xcc6   :  { %6375 = vmatpush3.msra.mxu1 %v5700_v49 }
 0xcc7   :  { %6376 = vmatprep.subr.mxu1 %v5699_v50 }
 0xcc8   :  { %6377 = vmatpush3.msra.mxu1 %v5699_v50 }
 0xcc9   :  { %6378 = vmatprep.subr.mxu1 %v5698_v51 }
 0xcca   :  { %6379 = vmatpush3.msra.mxu1 %v5698_v51 }
 0xccb   :  { %6380 = vmatprep.subr.mxu1 %v5697_v52 }
 0xccc   :  { %6381 = vmatpush3.msra.mxu1 %v5697_v52 }
 0xd85   :  { %v6338_v24 = vpop.f32.mrf.mxu1 }
 0xd86   :  { %v1478_v36 = vadd.f32 %v6338_v24, %v1399_v23 }
 0xd87   :  { %v1472_v26 = vpop.f32.mrf.mxu1 }
 0xd88   :  { %v1473_v35 = vadd.f32 %v1472_v26, %v1399_v23  ;;  %v1482_v27 = vmax.f32 %v1478_v36, 0.0 }
 0xd8a   :  { %v1481_v16 = vmax.f32 %v1473_v35, 0.0 }
 0xd8c   :  { %6371 = vmatprep.mubr.f32.mxu0 %v1481_v16 }
 0xd8d   :  { %6372 = vmatmul.mubr.f32.vlgmr.msra.gmra.mxu0 %v1482_v27 }
 0xe4d   :  { %v6373_v7 = vpop.f32.mrf.mxu0 }
 0xe4e   :  { %v1559_v31 = vadd.f32 %v6373_v7, %v7385_v9 }
 0xe4f   :  { %v1549_v30 = vpop.f32.mrf.mxu0 }
 0xe50   :  { %v1558_v34 = vadd.f32 %v1549_v30, %v7388_v19  ;;  %v7494_v39 = vadd.f32 %v1563_v32, %v1559_v31 }
 0xe52   :  { %v7492_v37 = vadd.f32 %v1563_v32, %v1558_v34  ;;  %v1603_v10 = vsel %vm106_vm1, %v7494_v39, 0.0 }
 0xe54   :  { %v1600_v41 = vsel %vm106_vm1, %v7492_v37, 0.0 }
 0xe55   :  { %1601 = vadd.xlane.f32.xlu1 %v1600_v41 }
 0xe59   :  { %1604 = vadd.xlane.f32.xlu1 %v1603_v10 }
 0xede   :  { %v1602_v42 = vpop.xlane.xlu1 %1601 }
 0xedf   :  { %v1606_v43 = vmul.f32 0.03125, %v1602_v42 }
 0xee1   :  { %v1608_v9 = vsub.f32 %v7492_v37, %v1606_v43 }
 0xee2   :  { %v1605_v44 = vpop.xlane.xlu1 %1604 }
 0xee3   :  { %v1607_v60 = vmul.f32 0.03125, %v1605_v44  ;;  %v1610_v45 = vmul.f32 %v1608_v9, %v1608_v9 }
 0xee5   :  { %v1609_v19 = vsub.f32 %v7494_v39, %v1607_v60  ;;  %v1612_v46 = vsel %vm106_vm1, %v1610_v45, 0.0 }
 0xee6   :  { %1613 = vadd.xlane.f32.xlu1 %v1612_v46 }
 0xee7   :  { %v1611_v8 = vmul.f32 %v1609_v19, %v1609_v19 }
 0xee9   :  { %v1615_v48 = vsel %vm106_vm1, %v1611_v8, 0.0 }
 0xeea   :  { %1616 = vadd.xlane.f32.xlu0 %v1615_v48 }
 0xf6f   :  { %v1614_v12 = vpop.xlane.xlu1 %1613 }
 0xf70   :  { %v1618_v53 = vmul.f32 0.03125, %v1614_v12 }
 0xf72   :  { %v1620_v54 = vadd.f32 1e-05, %v1618_v53 }
 0xf73   :  { %v1617_v57 = vpop.xlane.xlu0 %1616 }
 0xf74   :  { %6849 = vrsqrt.f32 %v1620_v54  ;;  %v1619_v58 = vmul.f32 0.03125, %v1617_v57 }
 0xf76   :  { %v1621_v63 = vadd.f32 1e-05, %v1619_v58 }
 0xf78   :  { %6851 = vrsqrt.f32 %v1621_v63 }
 0xf81   :  { %v6850_v2 = vpop.eup %6849 }
 0xf82   :  { %v1624_v4 = vmul.f32 %v6850_v2, %v1608_v9 }
 0xf84   :  { %v1630_v13 = vmul.f32 %v1629_v1, %v1624_v4 }
 0xf85   :  { %v6852_v15 = vpop.eup %6851 }
 0xf86   :  { %v1625_v17 = vmul.f32 %v6852_v15, %v1609_v19  ;;  %v1636_v20 = vadd.f32 %v1635_v6, %v1630_v13 }
 0xf88   :  { %v1631_v21 = vmul.f32 %v1629_v1, %v1625_v17  ;;  %6382 = vmatprep.mubr.msk.f32.mxu1 %vm106_vm1, %v1636_v20 }
 0xf8a   :  { %v1637_v22 = vadd.f32 %v1635_v6, %v1631_v21 }
 0xf8c   :  { %6383 = vmatmul.mubr.msk.f32.vlgmr.msra.gmra.mxu1 %vm106_vm1, %v1637_v22 }
0x104c   :  { %v7527_v23 = vpop.f32.mrf.mxu1 }
0x104d   :  { %1725 = vrot.lane.b32.xlu1 %v7527_v23, %s6976_s16  ;;  %v1720_v27 = vmul.f32 %v7527_v23, %v7169_v11  ;;  %v2126_v7 = vmul.f32 %v7527_v23, %v7266_v62  ;;  %v1839_v31 = vmul.f32 %v7527_v23, %v7199_v18  ;;  %v1946_v12 = vmul.f32 %v7527_v23, %v7250_v47 }
0x104e   :  { %v7531_v24 = vpop.f32.mrf.mxu1  ;;  %v1837_v54 = vmul.f32 %v7527_v23, %v7300_v38 }
0x104f   :  { %1723 = vrot.lane.b32.xlu0 %v7531_v24, %s6976_s16  ;;  %v1719_v36 = vmul.f32 %v7169_v11, %v7531_v24  ;;  %v2125_v26 = vmul.f32 %v7266_v62, %v7531_v24  ;;  %v1838_v30 = vmul.f32 %v7199_v18, %v7531_v24  ;;  %v1945_v53 = vmul.f32 %v7531_v24, %v7250_v47 }
0x1050   :  { %v1836_v57 = vmul.f32 %v7531_v24, %v7300_v38 }
0x1051   :  { %6389 = vmatprep.mubr.msk.f32.mxu1 %vm106_vm1, %v1719_v36  ;;  %6417 = vmatprep.mubr.msk.f32.mxu0 %vm106_vm1, %v2125_v26 }
0x10bf   :  { %v7541_v35 = vpop.permute.xlu1 %1725 }
0x10c0   :  { %6385 = vmatprep.subr.msk.mxu1 %vm106_vm1, %v7541_v35  ;;  %6413 = vmatprep.subr.msk.mxu0 %vm106_vm1, %v7541_v35 }
0x10c1   :  { %6386 = vmatpush3.xpose.msk.msra.mxu1 %vm106_vm1, %v7541_v35  ;;  %6414 = vmatpush3.xpose.msk.msra.mxu0 %vm106_vm1, %v7541_v35  ;;  %v7551_v16 = vpop.permute.xlu0 %1723 }
0x10c2   :  { %6387 = vmatprep.subr.msk.mxu1 %vm106_vm1, %v7551_v16  ;;  %6415 = vmatprep.subr.msk.mxu0 %vm106_vm1, %v7551_v16 }
0x10c5   :  { %6388 = vmatpush3.xpose.msk.msra.mxu1 %vm106_vm1, %v7551_v16  ;;  %6416 = vmatpush3.xpose.msk.msra.mxu0 %vm106_vm1, %v7551_v16 }
0x10c6   :  { %6392 = vmatprep.subr.msk.mxu1 %vm106_vm1, %v7541_v35 }
0x10c8   :  { %6390 = vmatmul.mubr.msk.f32.vlgmr.msra.gmra.mxu1 %vm106_vm1, %v1720_v27  ;;  %6418 = vmatmul.mubr.msk.f32.vlgmr.msra.gmra.mxu0 %vm106_vm1, %v2126_v7 }
0x10c9   :  { %6393 = vmatpush3.xpose.msk.msra.mxu1 %vm106_vm1, %v7541_v35  ;;  %6396 = vmatprep.mubr.msk.f32.mxu1 %vm106_vm1, %v1838_v30 }
0x10ca   :  { %6394 = vmatprep.subr.msk.mxu1 %vm106_vm1, %v7551_v16 }
0x10cd   :  { %6395 = vmatpush3.xpose.msk.msra.mxu1 %vm106_vm1, %v7551_v16 }
0x10d0   :  { %6397 = vmatmul.mubr.msk.f32.vlgmr.msra.gmra.mxu1 %vm106_vm1, %v1839_v31 }
0x1188   :  { %v6391_v32 = vpop.f32.mrf.mxu1  ;;  %v6419_v42 = vpop.f32.mrf.mxu0 }
0x1189   :  { %v1813_v44 = vsel %vm7224_vm10, %v6391_v32, -inf  ;;  %v2209_v48 = vsel %vm7224_vm10, %v6419_v42, -inf }
0x118a   :  { %v1803_v34 = vpop.f32.mrf.mxu1  ;;  %v2199_v46 = vpop.f32.mrf.mxu0  ;;  %v1817_v8 = vsel %vm541_vm11, %v1813_v44, -inf  ;;  %v2213_v51 = vsel %vm541_vm11, %v2209_v48, -inf }
0x118b   :  { %v1812_v19 = vsel %vm7232_vm12, %v1803_v34, -inf  ;;  %v2208_v50 = vsel %vm7232_vm12, %v2199_v46, -inf }
0x118c   :  { %v1814_v49 = vsel %vm541_vm11, %v1812_v19, -inf  ;;  %v2210_v52 = vsel %vm541_vm11, %v2208_v50, -inf }
0x1190   :  { %v6398_v41 = vpop.f32.mrf.mxu1 }
0x1191   :  { %v1922_v10 = vsel %vm7224_vm10, %v6398_v41, -inf }
0x1192   :  { %v1912_v43 = vpop.f32.mrf.mxu1  ;;  %v1926_v9 = vsel %vm541_vm11, %v1922_v10, -inf }
0x1193   :  { %v1921_v60 = vsel %vm7232_vm12, %v1912_v43, -inf  ;;  %1927 = vmax.xlane.f32.xlu0 %v1926_v9 }
0x1194   :  { %v1923_v45 = vsel %vm541_vm11, %v1921_v60, -inf }
0x1195   :  { %1924 = vmax.xlane.f32.xlu1 %v1923_v45 }
0x1197   :  { %1818 = vmax.xlane.f32.xlu0 %v1817_v8 }
0x1199   :  { %1815 = vmax.xlane.f32.xlu1 %v1814_v49 }
0x119b   :  { %2214 = vmax.xlane.f32.xlu0 %v2213_v51  ;;  %v2233_v51 = vmul.f32 %v7527_v23, %v7305_v40 }
0x119d   :  { %2211 = vmax.xlane.f32.xlu1 %v2210_v52 }
0x11ae   :  { %1951 = vrot.lane.b32.xlu1 %v1946_v12, %s6977_s0 }
0x11b1   :  { %1949 = vrot.lane.b32.xlu0 %v1945_v53, %s6977_s0 }
0x11b2   :  { %2040 = vrot.lane.b32.xlu1 %v1837_v54, %s6977_s0 }
0x11b6   :  { %2038 = vrot.lane.b32.xlu1 %v1836_v57, %s6977_s0 }
0x121c   :  { %v1928_v58 = vpop.xlane.xlu0 %1927 }
0x121d   :  { %v1930_v4 = vsub.f32 %v1922_v10, %v1928_v58 }
0x121e   :  { %v1925_v63 = vpop.xlane.xlu1 %1924 }
0x121f   :  { %v1929_v20 = vsub.f32 %v1921_v60, %v1925_v63  ;;  %v1933_v36 = vmul.f32 1.442695, %v1930_v4 }
0x1220   :  { %v1819_v1 = vpop.xlane.xlu0 %1818 }
0x1221   :  { %v1821_v2 = vsub.f32 %v1813_v44, %v1819_v1  ;;  %v1931_v30 = vmul.f32 1.442695, %v1929_v20 }
0x1222   :  { %v1816_v6 = vpop.xlane.xlu1 %1815 }
0x1223   :  { %v1824_v13 = vmul.f32 1.442695, %v1821_v2  ;;  %v1820_v15 = vsub.f32 %v1812_v19, %v1816_v6 }
0x1224   :  { %v2215_v17 = vpop.xlane.xlu0 %2214 }
0x1225   :  { %6853 = vpow2.f32 %v1824_v13  ;;  %v1822_v21 = vmul.f32 1.442695, %v1820_v15  ;;  %v2217_v22 = vsub.f32 %v2209_v48, %v2215_v17 }
0x1226   :  { %v2212_v26 = vpop.xlane.xlu1 %2211 }
0x1227   :  { %6855 = vpow2.f32 %v1822_v21  ;;  %v2220_v27 = vmul.f32 1.442695, %v2217_v22  ;;  %v2216_v7 = vsub.f32 %v2208_v50, %v2212_v26  ;;  %v2232_v50 = vmul.f32 %v7531_v24, %v7305_v40 }
0x1228   :  { %v1950_v34 = vpop.permute.xlu0 %1949 }
0x1229   :  { %6857 = vpow2.f32 %v2220_v27  ;;  %v2218_v31 = vmul.f32 1.442695, %v2216_v7 }
0x122a   :  { %6859 = vpow2.f32 %v1933_v36  ;;  %v1952_v32 = vpop.permute.xlu1 %1951 }
0x122b   :  { %6861 = vpow2.f32 %v2218_v31  ;;  %6399 = vmatprep.subr.mxu1 %v1952_v32  ;;  %v2326_v31 = vmul.f32 %v7527_v23, %v7324_v5 }
0x122c   :  { %6400 = vmatpush3.msra.mxu1 %v1952_v32  ;;  %6863 = vpow2.f32 %v1931_v30  ;;  %v2325_v30 = vmul.f32 %v7324_v5, %v7531_v24 }
0x122d   :  { %6401 = vmatprep.subr.mxu1 %v1950_v34 }
0x122e   :  { %6402 = vmatpush3.msra.mxu1 %v1950_v34  ;;  %v2041_v41 = vpop.permute.xlu1 %2040 }
0x122f   :  { %6406 = vmatprep.subr.mxu1 %v2041_v41 }
0x1232   :  { %v6854_v10 = vpop.eup %6853  ;;  %v2039_v52 = vpop.permute.xlu1 %2038 }
0x1233   :  { %v1829_v42 = vsel %vm541_vm11, %v6854_v10, 0.0 }
0x1234   :  { %v6856_v43 = vpop.eup %6855  ;;  %1830 = vadd.xlane.f32.xlu0 %v1829_v42 }
0x1235   :  { %v1826_v9 = vsel %vm541_vm11, %v6856_v43, 0.0 }
0x1236   :  { %v6858_v44 = vpop.eup %6857  ;;  %1827 = vadd.xlane.f32.xlu1 %v1826_v9 }
0x1237   :  { %v6860_v60 = vpop.eup %6859  ;;  %v2225_v45 = vsel %vm541_vm11, %v6858_v44, 0.0 }
0x1238   :  { %v6862_v19 = vpop.eup %6861  ;;  %2226 = vadd.xlane.f32.xlu0 %v2225_v45  ;;  %v1938_v48 = vsel %vm541_vm11, %v6860_v60, 0.0 }
0x1239   :  { %v2222_v46 = vsel %vm541_vm11, %v6862_v19, 0.0  ;;  %v6864_v8 = vpop.eup %6863 }
0x123a   :  { %2223 = vadd.xlane.f32.xlu1 %v2222_v46  ;;  %v1935_v49 = vsel %vm541_vm11, %v6864_v8, 0.0 }
0x123c   :  { %1939 = vadd.xlane.f32.xlu0 %v1938_v48 }
0x123e   :  { %1936 = vadd.xlane.f32.xlu1 %v1935_v49  ;;  %v2433_v49 = vmul.f32 %v7527_v23, %v7351_v33 }
0x124f   :  { %2236 = vrot.lane.b32.xlu1 %v2232_v50, %s6977_s0 }
0x1252   :  { %2238 = vrot.lane.b32.xlu0 %v2233_v51, %s6977_s0 }
0x12bd   :  { %v1831_v12 = vpop.xlane.xlu0 %1830 }
0x12bf   :  { %v1828_v53 = vpop.xlane.xlu1 %1827 }
0x12c0   :  { %6865 = vrcp.f32 %v1828_v53 }
0x12c1   :  { %v2227_v54 = vpop.xlane.xlu0 %2226 }
0x12c3   :  { %v2224_v57 = vpop.xlane.xlu1 %2223 }
0x12c5   :  { %v1940_v58 = vpop.xlane.xlu0 %1939 }
0x12c6   :  { %6867 = vrcp.f32 %v1940_v58 }
0x12c7   :  { %v1937_v63 = vpop.xlane.xlu1 %1936 }
0x12c8   :  { %6869 = vrcp.f32 %v1937_v63 }
0x12c9   :  { %6871 = vrcp.f32 %v1831_v12  ;;  %v2239_v36 = vpop.permute.xlu0 %2238 }
0x12ca   :  { %6873 = vrcp.f32 %v2224_v57 }
0x12cb   :  { %6875 = vrcp.f32 %v2227_v54  ;;  %v2237_v27 = vpop.permute.xlu1 %2236 }
0x12cd   :  { %v6866_v1 = vpop.eup %6865 }
0x12ce   :  { %v1834_v17 = vmul.f32 %v6866_v1, %v6856_v43 }
0x12d3   :  { %v6868_v2 = vpop.eup %6867 }
0x12d4   :  { %v1944_v13 = vmul.f32 %v6868_v2, %v6860_v60  ;;  %v2432_v2 = vmul.f32 %v7531_v24, %v7351_v33  ;;  %v5703_v24 = vld [vmem:[%s8435_s4 + $0x30] sm:$0xff] }
0x12d5   :  { %v6870_v4 = vpop.eup %6869 }
0x12d6   :  { %v1943_v6 = vmul.f32 %v6870_v4, %v6864_v8  ;;  %v6872_v15 = vpop.eup %6871 }
0x12d7   :  { %v6874_v20 = vpop.eup %6873  ;;  %v1835_v21 = vmul.f32 %v6872_v15, %v6854_v10  ;;  %v5704_v15 = vld [vmem:[%s8435_s4 + $0x38] sm:$0xff] }
0x12d8   :  { %6403 = vmatprep.mubr.msk.f32.mxu1 %vm541_vm11, %v1943_v6  ;;  %v6876_v22 = vpop.eup %6875  ;;  %v2230_v26 = vmul.f32 %v6874_v20, %v6862_v19 }
0x12d9   :  { %6404 = vmatmul.mubr.msk.f32.vlgmr.msra.gmra.mxu1 %vm541_vm11, %v1944_v13  ;;  %v2231_v7 = vmul.f32 %v6876_v22, %v6858_v44 }
0x12da   :  { %6407 = vmatpush3.msra.mxu1 %v2041_v41  ;;  %6410 = vmatprep.mubr.msk.f32.mxu1 %vm541_vm11, %v1834_v17 }
0x12db   :  { %6408 = vmatprep.subr.mxu1 %v2039_v52 }
0x12dc   :  { %6409 = vmatpush3.msra.mxu1 %v2039_v52 }
0x12dd   :  { %6420 = vmatprep.subr.mxu1 %v2239_v36  ;;  %6411 = vmatmul.mubr.msk.f32.vlgmr.msra.gmra.mxu1 %vm541_vm11, %v1835_v21 }
0x12de   :  { %6421 = vmatpush3.msra.mxu1 %v2239_v36  ;;  %6424 = vmatprep.mubr.msk.f32.mxu1 %vm541_vm11, %v2230_v26  ;;  %v5702_v36 = vld [vmem:[%s8435_s4 + $0x28] sm:$0xff]  ;;  %v5701_v26 = vld [vmem:[%s8435_s4 + $0x20] sm:$0xff] }
0x12df   :  { %6422 = vmatprep.subr.mxu1 %v2237_v27 }
0x12e0   :  { %6423 = vmatpush3.msra.mxu1 %v2237_v27 }
0x12e1   :  { %6427 = vmatprep.subr.msk.mxu1 %vm106_vm1, %v7541_v35  ;;  %6425 = vmatmul.mubr.msk.f32.vlgmr.msra.gmra.mxu1 %vm541_vm11, %v2231_v7 }
0x12e2   :  { %6428 = vmatpush3.xpose.msk.msra.mxu1 %vm106_vm1, %v7541_v35  ;;  %6431 = vmatprep.mubr.msk.f32.mxu1 %vm106_vm1, %v2325_v30 }
0x12e3   :  { %6429 = vmatprep.subr.msk.mxu1 %vm106_vm1, %v7551_v16 }
0x12e6   :  { %6430 = vmatpush3.xpose.msk.msra.mxu1 %vm106_vm1, %v7551_v16 }
0x12e9   :  { %6432 = vmatmul.mubr.msk.f32.vlgmr.msra.gmra.mxu1 %vm106_vm1, %v2326_v31 }
0x1399   :  { %v6405_v32 = vpop.f32.mrf.mxu1 }
0x139b   :  { %v2027_v34 = vpop.f32.mrf.mxu1 }
0x139d   :  { %v6412_v41 = vpop.f32.mrf.mxu1 }
0x139e   :  { %v2122_v10 = vadd.f32 %v6412_v41, %v6405_v32  ;;  %v2611_v32 = vrot.slane %v7519_v0, %v7380_v3 }
0x139f   :  { %v2116_v42 = vpop.f32.mrf.mxu1 }
0x13a0   :  { %v2117_v43 = vadd.f32 %v2116_v42, %v2027_v34 }
0x13a1   :  { %v6426_v35 = vpop.f32.mrf.mxu1 }
0x13a2   :  { %v2324_v9 = vadd.f32 %v6426_v35, %v2122_v10 }
0x13a3   :  { %v2314_v44 = vpop.f32.mrf.mxu1 }
0x13a4   :  { %v2323_v60 = vadd.f32 %v2314_v44, %v2117_v43 }
0x13a9   :  { %v6433_v45 = vpop.f32.mrf.mxu1 }
0x13aa   :  { %v2409_v19 = vsel %vm7224_vm10, %v6433_v45, -inf }
0x13ab   :  { %v2399_v16 = vpop.f32.mrf.mxu1  ;;  %v2413_v46 = vsel %vm541_vm11, %v2409_v19, -inf }
0x13ac   :  { %v2408_v8 = vsel %vm7232_vm12, %v2399_v16, -inf  ;;  %2414 = vmax.xlane.f32.xlu1 %v2413_v46 }
0x13ad   :  { %v2410_v48 = vsel %vm541_vm11, %v2408_v8, -inf }
0x13ae   :  { %2411 = vmax.xlane.f32.xlu0 %v2410_v48 }
0x13bd   :  { %2438 = vrot.lane.b32.xlu1 %v2433_v49, %s6977_s0 }
0x1435   :  { %v2415_v50 = vpop.xlane.xlu1 %2414 }
0x1436   :  { %v2417_v51 = vsub.f32 %v2409_v19, %v2415_v50  ;;  %v5708_v50 = vld [vmem:[%s8436_s5 + $0x38] sm:$0xff] }
0x1437   :  { %v2412_v52 = vpop.xlane.xlu0 %2411  ;;  %6452 = vmatprep.subr.mxu1 %v5708_v50 }
0x1438   :  { %v2420_v12 = vmul.f32 1.442695, %v2417_v51  ;;  %v2416_v53 = vsub.f32 %v2408_v8, %v2412_v52  ;;  %v5707_v51 = vld [vmem:[%s8436_s5 + $0x30] sm:$0xff]  ;;  %6453 = vmatpush3.msra.mxu1 %v5708_v50  ;;  %v5706_v52 = vld [vmem:[%s8436_s5 + $0x28] sm:$0xff] }
0x1439   :  { %v2439_v54 = vpop.permute.xlu1 %2438  ;;  %6454 = vmatprep.subr.mxu1 %v5707_v51 }
0x143a   :  { %6877 = vpow2.f32 %v2420_v12  ;;  %v2418_v57 = vmul.f32 1.442695, %v2416_v53  ;;  %6434 = vmatprep.subr.mxu0 %v2439_v54  ;;  %6455 = vmatpush3.msra.mxu1 %v5707_v51  ;;  %v5705_v12 = vld [vmem:[%s8436_s5 + $0x20] sm:$0xff]  ;;  %v5724_v53 = vld [vmem:[%s8437_s6 + $0xf8] sm:$0xff] }
0x143b   :  { %6435 = vmatpush3.msra.mxu0 %v2439_v54  ;;  %6456 = vmatprep.subr.mxu1 %v5706_v52  ;;  %v5723_v54 = vld [vmem:[%s8437_s6 + $0xf0] sm:$0xff] }
0x143c   :  { %6879 = vpow2.f32 %v2418_v57  ;;  %6457 = vmatpush3.msra.mxu1 %v5706_v52  ;;  %v5722_v57 = vld [vmem:[%s8437_s6 + $0xe8] sm:$0xff] }
0x143d   :  { %6458 = vmatprep.subr.mxu1 %v5705_v12 }
0x143e   :  { %6459 = vmatpush3.msra.mxu1 %v5705_v12 }
0x1447   :  { %v6878_v58 = vpop.eup %6877 }
0x1448   :  { %v2425_v63 = vsel %vm541_vm11, %v6878_v58, 0.0 }
0x1449   :  { %v6880_v1 = vpop.eup %6879  ;;  %2426 = vadd.xlane.f32.xlu0 %v2425_v63  ;;  %v5720_v63 = vld [vmem:[%s8437_s6 + $0xd8] sm:$0xff] }
0x144a   :  { %v2422_v23 = vsel %vm541_vm11, %v6880_v1, 0.0 }
0x144d   :  { %2423 = vadd.xlane.f32.xlu0 %v2422_v23  ;;  %v5718_v23 = vld [vmem:[%s8437_s6 + $0xc8] sm:$0xff] }
0x1463   :  { %2436 = vrot.lane.b32.xlu0 %v2432_v2, %s6977_s0  ;;  %v5717_v2 = vld [vmem:[%s8437_s6 + $0xc0] sm:$0xff] }
0x14d2   :  { %v2427_v4 = vpop.xlane.xlu0 %2426 }
0x14d3   :  { %6881 = vrcp.f32 %v2427_v4  ;;  %v5716_v4 = vld [vmem:[%s8437_s6 + $0xb8] sm:$0xff] }
0x14d6   :  { %v2424_v6 = vpop.xlane.xlu0 %2423 }
0x14d7   :  { %6883 = vrcp.f32 %v2424_v6  ;;  %v5715_v6 = vld [vmem:[%s8437_s6 + $0xb0] sm:$0xff] }
0x14da   :  { %v2437_v13 = vpop.permute.xlu0 %2436 }
0x14db   :  { %6436 = vmatprep.subr.mxu0 %v2437_v13 }
0x14dc   :  { %6437 = vmatpush3.msra.mxu0 %v2437_v13  ;;  %v5714_v13 = vld [vmem:[%s8437_s6 + $0xa8] sm:$0xff] }
0x14dd   :  { %6441 = vmatprep.subr.mxu0 %v5704_v15 }
0x14e0   :  { %v6882_v17 = vpop.eup %6881 }
0x14e1   :  { %v2431_v22 = vmul.f32 %v6882_v17, %v6878_v58  ;;  %v5721_v58 = vld [vmem:[%s8437_s6 + $0xe0] sm:$0xff] }
0x14e4   :  { %v6884_v20 = vpop.eup %6883 }
0x14e5   :  { %v2430_v21 = vmul.f32 %v6884_v20, %v6880_v1  ;;  %v5719_v1 = vld [vmem:[%s8437_s6 + $0xd0] sm:$0xff] }
0x14e7   :  { %6438 = vmatprep.mubr.msk.f32.mxu0 %vm541_vm11, %v2430_v21 }
0x14e8   :  { %6439 = vmatmul.mubr.msk.f32.vlgmr.msra.gmra.mxu0 %vm541_vm11, %v2431_v22 }
0x14e9   :  { %6442 = vmatpush3.msra.mxu0 %v5704_v15  ;;  %v5713_v15 = vld [vmem:[%s8437_s6 + $0xa0] sm:$0xff] }
0x14ea   :  { %6443 = vmatprep.subr.mxu0 %v5703_v24 }
0x14eb   :  { %6444 = vmatpush3.msra.mxu0 %v5703_v24 }
0x14ec   :  { %6445 = vmatprep.subr.mxu0 %v5702_v36 }
0x14ed   :  { %6446 = vmatpush3.msra.mxu0 %v5702_v36 }
0x14ee   :  { %6447 = vmatprep.subr.mxu0 %v5701_v26 }
0x14ef   :  { %6448 = vmatpush3.msra.mxu0 %v5701_v26 }
0x14f0   :  { %6463 = vmatprep.subr.mxu0 %v5724_v53 }
0x15a8   :  { %v6440_v27 = vpop.f32.mrf.mxu0 }
0x15a9   :  { %v2524_v31 = vadd.f32 %v6440_v27, %v2324_v9  ;;  %v2643_v27 = vrot.slane %v7519_v0, %v7455_v55 }
0x15aa   :  { %v2514_v7 = vpop.f32.mrf.mxu0 }
0x15ab   :  { %v2523_v30 = vadd.f32 %v2514_v7, %v2323_v60 }
0x15ad   :  { %6449 = vmatprep.mubr.msk.f32.mxu0 %vm106_vm1, %v2523_v30 }
0x15ae   :  { %6450 = vmatmul.mubr.msk.f32.vlgmr.msra.gmra.mxu0 %vm106_vm1, %v2524_v31 }
0x15af   :  { %6464 = vmatpush3.msra.mxu0 %v5724_v53 }
0x15b0   :  { %6465 = vmatprep.subr.mxu0 %v5723_v54 }
0x15b1   :  { %6466 = vmatpush3.msra.mxu0 %v5723_v54 }
0x15b2   :  { %6467 = vmatprep.subr.mxu0 %v5722_v57 }
0x15b3   :  { %6468 = vmatpush3.msra.mxu0 %v5722_v57 }
0x15b4   :  { %6469 = vmatprep.subr.mxu0 %v5721_v58 }
0x15b5   :  { %6470 = vmatpush3.msra.mxu0 %v5721_v58 }
0x15b6   :  { %6471 = vmatprep.subr.mxu0 %v5720_v63 }
0x15b7   :  { %6472 = vmatpush3.msra.mxu0 %v5720_v63 }
0x15b8   :  { %6473 = vmatprep.subr.mxu0 %v5719_v1 }
0x15b9   :  { %6474 = vmatpush3.msra.mxu0 %v5719_v1 }
0x15ba   :  { %6475 = vmatprep.subr.mxu0 %v5718_v23 }
0x15bb   :  { %6476 = vmatpush3.msra.mxu0 %v5718_v23 }
0x15bc   :  { %6477 = vmatprep.subr.mxu0 %v5717_v2 }
0x15bd   :  { %6478 = vmatpush3.msra.mxu0 %v5717_v2 }
0x15be   :  { %6479 = vmatprep.subr.mxu0 %v5716_v4 }
0x15bf   :  { %6480 = vmatpush3.msra.mxu0 %v5716_v4 }
0x15c0   :  { %6481 = vmatprep.subr.mxu0 %v5715_v6 }
0x15c1   :  { %6482 = vmatpush3.msra.mxu0 %v5715_v6 }
0x15c2   :  { %6483 = vmatprep.subr.mxu0 %v5714_v13 }
0x15c3   :  { %6484 = vmatpush3.msra.mxu0 %v5714_v13 }
0x15c4   :  { %6485 = vmatprep.subr.mxu0 %v5713_v15 }
0x15c5   :  { %6486 = vmatpush3.msra.mxu0 %v5713_v15  ;;  %v5759_v15 = vld [vmem:[%s8433_s3 + $0x58] sm:$0xff] }
0x15c6   :  { %6498 = vmatprep.subr.mxu1 %v5759_v15 }
0x166e   :  { %v6451_v34 = vpop.f32.mrf.mxu0 }
0x166f   :  { %v2607_v41 = vadd.f32 %v6451_v34, %v7494_v39  ;;  %v2649_v34 = vrot.slane %v7519_v0, %v7458_v56 }
0x1670   :  { %v2597_v10 = vpop.f32.mrf.mxu0 }
0x1671   :  { %v7676_v42 = vadd.f32 %v2611_v32, %v2607_v41  ;;  %v2606_v43 = vadd.f32 %v2597_v10, %v7492_v37 }
0x1673   :  { %v7679_v35 = vadd.f32 %v2611_v32, %v2606_v43  ;;  %v2617_v9 = vsel %vm106_vm1, %v7676_v42, 0.0 }
0x1674   :  { %2618 = vadd.xlane.f32.xlu0 %v2617_v9  ;;  %v5712_v9 = vld [vmem:[%s8437_s6 + $0x98] sm:$0xff] }
0x1675   :  { %v2614_v44 = vsel %vm106_vm1, %v7679_v35, 0.0  ;;  %6487 = vmatprep.subr.mxu0 %v5712_v9 }
0x1676   :  { %2615 = vadd.xlane.f32.xlu1 %v2614_v44  ;;  %6488 = vmatpush3.msra.mxu0 %v5712_v9  ;;  %v5711_v44 = vld [vmem:[%s8437_s6 + $0x90] sm:$0xff] }
0x1677   :  { %6489 = vmatprep.subr.mxu0 %v5711_v44 }
0x1678   :  { %6490 = vmatpush3.msra.mxu0 %v5711_v44 }
0x16fd   :  { %v2619_v60 = vpop.xlane.xlu0 %2618 }
0x16fe   :  { %v2621_v45 = vmul.f32 0.03125, %v2619_v60  ;;  %v5710_v60 = vld [vmem:[%s8437_s6 + $0x88] sm:$0xff] }
0x16ff   :  { %v2616_v19 = vpop.xlane.xlu1 %2615  ;;  %6491 = vmatprep.subr.mxu0 %v5710_v60 }
0x1700   :  { %v7686_v39 = vsub.f32 %v7676_v42, %v2621_v45  ;;  %v2620_v16 = vmul.f32 0.03125, %v2616_v19  ;;  %6492 = vmatpush3.msra.mxu0 %v5710_v60  ;;  %v5709_v45 = vld [vmem:[%s8437_s6 + $0x80] sm:$0xff]  ;;  %v2655_v19 = vrot.slane %v7519_v0, %v7481_v14 }
0x1701   :  { %6493 = vmatprep.subr.mxu0 %v5709_v45 }
0x1702   :  { %v7689_v46 = vsub.f32 %v7679_v35, %v2620_v16  ;;  %v2625_v37 = vmul.f32 %v7686_v39, %v7686_v39  ;;  %6494 = vmatpush3.msra.mxu0 %v5709_v45 }
0x1704   :  { %v2629_v8 = vsel %vm106_vm1, %v2625_v37, 0.0  ;;  %v2624_v48 = vmul.f32 %v7689_v46, %v7689_v46 }
0x1705   :  { %2630 = vadd.xlane.f32.xlu0 %v2629_v8 }
0x1706   :  { %v2626_v49 = vsel %vm106_vm1, %v2624_v48, 0.0 }
0x1707   :  { %2627 = vadd.xlane.f32.xlu1 %v2626_v49  ;;  %v2819_v49 = vrot.slane %v7519_v0, %v7486_v29 }
0x178e   :  { %v2631_v17 = vpop.xlane.xlu0 %2630 }
0x178f   :  { %v2633_v20 = vmul.f32 0.03125, %v2631_v17  ;;  %v5758_v17 = vld [vmem:[%s8433_s3 + $0x50] sm:$0xff] }
0x1790   :  { %v2628_v21 = vpop.xlane.xlu1 %2627 }
0x1791   :  { %v2635_v22 = vadd.f32 1e-05, %v2633_v20  ;;  %v2632_v24 = vmul.f32 0.03125, %v2628_v21  ;;  %v5757_v20 = vld [vmem:[%s8433_s3 + $0x48] sm:$0xff]  ;;  %v5756_v21 = vld [vmem:[%s8433_s3 + $0x40] sm:$0xff] }
0x1793   :  { %6885 = vrsqrt.f32 %v2635_v22  ;;  %v2634_v36 = vadd.f32 1e-05, %v2632_v24 }
0x1795   :  { %6887 = vrsqrt.f32 %v2634_v36 }
0x17a0   :  { %v6886_v26 = vpop.eup %6885 }
0x17a1   :  { %v2639_v7 = vmul.f32 %v6886_v26, %v7686_v39 }
0x17a2   :  { %v6888_v30 = vpop.eup %6887 }
0x17a3   :  { %v2638_v31 = vmul.f32 %v6888_v30, %v7689_v46  ;;  %v2645_v32 = vmul.f32 %v2643_v27, %v2639_v7  ;;  %v7798_v30 = vld [vmem:[%s8434_s7 + $0x10] sm:$0xff] }
0x17a4   :  { %v2891_v9 = vrot.slane %v7798_v30, %v7153_v61 }
0x17a5   :  { %v2644_v41 = vmul.f32 %v2643_v27, %v2638_v31  ;;  %v2651_v43 = vadd.f32 %v2649_v34, %v2645_v32  ;;  %v2885_v32 = vrot.slane %v7798_v30, %v7145_v59 }
0x17a7   :  { %v2650_v10 = vadd.f32 %v2649_v34, %v2644_v41 }
0x17a9   :  { %6460 = vmatprep.mubr.msk.f32.mxu1 %vm106_vm1, %v2650_v10 }
0x17aa   :  { %6461 = vmatmul.mubr.msk.f32.vlgmr.msra.gmra.mxu1 %vm106_vm1, %v2651_v43 }
0x17ab   :  { %6499 = vmatpush3.msra.mxu1 %v5759_v15 }
0x17ac   :  { %6500 = vmatprep.subr.mxu1 %v5758_v17 }
0x17ad   :  { %6501 = vmatpush3.msra.mxu1 %v5758_v17 }
0x17ae   :  { %6502 = vmatprep.subr.mxu1 %v5757_v20 }
0x17af   :  { %6503 = vmatpush3.msra.mxu1 %v5757_v20 }
0x17b0   :  { %6504 = vmatprep.subr.mxu1 %v5756_v21 }
0x17b1   :  { %6505 = vmatpush3.msra.mxu1 %v5756_v21 }
0x186a   :  { %v6462_v39 = vpop.f32.mrf.mxu1 }
0x186b   :  { %v2734_v16 = vadd.f32 %v6462_v39, %v2655_v19 }
0x186c   :  { %v2728_v46 = vpop.f32.mrf.mxu1 }
0x186d   :  { %v2729_v37 = vadd.f32 %v2728_v46, %v2655_v19  ;;  %v2738_v48 = vmax.f32 %v2734_v16, 0.0 }
0x186f   :  { %v2737_v8 = vmax.f32 %v2729_v37, 0.0 }
0x1871   :  { %6495 = vmatprep.mubr.f32.mxu0 %v2737_v8 }
0x1872   :  { %6496 = vmatmul.mubr.f32.vlgmr.msra.gmra.mxu0 %v2738_v48 }
0x1932   :  { %v6497_v50 = vpop.f32.mrf.mxu0 }
0x1933   :  { %v2815_v51 = vadd.f32 %v6497_v50, %v7676_v42 }
0x1934   :  { %v2805_v52 = vpop.f32.mrf.mxu0 }
0x1935   :  { %v7770_v12 = vadd.f32 %v2819_v49, %v2815_v51  ;;  %v2814_v53 = vadd.f32 %v2805_v52, %v7679_v35 }
0x1937   :  { %v7773_v54 = vadd.f32 %v2819_v49, %v2814_v53  ;;  %v2859_v57 = vsel %vm106_vm1, %v7770_v12, 0.0 }
0x1938   :  { %2860 = vadd.xlane.f32.xlu0 %v2859_v57 }
0x1939   :  { %v2856_v58 = vsel %vm106_vm1, %v7773_v54, 0.0 }
0x193a   :  { %2857 = vadd.xlane.f32.xlu1 %v2856_v58 }
0x19c1   :  { %v2861_v63 = vpop.xlane.xlu0 %2860 }
0x19c2   :  { %v2863_v0 = vmul.f32 0.03125, %v2861_v63 }
0x19c3   :  { %v2858_v1 = vpop.xlane.xlu1 %2857 }
0x19c4   :  { %v2865_v42 = vsub.f32 %v7770_v12, %v2863_v0  ;;  %v2862_v23 = vmul.f32 0.03125, %v2858_v1 }
0x19c6   :  { %v2864_v2 = vsub.f32 %v7773_v54, %v2862_v23  ;;  %v2867_v4 = vmul.f32 %v2865_v42, %v2865_v42 }
0x19c8   :  { %v2871_v35 = vsel %vm106_vm1, %v2867_v4, 0.0  ;;  %v2866_v6 = vmul.f32 %v2864_v2, %v2864_v2 }
0x19c9   :  { %2872 = vadd.xlane.f32.xlu0 %v2871_v35 }
0x19ca   :  { %v2868_v13 = vsel %vm106_vm1, %v2866_v6, 0.0 }
0x19cb   :  { %2869 = vadd.xlane.f32.xlu1 %v2868_v13 }
0x1a52   :  { %v2873_v22 = vpop.xlane.xlu0 %2872 }
0x1a53   :  { %v2875_v24 = vmul.f32 0.03125, %v2873_v22 }
0x1a54   :  { %v2870_v36 = vpop.xlane.xlu1 %2869 }
0x1a55   :  { %v2877_v26 = vadd.f32 1e-05, %v2875_v24  ;;  %v2874_v27 = vmul.f32 0.03125, %v2870_v36 }
0x1a57   :  { %6889 = vrsqrt.f32 %v2877_v26  ;;  %v2876_v7 = vadd.f32 1e-05, %v2874_v27 }
0x1a59   :  { %6891 = vrsqrt.f32 %v2876_v7 }
0x1a64   :  { %v6890_v31 = vpop.eup %6889 }
0x1a65   :  { %v2881_v34 = vmul.f32 %v6890_v31, %v2865_v42 }
0x1a66   :  { %v6892_v41 = vpop.eup %6891 }
0x1a67   :  { %v2880_v10 = vmul.f32 %v6892_v41, %v2864_v2  ;;  %v2887_v43 = vmul.f32 %v2885_v32, %v2881_v34 }
0x1a69   :  { %v2886_v44 = vmul.f32 %v2885_v32, %v2880_v10  ;;  %v2893_v45 = vadd.f32 %v2891_v9, %v2887_v43 }
0x1a6b   :  { %v2892_v60 = vadd.f32 %v2891_v9, %v2886_v44 }
0x1a6d   :  { %6506 = vmatprep.mubr.msk.f32.mxu1 %vm106_vm1, %v2892_v60 }
0x1a6e   :  { %6507 = vmatmul.mubr.msk.f32.vlgmr.msra.gmra.mxu1 %vm106_vm1, %v2893_v45 }
0x1b2e   :  { %v7806_v19 = vpop.f32.mrf.mxu1 }
0x1b2f   :  { %2981 = vrot.lane.b32.xlu1 %v7806_v19, %s6976_s16  ;;  %v2976_v48 = vmul.f32 %v7806_v19, %v7169_v11  ;;  %v3382_v49 = vmul.f32 %v7806_v19, %v7266_v62  ;;  %v3095_v51 = vmul.f32 %v7806_v19, %v7199_v18  ;;  %v3202_v22 = vmul.f32 %v7806_v19, %v7250_v47 }
0x1b30   :  { %v7810_v39 = vpop.f32.mrf.mxu1  ;;  %v3093_v36 = vmul.f32 %v7806_v19, %v7300_v38 }
0x1b31   :  { %2979 = vrot.lane.b32.xlu0 %v7810_v39, %s6976_s16  ;;  %v2975_v16 = vmul.f32 %v7169_v11, %v7810_v39  ;;  %v3381_v46 = vmul.f32 %v7266_v62, %v7810_v39  ;;  %v3094_v50 = vmul.f32 %v7199_v18, %v7810_v39  ;;  %v3201_v24 = vmul.f32 %v7810_v39, %v7250_v47 }
0x1b32   :  { %v3092_v26 = vmul.f32 %v7810_v39, %v7300_v38 }
0x1b33   :  { %6513 = vmatprep.mubr.msk.f32.mxu1 %vm106_vm1, %v2975_v16  ;;  %6541 = vmatprep.mubr.msk.f32.mxu0 %vm106_vm1, %v3381_v46 }
0x1ba1   :  { %v7820_v37 = vpop.permute.xlu1 %2981 }
0x1ba2   :  { %6509 = vmatprep.subr.msk.mxu1 %vm106_vm1, %v7820_v37  ;;  %6537 = vmatprep.subr.msk.mxu0 %vm106_vm1, %v7820_v37 }
0x1ba3   :  { %6510 = vmatpush3.xpose.msk.msra.mxu1 %vm106_vm1, %v7820_v37  ;;  %6538 = vmatpush3.xpose.msk.msra.mxu0 %vm106_vm1, %v7820_v37  ;;  %v7830_v8 = vpop.permute.xlu0 %2979 }
0x1ba4   :  { %6511 = vmatprep.subr.msk.mxu1 %vm106_vm1, %v7830_v8  ;;  %6539 = vmatprep.subr.msk.mxu0 %vm106_vm1, %v7830_v8 }
0x1ba7   :  { %6512 = vmatpush3.xpose.msk.msra.mxu1 %vm106_vm1, %v7830_v8  ;;  %6540 = vmatpush3.xpose.msk.msra.mxu0 %vm106_vm1, %v7830_v8 }
0x1ba8   :  { %6516 = vmatprep.subr.msk.mxu1 %vm106_vm1, %v7820_v37 }
0x1baa   :  { %6514 = vmatmul.mubr.msk.f32.vlgmr.msra.gmra.mxu1 %vm106_vm1, %v2976_v48  ;;  %6542 = vmatmul.mubr.msk.f32.vlgmr.msra.gmra.mxu0 %vm106_vm1, %v3382_v49 }
0x1bab   :  { %6517 = vmatpush3.xpose.msk.msra.mxu1 %vm106_vm1, %v7820_v37  ;;  %6520 = vmatprep.mubr.msk.f32.mxu1 %vm106_vm1, %v3094_v50 }
0x1bac   :  { %6518 = vmatprep.subr.msk.mxu1 %vm106_vm1, %v7830_v8 }
0x1baf   :  { %6519 = vmatpush3.xpose.msk.msra.mxu1 %vm106_vm1, %v7830_v8 }
0x1bb2   :  { %6521 = vmatmul.mubr.msk.f32.vlgmr.msra.gmra.mxu1 %vm106_vm1, %v3095_v51 }
0x1c6a   :  { %v6515_v52 = vpop.f32.mrf.mxu1  ;;  %v6543_v63 = vpop.f32.mrf.mxu0 }
0x1c6b   :  { %v3069_v42 = vsel %vm7224_vm10, %v6515_v52, -inf  ;;  %v3465_v13 = vsel %vm7224_vm10, %v6543_v63, -inf }
0x1c6c   :  { %v3059_v53 = vpop.f32.mrf.mxu1  ;;  %v3455_v35 = vpop.f32.mrf.mxu0  ;;  %v3073_v6 = vsel %vm541_vm11, %v3069_v42, -inf  ;;  %v3469_v20 = vsel %vm541_vm11, %v3465_v13, -inf }
0x1c6d   :  { %v3068_v4 = vsel %vm7232_vm12, %v3059_v53, -inf  ;;  %v3464_v17 = vsel %vm7232_vm12, %v3455_v35, -inf }
0x1c6e   :  { %v3070_v15 = vsel %vm541_vm11, %v3068_v4, -inf  ;;  %v3466_v21 = vsel %vm541_vm11, %v3464_v17, -inf }
0x1c72   :  { %v6522_v57 = vpop.f32.mrf.mxu1 }
0x1c73   :  { %v3178_v58 = vsel %vm7224_vm10, %v6522_v57, -inf }
0x1c74   :  { %v3168_v0 = vpop.f32.mrf.mxu1  ;;  %v3182_v1 = vsel %vm541_vm11, %v3178_v58, -inf }
0x1c75   :  { %v3177_v23 = vsel %vm7232_vm12, %v3168_v0, -inf  ;;  %3183 = vmax.xlane.f32.xlu0 %v3182_v1 }
0x1c76   :  { %v3179_v2 = vsel %vm541_vm11, %v3177_v23, -inf }
0x1c77   :  { %3180 = vmax.xlane.f32.xlu1 %v3179_v2 }
0x1c79   :  { %3074 = vmax.xlane.f32.xlu0 %v3073_v6 }
0x1c7b   :  { %3071 = vmax.xlane.f32.xlu1 %v3070_v15 }
0x1c7d   :  { %3470 = vmax.xlane.f32.xlu0 %v3469_v20  ;;  %v3489_v20 = vmul.f32 %v7806_v19, %v7305_v40 }
0x1c7f   :  { %3467 = vmax.xlane.f32.xlu1 %v3466_v21 }
0x1c90   :  { %3207 = vrot.lane.b32.xlu1 %v3202_v22, %s6977_s0 }
0x1c93   :  { %3205 = vrot.lane.b32.xlu0 %v3201_v24, %s6977_s0 }
0x1c94   :  { %3296 = vrot.lane.b32.xlu1 %v3093_v36, %s6977_s0 }
0x1c98   :  { %3294 = vrot.lane.b32.xlu1 %v3092_v26, %s6977_s0 }
0x1cfe   :  { %v3184_v27 = vpop.xlane.xlu0 %3183 }
0x1cff   :  { %v3186_v34 = vsub.f32 %v3178_v58, %v3184_v27 }
0x1d00   :  { %v3181_v7 = vpop.xlane.xlu1 %3180 }
0x1d01   :  { %v3185_v44 = vsub.f32 %v3177_v23, %v3181_v7  ;;  %v3189_v16 = vmul.f32 1.442695, %v3186_v34 }
0x1d02   :  { %v3075_v31 = vpop.xlane.xlu0 %3074 }
0x1d03   :  { %v3077_v32 = vsub.f32 %v3069_v42, %v3075_v31  ;;  %v3187_v50 = vmul.f32 1.442695, %v3185_v44 }
0x1d04   :  { %v3072_v41 = vpop.xlane.xlu1 %3071 }
0x1d05   :  { %v3080_v10 = vmul.f32 1.442695, %v3077_v32  ;;  %v3076_v43 = vsub.f32 %v3068_v4, %v3072_v41 }
0x1d06   :  { %v3471_v9 = vpop.xlane.xlu0 %3470 }
0x1d07   :  { %6893 = vpow2.f32 %v3080_v10  ;;  %v3078_v60 = vmul.f32 1.442695, %v3076_v43  ;;  %v3473_v45 = vsub.f32 %v3465_v13, %v3471_v9 }
0x1d08   :  { %v3468_v46 = vpop.xlane.xlu1 %3467 }
0x1d09   :  { %6895 = vpow2.f32 %v3078_v60  ;;  %v3476_v48 = vmul.f32 1.442695, %v3473_v45  ;;  %v3472_v49 = vsub.f32 %v3464_v17, %v3468_v46  ;;  %v3488_v17 = vmul.f32 %v7810_v39, %v7305_v40 }
0x1d0a   :  { %v3206_v53 = vpop.permute.xlu0 %3205 }
0x1d0b   :  { %6897 = vpow2.f32 %v3476_v48  ;;  %v3474_v51 = vmul.f32 1.442695, %v3472_v49 }
0x1d0c   :  { %6899 = vpow2.f32 %v3189_v16  ;;  %v3208_v52 = vpop.permute.xlu1 %3207 }
0x1d0d   :  { %6901 = vpow2.f32 %v3474_v51  ;;  %6523 = vmatprep.subr.mxu1 %v3208_v52  ;;  %v3582_v51 = vmul.f32 %v7806_v19, %v7324_v5 }
0x1d0e   :  { %6524 = vmatpush3.msra.mxu1 %v3208_v52  ;;  %6903 = vpow2.f32 %v3187_v50  ;;  %v3581_v50 = vmul.f32 %v7324_v5, %v7810_v39 }
0x1d0f   :  { %6525 = vmatprep.subr.mxu1 %v3206_v53 }
0x1d10   :  { %6526 = vmatpush3.msra.mxu1 %v3206_v53  ;;  %v3297_v57 = vpop.permute.xlu1 %3296 }
0x1d11   :  { %6530 = vmatprep.subr.mxu1 %v3297_v57 }
0x1d14   :  { %v6894_v58 = vpop.eup %6893  ;;  %v3295_v21 = vpop.permute.xlu1 %3294 }
0x1d15   :  { %v3085_v63 = vsel %vm541_vm11, %v6894_v58, 0.0 }
0x1d16   :  { %v6896_v0 = vpop.eup %6895  ;;  %3086 = vadd.xlane.f32.xlu0 %v3085_v63 }
0x1d17   :  { %v3082_v1 = vsel %vm541_vm11, %v6896_v0, 0.0 }
0x1d18   :  { %v6898_v42 = vpop.eup %6897  ;;  %3083 = vadd.xlane.f32.xlu1 %v3082_v1 }
0x1d19   :  { %v6900_v23 = vpop.eup %6899  ;;  %v3481_v2 = vsel %vm541_vm11, %v6898_v42, 0.0 }
0x1d1a   :  { %v6902_v4 = vpop.eup %6901  ;;  %3482 = vadd.xlane.f32.xlu0 %v3481_v2  ;;  %v3194_v13 = vsel %vm541_vm11, %v6900_v23, 0.0 }
0x1d1b   :  { %v3478_v35 = vsel %vm541_vm11, %v6902_v4, 0.0  ;;  %v6904_v6 = vpop.eup %6903 }
0x1d1c   :  { %3479 = vadd.xlane.f32.xlu1 %v3478_v35  ;;  %v3191_v15 = vsel %vm541_vm11, %v6904_v6, 0.0 }
0x1d1e   :  { %3195 = vadd.xlane.f32.xlu0 %v3194_v13 }
0x1d20   :  { %3192 = vadd.xlane.f32.xlu1 %v3191_v15  ;;  %v3689_v15 = vmul.f32 %v7806_v19, %v7351_v33 }
0x1d31   :  { %3492 = vrot.lane.b32.xlu1 %v3488_v17, %s6977_s0 }
0x1d34   :  { %3494 = vrot.lane.b32.xlu0 %v3489_v20, %s6977_s0 }
0x1d9f   :  { %v3087_v22 = vpop.xlane.xlu0 %3086 }
0x1da1   :  { %v3084_v24 = vpop.xlane.xlu1 %3083 }
0x1da2   :  { %6905 = vrcp.f32 %v3084_v24 }
0x1da3   :  { %v3483_v36 = vpop.xlane.xlu0 %3482 }
0x1da5   :  { %v3480_v26 = vpop.xlane.xlu1 %3479 }
0x1da7   :  { %v3196_v27 = vpop.xlane.xlu0 %3195 }
0x1da8   :  { %6907 = vrcp.f32 %v3196_v27 }
0x1da9   :  { %v3193_v7 = vpop.xlane.xlu1 %3192 }
0x1daa   :  { %6909 = vrcp.f32 %v3193_v7 }
0x1dab   :  { %6911 = vrcp.f32 %v3087_v22  ;;  %v3495_v16 = vpop.permute.xlu0 %3494 }
0x1dac   :  { %6913 = vrcp.f32 %v3480_v26 }
0x1dad   :  { %6915 = vrcp.f32 %v3483_v36  ;;  %v3493_v48 = vpop.permute.xlu1 %3492 }
0x1daf   :  { %v6906_v31 = vpop.eup %6905 }
0x1db0   :  { %v3090_v9 = vmul.f32 %v6906_v31, %v6896_v0 }
0x1db5   :  { %v6908_v32 = vpop.eup %6907 }
0x1db6   :  { %v3200_v10 = vmul.f32 %v6908_v32, %v6900_v23  ;;  %v3688_v32 = vmul.f32 %v7810_v39, %v7351_v33  ;;  %v5762_v39 = vld [vmem:[%s8435_s4 + $0x50] sm:$0xff] }
0x1db7   :  { %v6910_v34 = vpop.eup %6909 }
0x1db8   :  { %v3199_v41 = vmul.f32 %v6910_v34, %v6904_v6  ;;  %v6912_v43 = vpop.eup %6911 }
0x1db9   :  { %v6914_v44 = vpop.eup %6913  ;;  %v3091_v60 = vmul.f32 %v6912_v43, %v6894_v58  ;;  %v5763_v43 = vld [vmem:[%s8435_s4 + $0x58] sm:$0xff] }
0x1dba   :  { %6527 = vmatprep.mubr.msk.f32.mxu1 %vm541_vm11, %v3199_v41  ;;  %v6916_v45 = vpop.eup %6915  ;;  %v3486_v46 = vmul.f32 %v6914_v44, %v6902_v4 }
0x1dbb   :  { %6528 = vmatmul.mubr.msk.f32.vlgmr.msra.gmra.mxu1 %vm541_vm11, %v3200_v10  ;;  %v3487_v49 = vmul.f32 %v6916_v45, %v6898_v42 }
0x1dbc   :  { %6531 = vmatpush3.msra.mxu1 %v3297_v57  ;;  %6534 = vmatprep.mubr.msk.f32.mxu1 %vm541_vm11, %v3090_v9 }
0x1dbd   :  { %6532 = vmatprep.subr.mxu1 %v3295_v21 }
0x1dbe   :  { %6533 = vmatpush3.msra.mxu1 %v3295_v21 }
0x1dbf   :  { %6544 = vmatprep.subr.mxu1 %v3495_v16  ;;  %6535 = vmatmul.mubr.msk.f32.vlgmr.msra.gmra.mxu1 %vm541_vm11, %v3091_v60 }
0x1dc0   :  { %6545 = vmatpush3.msra.mxu1 %v3495_v16  ;;  %6548 = vmatprep.mubr.msk.f32.mxu1 %vm541_vm11, %v3486_v46  ;;  %v5761_v16 = vld [vmem:[%s8435_s4 + $0x48] sm:$0xff]  ;;  %v5760_v46 = vld [vmem:[%s8435_s4 + $0x40] sm:$0xff] }
0x1dc1   :  { %6546 = vmatprep.subr.mxu1 %v3493_v48 }
0x1dc2   :  { %6547 = vmatpush3.msra.mxu1 %v3493_v48 }
0x1dc3   :  { %6551 = vmatprep.subr.msk.mxu1 %vm106_vm1, %v7820_v37  ;;  %6549 = vmatmul.mubr.msk.f32.vlgmr.msra.gmra.mxu1 %vm541_vm11, %v3487_v49 }
0x1dc4   :  { %6552 = vmatpush3.xpose.msk.msra.mxu1 %vm106_vm1, %v7820_v37  ;;  %6555 = vmatprep.mubr.msk.f32.mxu1 %vm106_vm1, %v3581_v50 }
0x1dc5   :  { %6553 = vmatprep.subr.msk.mxu1 %vm106_vm1, %v7830_v8 }
0x1dc8   :  { %6554 = vmatpush3.xpose.msk.msra.mxu1 %vm106_vm1, %v7830_v8 }
0x1dcb   :  { %6556 = vmatmul.mubr.msk.f32.vlgmr.msra.gmra.mxu1 %vm106_vm1, %v3582_v51 }
0x1e7b   :  { %v6529_v52 = vpop.f32.mrf.mxu1 }
0x1e7d   :  { %v3283_v53 = vpop.f32.mrf.mxu1 }
0x1e7f   :  { %v6536_v57 = vpop.f32.mrf.mxu1 }
0x1e80   :  { %v3378_v58 = vadd.f32 %v6536_v57, %v6529_v52  ;;  %v3867_v52 = vrot.slane %v7798_v30, %v7380_v3 }
0x1e81   :  { %v3372_v63 = vpop.f32.mrf.mxu1 }
0x1e82   :  { %v3373_v0 = vadd.f32 %v3372_v63, %v3283_v53 }
0x1e83   :  { %v6550_v37 = vpop.f32.mrf.mxu1 }
0x1e84   :  { %v3580_v1 = vadd.f32 %v6550_v37, %v3378_v58 }
0x1e85   :  { %v3570_v42 = vpop.f32.mrf.mxu1 }
0x1e86   :  { %v3579_v23 = vadd.f32 %v3570_v42, %v3373_v0 }
0x1e8b   :  { %v6557_v2 = vpop.f32.mrf.mxu1 }
0x1e8c   :  { %v3665_v4 = vsel %vm7224_vm10, %v6557_v2, -inf }
0x1e8d   :  { %v3669_v8 = vsel %vm541_vm11, %v3665_v4, -inf  ;;  %v3655_v35 = vpop.f32.mrf.mxu1 }
0x1e8e   :  { %v3664_v6 = vsel %vm7232_vm12, %v3655_v35, -inf  ;;  %3670 = vmax.xlane.f32.xlu1 %v3669_v8 }
0x1e8f   :  { %v3666_v13 = vsel %vm541_vm11, %v3664_v6, -inf }
0x1e90   :  { %3667 = vmax.xlane.f32.xlu0 %v3666_v13 }
0x1e9f   :  { %3694 = vrot.lane.b32.xlu1 %v3689_v15, %s6977_s0 }
0x1f17   :  { %v3671_v17 = vpop.xlane.xlu1 %3670 }
0x1f18   :  { %v3673_v20 = vsub.f32 %v3665_v4, %v3671_v17  ;;  %v5767_v17 = vld [vmem:[%s8436_s5 + $0x58] sm:$0xff] }
0x1f19   :  { %v3668_v21 = vpop.xlane.xlu0 %3667  ;;  %6576 = vmatprep.subr.mxu1 %v5767_v17 }
0x1f1a   :  { %v3676_v22 = vmul.f32 1.442695, %v3673_v20  ;;  %v3672_v24 = vsub.f32 %v3664_v6, %v3668_v21  ;;  %v5766_v20 = vld [vmem:[%s8436_s5 + $0x50] sm:$0xff]  ;;  %6577 = vmatpush3.msra.mxu1 %v5767_v17  ;;  %v5765_v21 = vld [vmem:[%s8436_s5 + $0x48] sm:$0xff] }
0x1f1b   :  { %v3695_v36 = vpop.permute.xlu1 %3694  ;;  %6578 = vmatprep.subr.mxu1 %v5766_v20 }
0x1f1c   :  { %6917 = vpow2.f32 %v3676_v22  ;;  %v3674_v26 = vmul.f32 1.442695, %v3672_v24  ;;  %6558 = vmatprep.subr.mxu0 %v3695_v36  ;;  %6579 = vmatpush3.msra.mxu1 %v5766_v20  ;;  %v5764_v22 = vld [vmem:[%s8436_s5 + $0x40] sm:$0xff]  ;;  %v5783_v24 = vld [vmem:[%s8437_s6 + $0x178] sm:$0xff] }
0x1f1d   :  { %6559 = vmatpush3.msra.mxu0 %v3695_v36  ;;  %6580 = vmatprep.subr.mxu1 %v5765_v21  ;;  %v5782_v36 = vld [vmem:[%s8437_s6 + $0x170] sm:$0xff] }
0x1f1e   :  { %6919 = vpow2.f32 %v3674_v26  ;;  %6581 = vmatpush3.msra.mxu1 %v5765_v21  ;;  %v5781_v26 = vld [vmem:[%s8437_s6 + $0x168] sm:$0xff] }
0x1f1f   :  { %6582 = vmatprep.subr.mxu1 %v5764_v22 }
0x1f20   :  { %6583 = vmatpush3.msra.mxu1 %v5764_v22 }
0x1f29   :  { %v6918_v27 = vpop.eup %6917 }
0x1f2a   :  { %v3681_v7 = vsel %vm541_vm11, %v6918_v27, 0.0 }
0x1f2b   :  { %v6920_v31 = vpop.eup %6919  ;;  %3682 = vadd.xlane.f32.xlu0 %v3681_v7  ;;  %v5779_v7 = vld [vmem:[%s8437_s6 + $0x158] sm:$0xff] }
0x1f2c   :  { %v3678_v19 = vsel %vm541_vm11, %v6920_v31, 0.0 }
0x1f2f   :  { %3679 = vadd.xlane.f32.xlu0 %v3678_v19  ;;  %v5777_v19 = vld [vmem:[%s8437_s6 + $0x148] sm:$0xff] }
0x1f45   :  { %3692 = vrot.lane.b32.xlu0 %v3688_v32, %s6977_s0  ;;  %v5776_v32 = vld [vmem:[%s8437_s6 + $0x140] sm:$0xff] }
0x1fb4   :  { %v3683_v34 = vpop.xlane.xlu0 %3682 }
0x1fb5   :  { %6921 = vrcp.f32 %v3683_v34  ;;  %v5775_v34 = vld [vmem:[%s8437_s6 + $0x138] sm:$0xff] }
0x1fb8   :  { %v3680_v41 = vpop.xlane.xlu0 %3679 }
0x1fb9   :  { %6923 = vrcp.f32 %v3680_v41  ;;  %v5774_v41 = vld [vmem:[%s8437_s6 + $0x130] sm:$0xff] }
0x1fbc   :  { %v3693_v10 = vpop.permute.xlu0 %3692 }
0x1fbd   :  { %6560 = vmatprep.subr.mxu0 %v3693_v10 }
0x1fbe   :  { %6561 = vmatpush3.msra.mxu0 %v3693_v10  ;;  %v5773_v10 = vld [vmem:[%s8437_s6 + $0x128] sm:$0xff] }
0x1fbf   :  { %6565 = vmatprep.subr.mxu0 %v5763_v43 }
0x1fc2   :  { %v6922_v9 = vpop.eup %6921 }
0x1fc3   :  { %v3687_v45 = vmul.f32 %v6922_v9, %v6918_v27  ;;  %v5780_v27 = vld [vmem:[%s8437_s6 + $0x160] sm:$0xff] }
0x1fc6   :  { %v6924_v44 = vpop.eup %6923 }
0x1fc7   :  { %v3686_v60 = vmul.f32 %v6924_v44, %v6920_v31  ;;  %v5778_v31 = vld [vmem:[%s8437_s6 + $0x150] sm:$0xff] }
0x1fc9   :  { %6562 = vmatprep.mubr.msk.f32.mxu0 %vm541_vm11, %v3686_v60 }
0x1fca   :  { %6563 = vmatmul.mubr.msk.f32.vlgmr.msra.gmra.mxu0 %vm541_vm11, %v3687_v45 }
0x1fcb   :  { %6566 = vmatpush3.msra.mxu0 %v5763_v43  ;;  %v5772_v43 = vld [vmem:[%s8437_s6 + $0x120] sm:$0xff] }
0x1fcc   :  { %6567 = vmatprep.subr.mxu0 %v5762_v39 }
0x1fcd   :  { %6568 = vmatpush3.msra.mxu0 %v5762_v39 }
0x1fce   :  { %6569 = vmatprep.subr.mxu0 %v5761_v16 }
0x1fcf   :  { %6570 = vmatpush3.msra.mxu0 %v5761_v16 }
0x1fd0   :  { %6571 = vmatprep.subr.mxu0 %v5760_v46 }
0x1fd1   :  { %6572 = vmatpush3.msra.mxu0 %v5760_v46 }
0x1fd2   :  { %6587 = vmatprep.subr.mxu0 %v5783_v24 }
0x208a   :  { %v6564_v48 = vpop.f32.mrf.mxu0 }
0x208b   :  { %v3780_v51 = vadd.f32 %v6564_v48, %v3580_v1  ;;  %v3899_v48 = vrot.slane %v7798_v30, %v7455_v55 }
0x208c   :  { %v3770_v49 = vpop.f32.mrf.mxu0 }
0x208d   :  { %v3779_v50 = vadd.f32 %v3770_v49, %v3579_v23 }
0x208f   :  { %6573 = vmatprep.mubr.msk.f32.mxu0 %vm106_vm1, %v3779_v50 }
0x2090   :  { %6574 = vmatmul.mubr.msk.f32.vlgmr.msra.gmra.mxu0 %vm106_vm1, %v3780_v51 }
0x2091   :  { %6588 = vmatpush3.msra.mxu0 %v5783_v24 }
0x2092   :  { %6589 = vmatprep.subr.mxu0 %v5782_v36 }
0x2093   :  { %6590 = vmatpush3.msra.mxu0 %v5782_v36 }
0x2094   :  { %6591 = vmatprep.subr.mxu0 %v5781_v26 }
0x2095   :  { %6592 = vmatpush3.msra.mxu0 %v5781_v26 }
0x2096   :  { %6593 = vmatprep.subr.mxu0 %v5780_v27 }
0x2097   :  { %6594 = vmatpush3.msra.mxu0 %v5780_v27 }
0x2098   :  { %6595 = vmatprep.subr.mxu0 %v5779_v7 }
0x2099   :  { %6596 = vmatpush3.msra.mxu0 %v5779_v7 }
0x209a   :  { %6597 = vmatprep.subr.mxu0 %v5778_v31 }
0x209b   :  { %6598 = vmatpush3.msra.mxu0 %v5778_v31 }
0x209c   :  { %6599 = vmatprep.subr.mxu0 %v5777_v19 }
0x209d   :  { %6600 = vmatpush3.msra.mxu0 %v5777_v19 }
0x209e   :  { %6601 = vmatprep.subr.mxu0 %v5776_v32 }
0x209f   :  { %6602 = vmatpush3.msra.mxu0 %v5776_v32 }
0x20a0   :  { %6603 = vmatprep.subr.mxu0 %v5775_v34 }
0x20a1   :  { %6604 = vmatpush3.msra.mxu0 %v5775_v34 }
0x20a2   :  { %6605 = vmatprep.subr.mxu0 %v5774_v41 }
0x20a3   :  { %6606 = vmatpush3.msra.mxu0 %v5774_v41 }
0x20a4   :  { %6607 = vmatprep.subr.mxu0 %v5773_v10 }
0x20a5   :  { %6608 = vmatpush3.msra.mxu0 %v5773_v10 }
0x20a6   :  { %6609 = vmatprep.subr.mxu0 %v5772_v43 }
0x20a7   :  { %6610 = vmatpush3.msra.mxu0 %v5772_v43  ;;  %v5818_v43 = vld [vmem:[%s8433_s3 + $0x78] sm:$0xff] }
0x20a8   :  { %6622 = vmatprep.subr.mxu1 %v5818_v43 }
0x2150   :  { %v6575_v53 = vpop.f32.mrf.mxu0 }
0x2151   :  { %v3863_v57 = vadd.f32 %v6575_v53, %v7770_v12  ;;  %v3905_v53 = vrot.slane %v7798_v30, %v7458_v56 }
0x2152   :  { %v3853_v58 = vpop.f32.mrf.mxu0 }
0x2153   :  { %v7955_v63 = vadd.f32 %v3867_v52, %v3863_v57  ;;  %v3862_v0 = vadd.f32 %v3853_v58, %v7773_v54 }
0x2155   :  { %v7958_v37 = vadd.f32 %v3867_v52, %v3862_v0  ;;  %v3873_v1 = vsel %vm106_vm1, %v7955_v63, 0.0 }
0x2156   :  { %3874 = vadd.xlane.f32.xlu0 %v3873_v1  ;;  %v5771_v1 = vld [vmem:[%s8437_s6 + $0x118] sm:$0xff] }
0x2157   :  { %v3870_v42 = vsel %vm106_vm1, %v7958_v37, 0.0  ;;  %6611 = vmatprep.subr.mxu0 %v5771_v1 }
0x2158   :  { %3871 = vadd.xlane.f32.xlu1 %v3870_v42  ;;  %6612 = vmatpush3.msra.mxu0 %v5771_v1  ;;  %v5770_v42 = vld [vmem:[%s8437_s6 + $0x110] sm:$0xff] }
0x2159   :  { %6613 = vmatprep.subr.mxu0 %v5770_v42 }
0x215a   :  { %6614 = vmatpush3.msra.mxu0 %v5770_v42 }
0x21df   :  { %v3875_v23 = vpop.xlane.xlu0 %3874 }
0x21e0   :  { %v3877_v2 = vmul.f32 0.03125, %v3875_v23  ;;  %v5769_v23 = vld [vmem:[%s8437_s6 + $0x108] sm:$0xff] }
0x21e1   :  { %v3872_v4 = vpop.xlane.xlu1 %3871  ;;  %6615 = vmatprep.subr.mxu0 %v5769_v23 }
0x21e2   :  { %v7965_v12 = vsub.f32 %v7955_v63, %v3877_v2  ;;  %v3876_v8 = vmul.f32 0.03125, %v3872_v4  ;;  %6616 = vmatpush3.msra.mxu0 %v5769_v23  ;;  %v5768_v2 = vld [vmem:[%s8437_s6 + $0x100] sm:$0xff]  ;;  %v3911_v4 = vrot.slane %v7798_v30, %v7481_v14 }
0x21e3   :  { %6617 = vmatprep.subr.mxu0 %v5768_v2 }
0x21e4   :  { %v7968_v35 = vsub.f32 %v7958_v37, %v3876_v8  ;;  %v3881_v54 = vmul.f32 %v7965_v12, %v7965_v12  ;;  %6618 = vmatpush3.msra.mxu0 %v5768_v2 }
0x21e6   :  { %v3885_v6 = vsel %vm106_vm1, %v3881_v54, 0.0  ;;  %v3880_v13 = vmul.f32 %v7968_v35, %v7968_v35 }
0x21e7   :  { %3886 = vadd.xlane.f32.xlu0 %v3885_v6 }
0x21e8   :  { %v3882_v15 = vsel %vm106_vm1, %v3880_v13, 0.0 }
0x21e9   :  { %3883 = vadd.xlane.f32.xlu1 %v3882_v15  ;;  %v4075_v15 = vrot.slane %v7798_v30, %v7486_v29 }
0x2270   :  { %v3887_v9 = vpop.xlane.xlu0 %3886 }
0x2271   :  { %v3889_v44 = vmul.f32 0.03125, %v3887_v9  ;;  %v5817_v9 = vld [vmem:[%s8433_s3 + $0x70] sm:$0xff] }
0x2272   :  { %v3884_v60 = vpop.xlane.xlu1 %3883 }
0x2273   :  { %v3891_v45 = vadd.f32 1e-05, %v3889_v44  ;;  %v3888_v39 = vmul.f32 0.03125, %v3884_v60  ;;  %v5816_v44 = vld [vmem:[%s8433_s3 + $0x68] sm:$0xff]  ;;  %v5815_v60 = vld [vmem:[%s8433_s3 + $0x60] sm:$0xff] }
0x2275   :  { %6925 = vrsqrt.f32 %v3891_v45  ;;  %v3890_v16 = vadd.f32 1e-05, %v3888_v39 }
0x2277   :  { %6927 = vrsqrt.f32 %v3890_v16 }
0x2282   :  { %v6926_v46 = vpop.eup %6925 }
0x2283   :  { %v3895_v49 = vmul.f32 %v6926_v46, %v7965_v12 }
0x2284   :  { %v6928_v50 = vpop.eup %6927 }
0x2285   :  { %v3894_v51 = vmul.f32 %v6928_v50, %v7968_v35  ;;  %v3901_v52 = vmul.f32 %v3899_v48, %v3895_v49  ;;  %v8077_v50 = vld [vmem:[%s8434_s7 + $0x18] sm:$0xff] }
0x2286   :  { %v4147_v1 = vrot.slane %v8077_v50, %v7153_v61 }
0x2287   :  { %v3900_v57 = vmul.f32 %v3899_v48, %v3894_v51  ;;  %v3907_v0 = vadd.f32 %v3905_v53, %v3901_v52  ;;  %v4141_v52 = vrot.slane %v8077_v50, %v7145_v59 }
0x2289   :  { %v3906_v58 = vadd.f32 %v3905_v53, %v3900_v57 }
0x228b   :  { %6584 = vmatprep.mubr.msk.f32.mxu1 %vm106_vm1, %v3906_v58 }
0x228c   :  { %6585 = vmatmul.mubr.msk.f32.vlgmr.msra.gmra.mxu1 %vm106_vm1, %v3907_v0 }
0x228d   :  { %6623 = vmatpush3.msra.mxu1 %v5818_v43 }
0x228e   :  { %6624 = vmatprep.subr.mxu1 %v5817_v9 }
0x228f   :  { %6625 = vmatpush3.msra.mxu1 %v5817_v9 }
0x2290   :  { %6626 = vmatprep.subr.mxu1 %v5816_v44 }
0x2291   :  { %6627 = vmatpush3.msra.mxu1 %v5816_v44 }
0x2292   :  { %6628 = vmatprep.subr.mxu1 %v5815_v60 }
0x2293   :  { %6629 = vmatpush3.msra.mxu1 %v5815_v60 }
0x234c   :  { %v6586_v12 = vpop.f32.mrf.mxu1 }
0x234d   :  { %v3990_v8 = vadd.f32 %v6586_v12, %v3911_v4 }
0x234e   :  { %v3984_v35 = vpop.f32.mrf.mxu1 }
0x234f   :  { %v3985_v54 = vadd.f32 %v3984_v35, %v3911_v4  ;;  %v3994_v13 = vmax.f32 %v3990_v8, 0.0 }
0x2351   :  { %v3993_v6 = vmax.f32 %v3985_v54, 0.0 }
0x2353   :  { %6619 = vmatprep.mubr.f32.mxu0 %v3993_v6 }
0x2354   :  { %6620 = vmatmul.mubr.f32.vlgmr.msra.gmra.mxu0 %v3994_v13 }
0x2414   :  { %v6621_v17 = vpop.f32.mrf.mxu0 }
0x2415   :  { %v4071_v20 = vadd.f32 %v6621_v17, %v7955_v63 }
0x2416   :  { %v4061_v21 = vpop.f32.mrf.mxu0 }
0x2417   :  { %v8049_v22 = vadd.f32 %v4075_v15, %v4071_v20  ;;  %v4070_v24 = vadd.f32 %v4061_v21, %v7958_v37 }
0x2419   :  { %v8052_v36 = vadd.f32 %v4075_v15, %v4070_v24  ;;  %v4115_v26 = vsel %vm106_vm1, %v8049_v22, 0.0 }
0x241a   :  { %4116 = vadd.xlane.f32.xlu0 %v4115_v26 }
0x241b   :  { %v4112_v27 = vsel %vm106_vm1, %v8052_v36, 0.0 }
0x241c   :  { %4113 = vadd.xlane.f32.xlu1 %v4112_v27 }
0x24a3   :  { %v4117_v7 = vpop.xlane.xlu0 %4116 }
0x24a4   :  { %v4119_v30 = vmul.f32 0.03125, %v4117_v7 }
0x24a5   :  { %v4114_v31 = vpop.xlane.xlu1 %4113 }
0x24a6   :  { %v4121_v63 = vsub.f32 %v8049_v22, %v4119_v30  ;;  %v4118_v19 = vmul.f32 0.03125, %v4114_v31 }
0x24a8   :  { %v4120_v32 = vsub.f32 %v8052_v36, %v4118_v19  ;;  %v4123_v34 = vmul.f32 %v4121_v63, %v4121_v63 }
0x24aa   :  { %v4127_v37 = vsel %vm106_vm1, %v4123_v34, 0.0  ;;  %v4122_v41 = vmul.f32 %v4120_v32, %v4120_v32 }
0x24ab   :  { %4128 = vadd.xlane.f32.xlu0 %v4127_v37 }
0x24ac   :  { %v4124_v10 = vsel %vm106_vm1, %v4122_v41, 0.0 }
0x24ad   :  { %4125 = vadd.xlane.f32.xlu1 %v4124_v10 }
0x2534   :  { %v4129_v45 = vpop.xlane.xlu0 %4128 }
0x2535   :  { %v4131_v39 = vmul.f32 0.03125, %v4129_v45 }
0x2536   :  { %v4126_v16 = vpop.xlane.xlu1 %4125 }
0x2537   :  { %v4133_v46 = vadd.f32 1e-05, %v4131_v39  ;;  %v4130_v48 = vmul.f32 0.03125, %v4126_v16 }
0x2539   :  { %6929 = vrsqrt.f32 %v4133_v46  ;;  %v4132_v49 = vadd.f32 1e-05, %v4130_v48 }
0x253b   :  { %6931 = vrsqrt.f32 %v4132_v49 }
0x2546   :  { %v6930_v51 = vpop.eup %6929 }
0x2547   :  { %v4137_v53 = vmul.f32 %v6930_v51, %v4121_v63 }
0x2548   :  { %v6932_v57 = vpop.eup %6931 }
0x2549   :  { %v4136_v58 = vmul.f32 %v6932_v57, %v4120_v32  ;;  %v4143_v0 = vmul.f32 %v4141_v52, %v4137_v53 }
0x254b   :  { %v4142_v42 = vmul.f32 %v4141_v52, %v4136_v58  ;;  %v4149_v2 = vadd.f32 %v4147_v1, %v4143_v0 }
0x254d   :  { %v4148_v23 = vadd.f32 %v4147_v1, %v4142_v42 }
0x254f   :  { %6630 = vmatprep.mubr.msk.f32.mxu1 %vm106_vm1, %v4148_v23 }
0x2550   :  { %6631 = vmatmul.mubr.msk.f32.vlgmr.msra.gmra.mxu1 %vm106_vm1, %v4149_v2 }
0x2610   :  { %v8085_v4 = vpop.f32.mrf.mxu1 }
0x2611   :  { %4237 = vrot.lane.b32.xlu1 %v8085_v4, %s6976_s16  ;;  %v4232_v13 = vmul.f32 %v8085_v4, %v7169_v11  ;;  %v4638_v15 = vmul.f32 %v8085_v4, %v7266_v62  ;;  %v4458_v9 = vmul.f32 %v8085_v4, %v7250_v47  ;;  %v4349_v60 = vmul.f32 %v8085_v4, %v7300_v38 }
0x2612   :  { %v8089_v12 = vpop.f32.mrf.mxu1 }
0x2613   :  { %4235 = vrot.lane.b32.xlu0 %v8089_v12, %s6976_s16  ;;  %v4231_v8 = vmul.f32 %v7169_v11, %v8089_v12  ;;  %v4637_v35 = vmul.f32 %v7266_v62, %v8089_v12  ;;  %v4350_v17 = vmul.f32 %v7199_v18, %v8089_v12  ;;  %v4351_v11 = vmul.f32 %v8085_v4, %v7199_v18 }
0x2614   :  { %v4457_v44 = vmul.f32 %v8089_v12, %v7250_v47  ;;  %v4348_v45 = vmul.f32 %v8089_v12, %v7300_v38 }
0x2615   :  { %6637 = vmatprep.mubr.msk.f32.mxu1 %vm106_vm1, %v4231_v8  ;;  %6665 = vmatprep.mubr.msk.f32.mxu0 %vm106_vm1, %v4637_v35 }
0x2683   :  { %v8099_v54 = vpop.permute.xlu1 %4237 }
0x2684   :  { %6633 = vmatprep.subr.msk.mxu1 %vm106_vm1, %v8099_v54  ;;  %6661 = vmatprep.subr.msk.mxu0 %vm106_vm1, %v8099_v54 }
0x2685   :  { %6634 = vmatpush3.xpose.msk.msra.mxu1 %vm106_vm1, %v8099_v54  ;;  %6662 = vmatpush3.xpose.msk.msra.mxu0 %vm106_vm1, %v8099_v54  ;;  %v8109_v6 = vpop.permute.xlu0 %4235 }
0x2686   :  { %6635 = vmatprep.subr.msk.mxu1 %vm106_vm1, %v8109_v6  ;;  %6663 = vmatprep.subr.msk.mxu0 %vm106_vm1, %v8109_v6 }
0x2689   :  { %6636 = vmatpush3.xpose.msk.msra.mxu1 %vm106_vm1, %v8109_v6  ;;  %6664 = vmatpush3.xpose.msk.msra.mxu0 %vm106_vm1, %v8109_v6 }
0x268a   :  { %6640 = vmatprep.subr.msk.mxu1 %vm106_vm1, %v8099_v54 }
0x268c   :  { %6638 = vmatmul.mubr.msk.f32.vlgmr.msra.gmra.mxu1 %vm106_vm1, %v4232_v13  ;;  %6666 = vmatmul.mubr.msk.f32.vlgmr.msra.gmra.mxu0 %vm106_vm1, %v4638_v15 }
0x268d   :  { %6641 = vmatpush3.xpose.msk.msra.mxu1 %vm106_vm1, %v8099_v54  ;;  %6644 = vmatprep.mubr.msk.f32.mxu1 %vm106_vm1, %v4350_v17 }
0x268e   :  { %6642 = vmatprep.subr.msk.mxu1 %vm106_vm1, %v8109_v6 }
0x2691   :  { %6643 = vmatpush3.xpose.msk.msra.mxu1 %vm106_vm1, %v8109_v6 }
0x2694   :  { %6645 = vmatmul.mubr.msk.f32.vlgmr.msra.gmra.mxu1 %vm106_vm1, %v4351_v11 }
0x274c   :  { %v6639_v62 = vpop.f32.mrf.mxu1  ;;  %v6667_v26 = vpop.f32.mrf.mxu0 }
0x274d   :  { %v4325_v30 = vsel %vm7224_vm10, %v6639_v62, -inf  ;;  %v4721_v34 = vsel %vm7224_vm10, %v6667_v26, -inf }
0x274e   :  { %v4315_v20 = vpop.f32.mrf.mxu1  ;;  %v4329_v19 = vsel %vm541_vm11, %v4325_v30, -inf  ;;  %v4711_v32 = vpop.f32.mrf.mxu0  ;;  %v4725_v10 = vsel %vm541_vm11, %v4721_v34, -inf }
0x274f   :  { %v4324_v63 = vsel %vm7232_vm12, %v4315_v20, -inf  ;;  %v4720_v41 = vsel %vm7232_vm12, %v4711_v32, -inf }
0x2750   :  { %v4326_v37 = vsel %vm541_vm11, %v4324_v63, -inf  ;;  %v4722_v43 = vsel %vm541_vm11, %v4720_v41, -inf }
0x2754   :  { %v6646_v21 = vpop.f32.mrf.mxu1 }
0x2755   :  { %v4434_v24 = vsel %vm7224_vm10, %v6646_v21, -inf }
0x2756   :  { %v4438_v27 = vsel %vm541_vm11, %v4434_v24, -inf  ;;  %v4424_v7 = vpop.f32.mrf.mxu1 }
0x2757   :  { %v4433_v31 = vsel %vm7232_vm12, %v4424_v7, -inf  ;;  %4439 = vmax.xlane.f32.xlu0 %v4438_v27 }
0x2758   :  { %v4435_v18 = vsel %vm541_vm11, %v4433_v31, -inf }
0x2759   :  { %4436 = vmax.xlane.f32.xlu1 %v4435_v18 }
0x275b   :  { %4330 = vmax.xlane.f32.xlu0 %v4329_v19  ;;  %v4745_v19 = vmul.f32 %v8085_v4, %v7305_v40 }
0x275d   :  { %4327 = vmax.xlane.f32.xlu1 %v4326_v37 }
0x275f   :  { %4726 = vmax.xlane.f32.xlu0 %v4725_v10 }
0x2761   :  { %4723 = vmax.xlane.f32.xlu1 %v4722_v43 }
0x2772   :  { %4463 = vrot.lane.b32.xlu1 %v4458_v9, %s6977_s0 }
0x2775   :  { %4461 = vrot.lane.b32.xlu0 %v4457_v44, %s6977_s0 }
0x2776   :  { %4552 = vrot.lane.b32.xlu1 %v4349_v60, %s6977_s0 }
0x277a   :  { %4550 = vrot.lane.b32.xlu1 %v4348_v45, %s6977_s0 }
0x27e0   :  { %v4440_v39 = vpop.xlane.xlu0 %4439 }
0x27e1   :  { %v4442_v49 = vsub.f32 %v4434_v24, %v4440_v39 }
0x27e2   :  { %v4437_v16 = vpop.xlane.xlu1 %4436 }
0x27e3   :  { %v4441_v57 = vsub.f32 %v4433_v31, %v4437_v16  ;;  %v4445_v1 = vmul.f32 1.442695, %v4442_v49 }
0x27e4   :  { %v4331_v46 = vpop.xlane.xlu0 %4330 }
0x27e5   :  { %v4333_v48 = vsub.f32 %v4325_v30, %v4331_v46  ;;  %v4443_v2 = vmul.f32 1.442695, %v4441_v57 }
0x27e6   :  { %v4328_v51 = vpop.xlane.xlu1 %4327 }
0x27e7   :  { %v4336_v52 = vmul.f32 1.442695, %v4333_v48  ;;  %v4332_v47 = vsub.f32 %v4324_v63, %v4328_v51  ;;  %v4744_v63 = vmul.f32 %v8089_v12, %v7305_v40 }
0x27e8   :  { %v4727_v53 = vpop.xlane.xlu0 %4726 }
0x27e9   :  { %6933 = vpow2.f32 %v4336_v52  ;;  %v4334_v58 = vmul.f32 1.442695, %v4332_v47  ;;  %v4729_v0 = vsub.f32 %v4721_v34, %v4727_v53 }
0x27ea   :  { %v4724_v42 = vpop.xlane.xlu1 %4723 }
0x27eb   :  { %6935 = vpow2.f32 %v4334_v58  ;;  %v4732_v23 = vmul.f32 1.442695, %v4729_v0  ;;  %v4728_v38 = vsub.f32 %v4720_v41, %v4724_v42  ;;  %v4837_v58 = vmul.f32 %v7324_v5, %v8089_v12 }
0x27ec   :  { %v4462_v13 = vpop.permute.xlu0 %4461  ;;  %v4838_v0 = vmul.f32 %v8085_v4, %v7324_v5 }
0x27ed   :  { %6937 = vpow2.f32 %v4732_v23  ;;  %v4730_v8 = vmul.f32 1.442695, %v4728_v38 }
0x27ee   :  { %6939 = vpow2.f32 %v4445_v1  ;;  %v4464_v35 = vpop.permute.xlu1 %4463 }
0x27ef   :  { %6941 = vpow2.f32 %v4730_v8  ;;  %6647 = vmatprep.subr.mxu1 %v4464_v35 }
0x27f0   :  { %6648 = vmatpush3.msra.mxu1 %v4464_v35  ;;  %6943 = vpow2.f32 %v4443_v2 }
0x27f1   :  { %6649 = vmatprep.subr.mxu1 %v4462_v13 }
0x27f2   :  { %6650 = vmatpush3.msra.mxu1 %v4462_v13  ;;  %v4553_v15 = vpop.permute.xlu1 %4552 }
0x27f3   :  { %6654 = vmatprep.subr.mxu1 %v4553_v15 }
0x27f6   :  { %v6934_v17 = vpop.eup %6933  ;;  %v4551_v32 = vpop.permute.xlu1 %4550 }
0x27f7   :  { %v4341_v11 = vsel %vm541_vm11, %v6934_v17, 0.0 }
0x27f8   :  { %v6936_v62 = vpop.eup %6935  ;;  %4342 = vadd.xlane.f32.xlu0 %v4341_v11 }
0x27f9   :  { %v4338_v20 = vsel %vm541_vm11, %v6936_v62, 0.0 }
0x27fa   :  { %v6938_v21 = vpop.eup %6937  ;;  %4339 = vadd.xlane.f32.xlu1 %v4338_v20 }
0x27fb   :  { %v6940_v24 = vpop.eup %6939  ;;  %v4737_v26 = vsel %vm541_vm11, %v6938_v21, 0.0 }
0x27fc   :  { %v6942_v27 = vpop.eup %6941  ;;  %4738 = vadd.xlane.f32.xlu0 %v4737_v26  ;;  %v4450_v31 = vsel %vm541_vm11, %v6940_v24, 0.0 }
0x27fd   :  { %v4734_v7 = vsel %vm541_vm11, %v6942_v27, 0.0  ;;  %v6944_v30 = vpop.eup %6943 }
0x27fe   :  { %4735 = vadd.xlane.f32.xlu1 %v4734_v7  ;;  %v4447_v18 = vsel %vm541_vm11, %v6944_v30, 0.0 }
0x2800   :  { %4451 = vadd.xlane.f32.xlu0 %v4450_v31 }
0x2802   :  { %4448 = vadd.xlane.f32.xlu1 %v4447_v18 }
0x2813   :  { %4748 = vrot.lane.b32.xlu1 %v4744_v63, %s6977_s0 }
0x2816   :  { %4750 = vrot.lane.b32.xlu0 %v4745_v19, %s6977_s0  ;;  %v4944_v19 = vmul.f32 %v8089_v12, %v7351_v33  ;;  %v5820_v12 = vld [vmem:[%s8435_s4 + $0x68] sm:$0xff] }
0x2881   :  { %v4343_v34 = vpop.xlane.xlu0 %4342 }
0x2883   :  { %v4340_v37 = vpop.xlane.xlu1 %4339 }
0x2884   :  { %6945 = vrcp.f32 %v4340_v37 }
0x2885   :  { %v4739_v41 = vpop.xlane.xlu0 %4738 }
0x2887   :  { %v4736_v10 = vpop.xlane.xlu1 %4735 }
0x2889   :  { %v4452_v43 = vpop.xlane.xlu0 %4451 }
0x288a   :  { %6947 = vrcp.f32 %v4452_v43 }
0x288b   :  { %v4449_v9 = vpop.xlane.xlu1 %4448 }
0x288c   :  { %6949 = vrcp.f32 %v4449_v9 }
0x288d   :  { %6951 = vrcp.f32 %v4343_v34  ;;  %v4751_v52 = vpop.permute.xlu0 %4750 }
0x288e   :  { %6953 = vrcp.f32 %v4736_v10 }
0x288f   :  { %6955 = vrcp.f32 %v4739_v41  ;;  %v4749_v53 = vpop.permute.xlu1 %4748  ;;  %v5822_v41 = vld [vmem:[%s8435_s4 + $0x78] sm:$0xff] }
0x2891   :  { %v6946_v44 = vpop.eup %6945 }
0x2892   :  { %v4346_v46 = vmul.f32 %v6946_v44, %v6936_v62 }
0x2897   :  { %v6948_v60 = vpop.eup %6947 }
0x2898   :  { %v4456_v40 = vmul.f32 %v6948_v60, %v6940_v24  ;;  %v5819_v60 = vld [vmem:[%s8435_s4 + $0x60] sm:$0xff] }
0x2899   :  { %v6950_v45 = vpop.eup %6949 }
0x289a   :  { %v4455_v39 = vmul.f32 %v6950_v45, %v6944_v30  ;;  %v6952_v16 = vpop.eup %6951 }
0x289b   :  { %v6954_v48 = vpop.eup %6953  ;;  %v4347_v49 = vmul.f32 %v6952_v16, %v6934_v17 }
0x289c   :  { %6651 = vmatprep.mubr.msk.f32.mxu1 %vm541_vm11, %v4455_v39  ;;  %v6956_v51 = vpop.eup %6955  ;;  %v4742_v47 = vmul.f32 %v6954_v48, %v6942_v27 }
0x289d   :  { %6652 = vmatmul.mubr.msk.f32.vlgmr.msra.gmra.mxu1 %vm541_vm11, %v4456_v40  ;;  %v4743_v57 = vmul.f32 %v6956_v51, %v6938_v21  ;;  %v4945_v21 = vmul.f32 %v8085_v4, %v7351_v33  ;;  %v5821_v33 = vld [vmem:[%s8435_s4 + $0x70] sm:$0xff] }
0x289e   :  { %6655 = vmatpush3.msra.mxu1 %v4553_v15  ;;  %6658 = vmatprep.mubr.msk.f32.mxu1 %vm541_vm11, %v4346_v46  ;;  %v5123_v46 = vrot.slane %v8077_v50, %v7380_v3 }
0x289f   :  { %6656 = vmatprep.subr.mxu1 %v4551_v32 }
0x28a0   :  { %6657 = vmatpush3.msra.mxu1 %v4551_v32 }
0x28a1   :  { %6668 = vmatprep.subr.mxu1 %v4751_v52  ;;  %6659 = vmatmul.mubr.msk.f32.vlgmr.msra.gmra.mxu1 %vm541_vm11, %v4347_v49 }
0x28a2   :  { %6669 = vmatpush3.msra.mxu1 %v4751_v52  ;;  %6672 = vmatprep.mubr.msk.f32.mxu1 %vm541_vm11, %v4742_v47 }
0x28a3   :  { %6670 = vmatprep.subr.mxu1 %v4749_v53 }
0x28a4   :  { %6671 = vmatpush3.msra.mxu1 %v4749_v53 }
0x28a5   :  { %6675 = vmatprep.subr.msk.mxu1 %vm106_vm1, %v8099_v54  ;;  %6673 = vmatmul.mubr.msk.f32.vlgmr.msra.gmra.mxu1 %vm541_vm11, %v4743_v57 }
0x28a6   :  { %6676 = vmatpush3.xpose.msk.msra.mxu1 %vm106_vm1, %v8099_v54  ;;  %6679 = vmatprep.mubr.msk.f32.mxu1 %vm106_vm1, %v4837_v58 }
0x28a7   :  { %6677 = vmatprep.subr.msk.mxu1 %vm106_vm1, %v8109_v6 }
0x28aa   :  { %6678 = vmatpush3.xpose.msk.msra.mxu1 %vm106_vm1, %v8109_v6 }
0x28ad   :  { %6680 = vmatmul.mubr.msk.f32.vlgmr.msra.gmra.mxu1 %vm106_vm1, %v4838_v0 }
0x295d   :  { %v6653_v1 = vpop.f32.mrf.mxu1 }
0x295f   :  { %v4539_v42 = vpop.f32.mrf.mxu1 }
0x2961   :  { %v6660_v23 = vpop.f32.mrf.mxu1 }
0x2962   :  { %v4634_v38 = vadd.f32 %v6660_v23, %v6653_v1 }
0x2963   :  { %v4628_v2 = vpop.f32.mrf.mxu1 }
0x2964   :  { %v4629_v8 = vadd.f32 %v4628_v2, %v4539_v42 }
0x2965   :  { %v6674_v54 = vpop.f32.mrf.mxu1 }
0x2966   :  { %v4836_v35 = vadd.f32 %v6674_v54, %v4634_v38 }
0x2967   :  { %v4826_v13 = vpop.f32.mrf.mxu1 }
0x2968   :  { %v4835_v15 = vadd.f32 %v4826_v13, %v4629_v8  ;;  %v5825_v13 = vld [vmem:[%s8436_s5 + $0x70] sm:$0xff] }
0x296d   :  { %v6681_v17 = vpop.f32.mrf.mxu1 }
0x296e   :  { %v4921_v11 = vsel %vm7224_vm10, %v6681_v17, -inf  ;;  %v5823_v17 = vld [vmem:[%s8436_s5 + $0x60] sm:$0xff] }
0x296f   :  { %v4925_v6 = vsel %vm541_vm11, %v4921_v11, -inf  ;;  %v4911_v62 = vpop.f32.mrf.mxu1 }
0x2970   :  { %v4920_v5 = vsel %vm7232_vm12, %v4911_v62, -inf  ;;  %4926 = vmax.xlane.f32.xlu1 %v4925_v6  ;;  %v5841_v6 = vld [vmem:[%s8437_s6 + $0x1f0] sm:$0xff]  ;;  %v5840_v62 = vld [vmem:[%s8437_s6 + $0x1e8] sm:$0xff] }
0x2971   :  { %v4922_v20 = vsel %vm541_vm11, %v4920_v5, -inf }
0x2972   :  { %4923 = vmax.xlane.f32.xlu0 %v4922_v20  ;;  %v5838_v20 = vld [vmem:[%s8437_s6 + $0x1d8] sm:$0xff] }
0x2981   :  { %4950 = vrot.lane.b32.xlu1 %v4945_v21, %s6977_s0  ;;  %v5837_v21 = vld [vmem:[%s8437_s6 + $0x1d0] sm:$0xff] }
0x29f9   :  { %v4927_v24 = vpop.xlane.xlu1 %4926 }
0x29fa   :  { %v4929_v26 = vsub.f32 %v4921_v11, %v4927_v24  ;;  %v5842_v11 = vld [vmem:[%s8437_s6 + $0x1f8] sm:$0xff]  ;;  %v5836_v24 = vld [vmem:[%s8437_s6 + $0x1c8] sm:$0xff] }
0x29fb   :  { %v4924_v27 = vpop.xlane.xlu0 %4923 }
0x29fc   :  { %v4932_v25 = vmul.f32 1.442695, %v4929_v26  ;;  %v4928_v7 = vsub.f32 %v4920_v5, %v4924_v27  ;;  %v5839_v5 = vld [vmem:[%s8437_s6 + $0x1e0] sm:$0xff]  ;;  %v5834_v27 = vld [vmem:[%s8437_s6 + $0x1b8] sm:$0xff] }
0x29fd   :  { %v4951_v30 = vpop.permute.xlu1 %4950  ;;  %v5835_v26 = vld [vmem:[%s8437_s6 + $0x1c0] sm:$0xff] }
0x29fe   :  { %6957 = vpow2.f32 %v4932_v25  ;;  %v4930_v31 = vmul.f32 1.442695, %v4928_v7  ;;  %6682 = vmatprep.subr.mxu0 %v4951_v30  ;;  %v5833_v25 = vld [vmem:[%s8437_s6 + $0x1b0] sm:$0xff]  ;;  %v5832_v7 = vld [vmem:[%s8437_s6 + $0x1a8] sm:$0xff] }
0x29ff   :  { %6683 = vmatpush3.msra.mxu0 %v4951_v30  ;;  %v5831_v30 = vld [vmem:[%s8437_s6 + $0x1a0] sm:$0xff] }
0x2a00   :  { %6959 = vpow2.f32 %v4930_v31 }
0x2a0b   :  { %v6958_v28 = vpop.eup %6957 }
0x2a0c   :  { %v4937_v18 = vsel %vm541_vm11, %v6958_v28, 0.0 }
0x2a0d   :  { %v6960_v63 = vpop.eup %6959  ;;  %4938 = vadd.xlane.f32.xlu0 %v4937_v18 }
0x2a0e   :  { %v4934_v4 = vsel %vm541_vm11, %v6960_v63, 0.0 }
0x2a11   :  { %4935 = vadd.xlane.f32.xlu0 %v4934_v4 }
0x2a27   :  { %4948 = vrot.lane.b32.xlu0 %v4944_v19, %s6977_s0 }
0x2a96   :  { %v4939_v32 = vpop.xlane.xlu0 %4938 }
0x2a97   :  { %6961 = vrcp.f32 %v4939_v32 }
0x2a9a   :  { %v4936_v34 = vpop.xlane.xlu0 %4935 }
0x2a9b   :  { %6963 = vrcp.f32 %v4936_v34  ;;  %v5155_v34 = vrot.slane %v8077_v50, %v7455_v55  ;;  %v5830_v55 = vld [vmem:[%s8437_s6 + $0x198] sm:$0xff] }
0x2a9e   :  { %v4949_v37 = vpop.permute.xlu0 %4948 }
0x2a9f   :  { %6684 = vmatprep.subr.mxu0 %v4949_v37 }
0x2aa0   :  { %6685 = vmatpush3.msra.mxu0 %v4949_v37 }
0x2aa1   :  { %6689 = vmatprep.subr.mxu0 %v5822_v41 }
0x2aa4   :  { %v6962_v10 = vpop.eup %6961 }
0x2aa5   :  { %v4943_v44 = vmul.f32 %v6962_v10, %v6958_v28 }
0x2aa8   :  { %v6964_v43 = vpop.eup %6963 }
0x2aa9   :  { %v4942_v9 = vmul.f32 %v6964_v43, %v6960_v63 }
0x2aab   :  { %6686 = vmatprep.mubr.msk.f32.mxu0 %vm541_vm11, %v4942_v9  ;;  %v5161_v9 = vrot.slane %v8077_v50, %v7458_v56  ;;  %v5828_v56 = vld [vmem:[%s8437_s6 + $0x188] sm:$0xff] }
0x2aac   :  { %6687 = vmatmul.mubr.msk.f32.vlgmr.msra.gmra.mxu0 %vm541_vm11, %v4943_v44 }
0x2aad   :  { %6690 = vmatpush3.msra.mxu0 %v5822_v41 }
0x2aae   :  { %6691 = vmatprep.subr.mxu0 %v5821_v33 }
0x2aaf   :  { %6692 = vmatpush3.msra.mxu0 %v5821_v33 }
0x2ab0   :  { %6693 = vmatprep.subr.mxu0 %v5820_v12 }
0x2ab1   :  { %6694 = vmatpush3.msra.mxu0 %v5820_v12 }
0x2ab2   :  { %6695 = vmatprep.subr.mxu0 %v5819_v60 }
0x2ab3   :  { %6696 = vmatpush3.msra.mxu0 %v5819_v60  ;;  %v5829_v60 = vld [vmem:[%s8437_s6 + $0x190] sm:$0xff] }
0x2ab4   :  { %6711 = vmatprep.subr.mxu0 %v5842_v11 }
0x2b6c   :  { %v6688_v45 = vpop.f32.mrf.mxu0 }
0x2b6d   :  { %v5036_v16 = vadd.f32 %v6688_v45, %v4836_v35  ;;  %v5826_v35 = vld [vmem:[%s8436_s5 + $0x78] sm:$0xff]  ;;  %v5827_v45 = vld [vmem:[%s8437_s6 + $0x180] sm:$0xff] }
0x2b6e   :  { %v5026_v39 = vpop.f32.mrf.mxu0  ;;  %6700 = vmatprep.subr.mxu1 %v5826_v35 }
0x2b6f   :  { %v5035_v40 = vadd.f32 %v5026_v39, %v4835_v15  ;;  %6701 = vmatpush3.msra.mxu1 %v5826_v35  ;;  %v5824_v15 = vld [vmem:[%s8436_s5 + $0x68] sm:$0xff]  ;;  %v5167_v39 = vrot.slane %v8077_v50, %v7481_v14 }
0x2b70   :  { %6702 = vmatprep.subr.mxu1 %v5825_v13 }
0x2b71   :  { %6697 = vmatprep.mubr.msk.f32.mxu0 %vm106_vm1, %v5035_v40  ;;  %6703 = vmatpush3.msra.mxu1 %v5825_v13 }
0x2b72   :  { %6698 = vmatmul.mubr.msk.f32.vlgmr.msra.gmra.mxu0 %vm106_vm1, %v5036_v16  ;;  %6704 = vmatprep.subr.mxu1 %v5824_v15 }
0x2b73   :  { %6705 = vmatpush3.msra.mxu1 %v5824_v15  ;;  %6712 = vmatpush3.msra.mxu0 %v5842_v11  ;;  %v5375_v11 = vld [vmem:[%s8438_s8 + $0x10] sm:$0xff] }
0x2b74   :  { %6706 = vmatprep.subr.mxu1 %v5823_v17  ;;  %6713 = vmatprep.subr.mxu0 %v5841_v6 }
0x2b75   :  { %6707 = vmatpush3.msra.mxu1 %v5823_v17  ;;  %6714 = vmatpush3.msra.mxu0 %v5841_v6  ;;  %v5376_v17 = vld [vmem:[%s8438_s8 + $0x18] sm:$0xff]  ;;  %v5374_v6 = vld [vmem:[%s8438_s8 + $0x8] sm:$0xff] }
0x2b76   :  { %6715 = vmatprep.subr.mxu0 %v5840_v62  ;;  %6746 = vmatprep.subr.mxu1 %v5376_v17 }
0x2b77   :  { %6716 = vmatpush3.msra.mxu0 %v5840_v62  ;;  %v5373_v62 = vld [vmem:[%s8438_s8] sm:$0xff] }
0x2b78   :  { %6717 = vmatprep.subr.mxu0 %v5839_v5 }
0x2b79   :  { %6718 = vmatpush3.msra.mxu0 %v5839_v5  ;;  %v5479_v5 = vld [vmem:[%s8439_s9 + $0x78] sm:$0xff] }
0x2b7a   :  { %6719 = vmatprep.subr.mxu0 %v5838_v20 }
0x2b7b   :  { %6720 = vmatpush3.msra.mxu0 %v5838_v20 }
0x2b7c   :  { %6721 = vmatprep.subr.mxu0 %v5837_v21 }
0x2b7d   :  { %6722 = vmatpush3.msra.mxu0 %v5837_v21 }
0x2b7e   :  { %6723 = vmatprep.subr.mxu0 %v5836_v24 }
0x2b7f   :  { %6724 = vmatpush3.msra.mxu0 %v5836_v24 }
0x2b80   :  { %6725 = vmatprep.subr.mxu0 %v5835_v26 }
0x2b81   :  { %6726 = vmatpush3.msra.mxu0 %v5835_v26 }
0x2b82   :  { %6727 = vmatprep.subr.mxu0 %v5834_v27 }
0x2b83   :  { %6728 = vmatpush3.msra.mxu0 %v5834_v27 }
0x2b84   :  { %6729 = vmatprep.subr.mxu0 %v5833_v25 }
0x2b85   :  { %6730 = vmatpush3.msra.mxu0 %v5833_v25 }
0x2b86   :  { %6731 = vmatprep.subr.mxu0 %v5832_v7 }
0x2b87   :  { %6732 = vmatpush3.msra.mxu0 %v5832_v7  ;;  %v8351_v7 = vld [vmem:[%s8440_s11] sm:$0xff] }
0x2b88   :  { %6733 = vmatprep.subr.mxu0 %v5831_v30 }
0x2b89   :  { %6734 = vmatpush3.msra.mxu0 %v5831_v30 }
0x2b8a   :  { %6735 = vmatprep.subr.mxu0 %v5830_v55 }
0x2b8b   :  { %6736 = vmatpush3.msra.mxu0 %v5830_v55  ;;  %v5469_v55 = vld [vmem:[%s8439_s9 + $0x28] sm:$0xff] }
0x2b8c   :  { %6737 = vmatprep.subr.mxu0 %v5829_v60 }
0x2b8d   :  { %6738 = vmatpush3.msra.mxu0 %v5829_v60  ;;  %v5468_v60 = vld [vmem:[%s8439_s9 + $0x20] sm:$0xff] }
0x2b8e   :  { %6739 = vmatprep.subr.mxu0 %v5828_v56 }
0x2b8f   :  { %6740 = vmatpush3.msra.mxu0 %v5828_v56  ;;  %v5467_v56 = vld [vmem:[%s8439_s9 + $0x18] sm:$0xff] }
0x2b90   :  { %6741 = vmatprep.subr.mxu0 %v5827_v45 }
0x2b91   :  { %6742 = vmatpush3.msra.mxu0 %v5827_v45  ;;  %v5466_v45 = vld [vmem:[%s8439_s9 + $0x10] sm:$0xff] }
0x2c32   :  { %v6699_v48 = vpop.f32.mrf.mxu0 }
0x2c33   :  { %v5119_v49 = vadd.f32 %v6699_v48, %v8049_v22 }
0x2c34   :  { %v5109_v51 = vpop.f32.mrf.mxu0 }
0x2c35   :  { %v8234_v52 = vadd.f32 %v5123_v46, %v5119_v49  ;;  %v5118_v47 = vadd.f32 %v5109_v51, %v8052_v36 }
0x2c37   :  { %v8237_v53 = vadd.f32 %v5123_v46, %v5118_v47  ;;  %v5129_v57 = vsel %vm106_vm1, %v8234_v52, 0.0  ;;  %v5331_v47 = vrot.slane %v8077_v50, %v7486_v29 }
0x2c38   :  { %5130 = vadd.xlane.f32.xlu0 %v5129_v57 }
0x2c39   :  { %v5126_v58 = vsel %vm106_vm1, %v8237_v53, 0.0 }
0x2c3a   :  { %5127 = vadd.xlane.f32.xlu1 %v5126_v58 }
0x2cc1   :  { %v5131_v0 = vpop.xlane.xlu0 %5130 }
0x2cc2   :  { %v5133_v1 = vmul.f32 0.03125, %v5131_v0 }
0x2cc3   :  { %v5128_v42 = vpop.xlane.xlu1 %5127 }
0x2cc4   :  { %v8244_v22 = vsub.f32 %v8234_v52, %v5133_v1  ;;  %v5132_v23 = vmul.f32 0.03125, %v5128_v42 }
0x2cc6   :  { %v8247_v38 = vsub.f32 %v8237_v53, %v5132_v23  ;;  %v5137_v36 = vmul.f32 %v8244_v22, %v8244_v22 }
0x2cc8   :  { %v5141_v2 = vsel %vm106_vm1, %v5137_v36, 0.0  ;;  %v5136_v8 = vmul.f32 %v8247_v38, %v8247_v38 }
0x2cc9   :  { %5142 = vadd.xlane.f32.xlu0 %v5141_v2 }
0x2cca   :  { %v5138_v54 = vsel %vm106_vm1, %v5136_v8, 0.0 }
0x2ccb   :  { %5139 = vadd.xlane.f32.xlu1 %v5138_v54 }
0x2d52   :  { %v5143_v31 = vpop.xlane.xlu0 %5142 }
0x2d53   :  { %v5145_v28 = vmul.f32 0.03125, %v5143_v31  ;;  %v5364_v31 = vrot.slane %v8351_v7, %v7380_v3  ;;  %v5477_v3 = vld [vmem:[%s8439_s9 + $0x68] sm:$0xff] }
0x2d54   :  { %v5140_v18 = vpop.xlane.xlu1 %5139 }
0x2d55   :  { %v5147_v63 = vadd.f32 1e-05, %v5145_v28  ;;  %v5144_v4 = vmul.f32 0.03125, %v5140_v18 }
0x2d57   :  { %6965 = vrsqrt.f32 %v5147_v63  ;;  %v5146_v19 = vadd.f32 1e-05, %v5144_v4 }
0x2d59   :  { %6967 = vrsqrt.f32 %v5146_v19  ;;  %v5370_v19 = vrot.slane %v8351_v7, %v7486_v29  ;;  %v5476_v29 = vld [vmem:[%s8439_s9 + $0x60] sm:$0xff] }
0x2d64   :  { %v6966_v32 = vpop.eup %6965 }
0x2d65   :  { %v5151_v37 = vmul.f32 %v6966_v32, %v8244_v22 }
0x2d66   :  { %v6968_v41 = vpop.eup %6967 }
0x2d67   :  { %v5150_v10 = vmul.f32 %v6968_v41, %v8247_v38  ;;  %v5157_v43 = vmul.f32 %v5155_v34, %v5151_v37  ;;  %v5478_v41 = vld [vmem:[%s8439_s9 + $0x70] sm:$0xff] }
0x2d69   :  { %v5156_v44 = vmul.f32 %v5155_v34, %v5150_v10  ;;  %v5163_v12 = vadd.f32 %v5161_v9, %v5157_v43  ;;  %v5475_v10 = vld [vmem:[%s8439_s9 + $0x58] sm:$0xff]  ;;  %v5474_v43 = vld [vmem:[%s8439_s9 + $0x50] sm:$0xff] }
0x2d6b   :  { %v5162_v33 = vadd.f32 %v5161_v9, %v5156_v44  ;;  %v5473_v9 = vld [vmem:[%s8439_s9 + $0x48] sm:$0xff]  ;;  %v5472_v44 = vld [vmem:[%s8439_s9 + $0x40] sm:$0xff] }
0x2d6d   :  { %6708 = vmatprep.mubr.msk.f32.mxu1 %vm106_vm1, %v5162_v33  ;;  %v5471_v33 = vld [vmem:[%s8439_s9 + $0x38] sm:$0xff] }
0x2d6e   :  { %6709 = vmatmul.mubr.msk.f32.vlgmr.msra.gmra.mxu1 %vm106_vm1, %v5163_v12  ;;  %v5470_v12 = vld [vmem:[%s8439_s9 + $0x30] sm:$0xff] }
0x2d6f   :  { %6747 = vmatpush3.msra.mxu1 %v5376_v17 }
0x2d70   :  { %6748 = vmatprep.subr.mxu1 %v5375_v11 }
0x2d71   :  { %6749 = vmatpush3.msra.mxu1 %v5375_v11 }
0x2d72   :  { %6750 = vmatprep.subr.mxu1 %v5374_v6 }
0x2d73   :  { %6751 = vmatpush3.msra.mxu1 %v5374_v6 }
0x2d74   :  { %6752 = vmatprep.subr.mxu1 %v5373_v62 }
0x2d75   :  { %6753 = vmatpush3.msra.mxu1 %v5373_v62 }
0x2d76   :  { %6757 = vmatprep.subr.mxu1 %v5479_v5 }
0x2e2e   :  { %v6710_v40 = vpop.f32.mrf.mxu1 }
0x2e2f   :  { %v5246_v16 = vadd.f32 %v6710_v40, %v5167_v39  ;;  %v5464_v40 = vld [vmem:[%s8439_s9] sm:$0xff] }
0x2e30   :  { %v5240_v46 = vpop.f32.mrf.mxu1 }
0x2e31   :  { %v5241_v48 = vadd.f32 %v5240_v46, %v5167_v39  ;;  %v5250_v51 = vmax.f32 %v5246_v16, 0.0  ;;  %v5465_v39 = vld [vmem:[%s8439_s9 + $0x8] sm:$0xff]  ;;  %v5562_v16 = vld [vmem:[%s8441_s10 + $0x18] sm:$0xff]  ;;  %v5380_v46 = vrot.slane %v8351_v7, %v7481_v14  ;;  %v5559_v14 = vld [vmem:[%s8441_s10] sm:$0xff] }
0x2e32   :  { %6792 = vmatprep.subr.mxu0 %v5562_v16 }
0x2e33   :  { %v5249_v49 = vmax.f32 %v5241_v48, 0.0 }
0x2e35   :  { %6743 = vmatprep.mubr.f32.mxu0 %v5249_v49 }
0x2e36   :  { %6744 = vmatmul.mubr.f32.vlgmr.msra.gmra.mxu0 %v5250_v51 }
0x2e37   :  { %6793 = vmatpush3.msra.mxu0 %v5562_v16 }
0x2ef6   :  { %v6745_v57 = vpop.f32.mrf.mxu0 }
0x2ef7   :  { %v5327_v58 = vadd.f32 %v6745_v57, %v8234_v52 }
0x2ef8   :  { %v5317_v0 = vpop.f32.mrf.mxu0 }
0x2ef9   :  { %v5333_v1 = vadd.f32 %v5331_v47, %v5327_v58  ;;  %v5326_v42 = vadd.f32 %v5317_v0, %v8237_v53  ;;  %v5561_v0 = vld [vmem:[%s8441_s10 + $0x10] sm:$0xff] }
0x2efa   :  { %6794 = vmatprep.subr.mxu0 %v5561_v0 }
0x2efb   :  { %v5332_v22 = vadd.f32 %v5331_v47, %v5326_v42  ;;  %v5338_v23 = vsel %vm106_vm1, %v5333_v1, 0.0  ;;  %6795 = vmatpush3.msra.mxu0 %v5561_v0  ;;  %v5483_v42 = vrot.slane %v8351_v7, %v7145_v59 }
0x2efc   :  { %5339 = vadd.xlane.f32.xlu0 %v5338_v23 }
0x2efd   :  { %v5335_v38 = vsel %vm106_vm1, %v5332_v22, 0.0 }
0x2efe   :  { %5336 = vadd.xlane.f32.xlu1 %v5335_v38 }
0x2f85   :  { %v5340_v36 = vpop.xlane.xlu0 %5339 }
0x2f86   :  { %v5342_v2 = vmul.f32 0.03125, %v5340_v36 }
0x2f87   :  { %v5337_v8 = vpop.xlane.xlu1 %5336 }
0x2f88   :  { %v5344_v54 = vsub.f32 %v5333_v1, %v5342_v2  ;;  %v5341_v35 = vmul.f32 0.03125, %v5337_v8  ;;  %v5560_v1 = vld [vmem:[%s8441_s10 + $0x8] sm:$0xff]  ;;  %v5566_v2 = vrot.slane %v8351_v7, %v7153_v61 }
0x2f89   :  { %6796 = vmatprep.subr.mxu0 %v5560_v1 }
0x2f8a   :  { %v5343_v50 = vsub.f32 %v5332_v22, %v5341_v35  ;;  %v5346_v13 = vmul.f32 %v5344_v54, %v5344_v54  ;;  %6797 = vmatpush3.msra.mxu0 %v5560_v1 }
0x2f8b   :  { %6798 = vmatprep.subr.mxu0 %v5559_v14 }
0x2f8c   :  { %v5350_v52 = vsel %vm106_vm1, %v5346_v13, 0.0  ;;  %v5345_v15 = vmul.f32 %v5343_v50, %v5343_v50  ;;  %6799 = vmatpush3.msra.mxu0 %v5559_v14 }
0x2f8d   :  { %5351 = vadd.xlane.f32.xlu0 %v5350_v52 }
0x2f8e   :  { %v5347_v53 = vsel %vm106_vm1, %v5345_v15, 0.0 }
0x2f8f   :  { %5348 = vadd.xlane.f32.xlu1 %v5347_v53 }
0x3016   :  { %v5352_v20 = vpop.xlane.xlu0 %5351 }
0x3017   :  { %v5354_v21 = vmul.f32 0.03125, %v5352_v20 }
0x3018   :  { %v5349_v24 = vpop.xlane.xlu1 %5348 }
0x3019   :  { %v5356_v26 = vadd.f32 1e-05, %v5354_v21  ;;  %v5353_v27 = vmul.f32 0.03125, %v5349_v24 }
0x301b   :  { %6969 = vrsqrt.f32 %v5356_v26  ;;  %v5355_v25 = vadd.f32 1e-05, %v5353_v27 }
0x301d   :  { %6971 = vrsqrt.f32 %v5355_v25 }
0x3028   :  { %v6970_v30 = vpop.eup %6969 }
0x3029   :  { %v5360_v28 = vmul.f32 %v6970_v30, %v5344_v54 }
0x302a   :  { %v6972_v18 = vpop.eup %6971 }
0x302b   :  { %v5359_v63 = vmul.f32 %v6972_v18, %v5343_v50  ;;  %v5366_v4 = vmul.f32 %v5364_v31, %v5360_v28 }
0x302d   :  { %v5365_v32 = vmul.f32 %v5364_v31, %v5359_v63  ;;  %v5372_v37 = vadd.f32 %v5370_v19, %v5366_v4 }
0x302f   :  { %v5371_v34 = vadd.f32 %v5370_v19, %v5365_v32 }
0x3031   :  { %6754 = vmatprep.mubr.msk.f32.mxu1 %vm106_vm1, %v5371_v34 }
0x3032   :  { %6755 = vmatmul.mubr.msk.f32.vlgmr.msra.gmra.mxu1 %vm106_vm1, %v5372_v37 }
0x3033   :  { %6758 = vmatpush3.msra.mxu1 %v5479_v5 }
0x3034   :  { %6759 = vmatprep.subr.mxu1 %v5478_v41 }
0x3035   :  { %6760 = vmatpush3.msra.mxu1 %v5478_v41 }
0x3036   :  { %6761 = vmatprep.subr.mxu1 %v5477_v3 }
0x3037   :  { %6762 = vmatpush3.msra.mxu1 %v5477_v3 }
0x3038   :  { %6763 = vmatprep.subr.mxu1 %v5476_v29 }
0x3039   :  { %6764 = vmatpush3.msra.mxu1 %v5476_v29 }
0x303a   :  { %6765 = vmatprep.subr.mxu1 %v5475_v10 }
0x303b   :  { %6766 = vmatpush3.msra.mxu1 %v5475_v10 }
0x303c   :  { %6767 = vmatprep.subr.mxu1 %v5474_v43 }
0x303d   :  { %6768 = vmatpush3.msra.mxu1 %v5474_v43 }
0x303e   :  { %6769 = vmatprep.subr.mxu1 %v5473_v9 }
0x303f   :  { %6770 = vmatpush3.msra.mxu1 %v5473_v9 }
0x3040   :  { %6771 = vmatprep.subr.mxu1 %v5472_v44 }
0x3041   :  { %6772 = vmatpush3.msra.mxu1 %v5472_v44 }
0x3042   :  { %6773 = vmatprep.subr.mxu1 %v5471_v33 }
0x3043   :  { %6774 = vmatpush3.msra.mxu1 %v5471_v33 }
0x3044   :  { %6775 = vmatprep.subr.mxu1 %v5470_v12 }
0x3045   :  { %6776 = vmatpush3.msra.mxu1 %v5470_v12 }
0x3046   :  { %6777 = vmatprep.subr.mxu1 %v5469_v55 }
0x3047   :  { %6778 = vmatpush3.msra.mxu1 %v5469_v55 }
0x3048   :  { %6779 = vmatprep.subr.mxu1 %v5468_v60 }
0x3049   :  { %6780 = vmatpush3.msra.mxu1 %v5468_v60 }
0x304a   :  { %6781 = vmatprep.subr.mxu1 %v5467_v56 }
0x304b   :  { %6782 = vmatpush3.msra.mxu1 %v5467_v56 }
0x304c   :  { %6783 = vmatprep.subr.mxu1 %v5466_v45 }
0x304d   :  { %6784 = vmatpush3.msra.mxu1 %v5466_v45 }
0x304e   :  { %6785 = vmatprep.subr.mxu1 %v5465_v39 }
0x304f   :  { %6786 = vmatpush3.msra.mxu1 %v5465_v39 }
0x3050   :  { %6787 = vmatprep.subr.mxu1 %v5464_v40 }
0x3051   :  { %6788 = vmatpush3.msra.mxu1 %v5464_v40 }
0x30f2   :  { %v6756_v48 = vpop.f32.mrf.mxu1 }
0x30f3   :  { %v5459_v49 = vadd.f32 %v6756_v48, %v5380_v46 }
0x30f4   :  { %v5453_v51 = vpop.f32.mrf.mxu1 }
0x30f5   :  { %v5454_v47 = vadd.f32 %v5453_v51, %v5380_v46  ;;  %v5463_v58 = vmax.f32 %v5459_v49, 0.0 }
0x30f7   :  { %v5462_v57 = vmax.f32 %v5454_v47, 0.0 }
0x30f9   :  { %6789 = vmatprep.mubr.f32.mxu1 %v5462_v57 }
0x30fa   :  { %6790 = vmatmul.mubr.f32.vlgmr.msra.gmra.mxu1 %v5463_v58 }
0x31ba   :  { %v6791_v22 = vpop.f32.mrf.mxu1 }
0x31bb   :  { %v5556_v36 = vadd.f32 %v6791_v22, %v5483_v42 }
0x31bc   :  { %v5550_v23 = vpop.f32.mrf.mxu1 }
0x31bd   :  { %v5551_v38 = vadd.f32 %v5550_v23, %v5483_v42 }
0x31bf   :  { %6800 = vmatprep.mubr.msk.f32.mxu0 %vm106_vm1, %v5551_v38 }
0x31c0   :  { %6801 = vmatmul.mubr.msk.f32.vlgmr.msra.gmra.mxu0 %vm106_vm1, %v5556_v36 }
0x3280   :  { %v6802_v8 = vpop.f32.mrf.mxu0 }
0x3281   :  { %v5645_v54 = vadd.f32 %v6802_v8, %v5566_v2 }
0x3282   :  { %v5639_v35 = vpop.f32.mrf.mxu0 }
0x3283   :  { %5649 = vst [vmem:[%s8442_s12 + $0x8] sm:$0xff] %v5645_v54  ;;  %v5640_v50 = vadd.f32 %v5639_v35, %v5566_v2 }
0x3285   :  { %5648 = vst [vmem:[%s8442_s12] sm:$0xff] %v5640_v50 }

</bundles_post_ra>
